<compile_context>
chip_gen: v7x
topology: tpu7x:2x2x1
jax: 0.10.0
libtpu: 0.0.40
codegen_flags: <defaults>
</compile_context>

<pallas_src>
import functools

import jax
import jax.numpy as jnp
from jax.experimental import pallas as pl
from jax.experimental.pallas import tpu as pltpu


def _round_up(x, m):
    return ((x + m - 1) // m) * m


_TM_MAX_CACHE = None


def _tm_max_default():
    """v7x has 2 TensorCores/chip -> keep >=2 M-grid steps for M>=512.
    Single-TC parts (v5e/v6e) keep one big tile (no per-step overhead)."""
    global _TM_MAX_CACHE
    if _TM_MAX_CACHE is None:
        tm = 256
        try:
            kind = jax.devices()[0].device_kind.lower()
            if "v5" in kind or "v6" in kind:
                tm = 512
        except Exception:
            pass
        _TM_MAX_CACHE = tm
    return _TM_MAX_CACHE


# --------------------------------------------------------------------------
# Pallas kernel: fused  A @ W + b  (+ ReLU), f32 accumulate
# --------------------------------------------------------------------------
def _mm_bias_kernel(apply_relu, a_ref, w_ref, b_ref, o_ref):
    acc = jnp.dot(a_ref[...], w_ref[...], preferred_element_type=jnp.float32)
    acc = acc + b_ref[...]                      # (1, Np) f32 bias broadcasts
    if apply_relu:
        acc = jnp.maximum(acc, 0.0)
    o_ref[...] = acc.astype(o_ref.dtype)


def matmul_bias(a, w_p, b_p, *, relu=False, out_dtype=jnp.bfloat16,
                tm_max=None):
    """A(M,K) @ W(Kp,Np) + b -> (M, Np).

    A is zero-padded to Kp columns (matching the prepped weight); the output
    keeps the lane-padded N — callers trim lazily so the trim fuses into the
    consumer gather instead of an extra HBM copy.
    """
    if tm_max is None:
        tm_max = _tm_max_default()
    M, K = a.shape
    Kp, Np = w_p.shape
    a = a.astype(jnp.bfloat16)
    if Kp != K:
        a = jnp.pad(a, ((0, 0), (0, Kp - K)))
    TM = min(tm_max, _round_up(M, 16))
    Mp = _round_up(M, TM)
    if Mp != M:
        a = jnp.pad(a, ((0, Mp - M), (0, 0)))
    grid_m = Mp // TM

    out_itemsize = jnp.dtype(out_dtype).itemsize
    # Honest estimate: Pallas double-buffers EVERY operand by default.
    vmem_bytes = 2 * (TM * Kp * 2 + Kp * Np * 2 + Np * 4
                      + TM * Np * out_itemsize)
    vmem_bytes = int(min(max(vmem_bytes + (1 << 20), 8 << 20), 64 << 20))
    flops = 2 * Mp * Kp * Np
    bytes_accessed = (Mp * Kp * 2 + Kp * Np * 2 + Np * 4
                      + Mp * Np * out_itemsize)

    out = pl.pallas_call(
        functools.partial(_mm_bias_kernel, relu),
        out_shape=jax.ShapeDtypeStruct((Mp, Np), out_dtype),
        grid=(grid_m,),
        in_specs=[
            pl.BlockSpec((TM, Kp), lambda i: (i, 0)),
            pl.BlockSpec((Kp, Np), lambda i: (0, 0)),
            pl.BlockSpec((1, Np), lambda i: (0, 0)),
        ],
        out_specs=pl.BlockSpec((TM, Np), lambda i: (i, 0)),
        compiler_params=pltpu.CompilerParams(
            dimension_semantics=("parallel",),
            vmem_limit_bytes=vmem_bytes,
            # Allow XLA to fuse the im2col pad/slice/concat producer into the
            # A operand (avoid materializing the expanded matrix in HBM).
            allow_input_fusion=[True, False, False]),
        cost_estimate=pl.CostEstimate(
            flops=flops, transcendentals=0, bytes_accessed=bytes_accessed),
    )(a, w_p, b_p)
    if Mp != M:
        out = out[:M]
    return out


# --------------------------------------------------------------------------
# Pallas kernel: fc1 -> fc2 fused in one call (latent stays in VMEM/vregs)
# --------------------------------------------------------------------------
def _fc_fused_kernel(a_ref, w1_ref, b1_ref, w2_ref, b2_ref, o_ref):
    z = jnp.dot(a_ref[...], w1_ref[...], preferred_element_type=jnp.float32)
    z = (z + b1_ref[...]).astype(jnp.bfloat16)      # padded latent lanes stay 0
    out = jnp.dot(z, w2_ref[...], preferred_element_type=jnp.float32)
    out = out + b2_ref[...]
    o_ref[...] = out.astype(o_ref.dtype)


def fc1_fc2_fused(h, w1_p, b1_p, w2_p, b2_p, *, out_dtype=jnp.bfloat16):
    M, K = h.shape
    K1p, Lp = w1_p.shape
    N2p = w2_p.shape[1]
    h = h.astype(jnp.bfloat16)
    if K1p != K:
        h = jnp.pad(h, ((0, 0), (0, K1p - K)))
    Mp = _round_up(M, 16)
    if Mp != M:
        h = jnp.pad(h, ((0, Mp - M), (0, 0)))
    out_itemsize = jnp.dtype(out_dtype).itemsize
    vmem_bytes = 2 * (Mp * K1p * 2 + K1p * Lp * 2 + Lp * 4 + Lp * N2p * 2
                      + N2p * 4 + Mp * N2p * out_itemsize)
    vmem_bytes = int(min(max(vmem_bytes + (1 << 20), 8 << 20), 64 << 20))
    out = pl.pallas_call(
        _fc_fused_kernel,
        out_shape=jax.ShapeDtypeStruct((Mp, N2p), out_dtype),
        grid=(1,),
        in_specs=[
            pl.BlockSpec((Mp, K1p), lambda i: (0, 0)),
            pl.BlockSpec((K1p, Lp), lambda i: (0, 0)),
            pl.BlockSpec((1, Lp), lambda i: (0, 0)),
            pl.BlockSpec((Lp, N2p), lambda i: (0, 0)),
            pl.BlockSpec((1, N2p), lambda i: (0, 0)),
        ],
        out_specs=pl.BlockSpec((Mp, N2p), lambda i: (0, 0)),
        compiler_params=pltpu.CompilerParams(
            dimension_semantics=("arbitrary",),
            vmem_limit_bytes=vmem_bytes,
            allow_input_fusion=[True, False, False, False, False]),
        cost_estimate=pl.CostEstimate(
            flops=2 * Mp * K1p * Lp + 2 * Mp * Lp * N2p,
            transcendentals=0,
            bytes_accessed=(Mp * K1p * 2 + K1p * Lp * 2 + Lp * 4
                            + Lp * N2p * 2 + N2p * 4 + Mp * N2p * out_itemsize)),
    )(h, w1_p, b1_p, w2_p, b2_p)
    if Mp != M:
        out = out[:M]
    return out


# --------------------------------------------------------------------------
# NHWC conv / transposed-conv wrappers (im2col -> fused GEMM)
# --------------------------------------------------------------------------
def conv2d_nhwc(x, cin, wmat_p, bias_p, k, stride, padding, *, relu,
                out_dtype=jnp.bfloat16):
    """PyTorch Conv2d semantics on NHWC activations.

    `x` may carry lane-padded channels (only the first `cin` are real); the
    trim + spatial pad + k*k tap gather form one producer chain that XLA may
    fuse into the GEMM's A operand.
    """
    B, H, W, _ = x.shape
    xp = jnp.pad(x[..., :cin],
                 ((0, 0), (padding, padding), (padding, padding), (0, 0)))
    Hp, Wp = H + 2 * padding, W + 2 * padding
    OH = (Hp - k) // stride + 1
    OW = (Wp - k) // stride + 1
    cols = []
    for i in range(k):
        for j in range(k):
            cols.append(xp[:, i:i + stride * (OH - 1) + 1:stride,
                           j:j + stride * (OW - 1) + 1:stride, :])
    a = jnp.concatenate(cols, axis=-1).reshape(B * OH * OW, k * k * cin)
    out = matmul_bias(a, wmat_p, bias_p, relu=relu, out_dtype=out_dtype)
    return out.reshape(B, OH, OW, wmat_p.shape[1])      # lane-padded channels


def conv_transpose2d_nhwc(x, c_in, c_out, w_all_p, b_all_p, *, relu,
                          out_dtype=jnp.bfloat16):
    """ConvTranspose2d(k=3, stride=2, padding=1, output_padding=1), NHWC.

    Sub-pixel decomposition: the 4 output-parity phases share one 2x2/stride-1
    im2col matrix and are computed by a single GEMM with N = 4*c_out, then
    interleaved with a pixel shuffle (no zero-inserted dilated input).
    """
    B, H, W, _ = x.shape
    xp = jnp.pad(x[..., :c_in], ((0, 0), (0, 1), (0, 1), (0, 0)))
    cols = []
    for dr in range(2):
        for dc in range(2):
            cols.append(xp[:, dr:dr + H, dc:dc + W, :])
    a = jnp.concatenate(cols, axis=-1).reshape(B * H * W, 4 * c_in)
    out = matmul_bias(a, w_all_p, b_all_p, relu=relu, out_dtype=out_dtype)
    # TODO(synk): this pixel shuffle + the next layer's 2x2 gather compose into
    #             one static gather; currently left to XLA fusion under jit.
    out = out[:, :4 * c_out].reshape(B, H, W, 2, 2, c_out)
    out = out.transpose(0, 1, 3, 2, 4, 5).reshape(B, 2 * H, 2 * W, c_out)
    return out


# --------------------------------------------------------------------------
# Parameter init (PyTorch-style uniform bounds) + one-time weight prep
# --------------------------------------------------------------------------
def _init_conv(key, c_out, c_in, k):
    bound = 1.0 / jnp.sqrt(c_in * k * k)
    kw, kb = jax.random.split(key)
    w = jax.random.uniform(kw, (c_out, c_in, k, k), jnp.float32, -bound, bound)
    b = jax.random.uniform(kb, (c_out,), jnp.float32, -bound, bound)
    return w, b


def _init_convT(key, c_in, c_out, k):
    bound = 1.0 / jnp.sqrt(c_in * k * k)
    kw, kb = jax.random.split(key)
    w = jax.random.uniform(kw, (c_in, c_out, k, k), jnp.float32, -bound, bound)
    b = jax.random.uniform(kb, (c_out,), jnp.float32, -bound, bound)
    return w, b


def _init_linear(key, d_in, d_out):
    bound = 1.0 / jnp.sqrt(d_in)
    kw, kb = jax.random.split(key)
    w = jax.random.uniform(kw, (d_in, d_out), jnp.float32, -bound, bound)
    b = jax.random.uniform(kb, (d_out,), jnp.float32, -bound, bound)
    return w, b


def _prep_conv_w(w, b):
    """(Cout,Cin,k,k) -> (Kp, Np) bf16 GEMM weight (NHWC im2col order)."""
    Cout, Cin, k, _ = w.shape
    K = k * k * Cin
    wmat = w.transpose(2, 3, 1, 0).reshape(K, Cout)
    Kp = _round_up(K, 128)
    Np = _round_up(Cout, 128)
    wmat = jnp.pad(wmat, ((0, Kp - K), (0, Np - Cout))).astype(jnp.bfloat16)
    bmat = jnp.pad(b, (0, Np - Cout)).astype(jnp.float32).reshape(1, Np)
    return wmat, bmat


def _prep_convT_w(wT, b):
    """(Cin,Cout,3,3) ConvTranspose2d weight -> (Kp, Np) sub-pixel weight."""
    Cin, Cout, k, _ = wT.shape
    # TODO(synk): sub-pixel packing specialised to k=3, stride=2, p=1, op=1.
    assert k == 3, "sub-pixel transposed-conv prep assumes k=3/stride=2/p=1/op=1"
    taps = {0: [(1, 0)], 1: [(2, 0), (0, 1)]}   # parity -> [(kernel_idx, delta)]
    phase_mats = []
    for pr in (0, 1):
        for pc in (0, 1):
            wp = jnp.zeros((2, 2, Cin, Cout), jnp.float32)
            for kh, dr in taps[pr]:
                for kw, dc in taps[pc]:
                    wp = wp.at[dr, dc].set(wT[:, :, kh, kw])
            phase_mats.append(wp.reshape(4 * Cin, Cout))
    w_all = jnp.concatenate(phase_mats, axis=1)          # (4*Cin, 4*Cout)
    b_all = jnp.tile(b, 4)
    K, N = 4 * Cin, 4 * Cout
    Kp = _round_up(K, 128)
    Np = _round_up(N, 128)
    w_all = jnp.pad(w_all, ((0, Kp - K), (0, Np - N))).astype(jnp.bfloat16)
    b_all = jnp.pad(b_all, (0, Np - N)).astype(jnp.float32).reshape(1, Np)
    return w_all, b_all


def _prep_linear(w, b):
    d_in, d_out = w.shape
    Kp = _round_up(d_in, 128)
    Np = _round_up(d_out, 128)
    wp = jnp.pad(w, ((0, Kp - d_in), (0, Np - d_out))).astype(jnp.bfloat16)
    bp = jnp.pad(b, (0, Np - d_out)).astype(jnp.float32).reshape(1, Np)
    return wp, bp


def make_ae_params(key, input_dim, latent_dim, layers_encoder, k):
    n = len(layers_encoder)
    keys = jax.random.split(key, 2 * n + 2)
    enc = [_prep_conv_w(*_init_conv(keys[i], co, ci, k))
           for i, (ci, co) in enumerate(layers_encoder)]
    a = layers_encoder[-1][1]
    b0 = layers_encoder[0][1]
    flat = a * (input_dim // b0) * (input_dim // b0)
    fc1 = _prep_linear(*_init_linear(keys[n], flat, latent_dim))
    fc2 = _prep_linear(*_init_linear(keys[n + 1], latent_dim, flat))
    dec = [_prep_convT_w(*_init_convT(keys[n + 2 + i], co, ci, k))
           for i, (ci, co) in enumerate(layers_encoder[::-1])]
    return dict(enc=enc, fc1=fc1, fc2=fc2, dec=dec)


# --------------------------------------------------------------------------
# AE forward (encode -> fc1 -> fc2 -> decode), NCHW at the boundary
# --------------------------------------------------------------------------
def ae_forward(params, x, *, layers_encoder, input_dim, latent_dim,
               kernel_size, stride, padding):
    B = x.shape[0]
    h = x.transpose(0, 2, 3, 1).astype(jnp.bfloat16)        # NCHW -> NHWC bf16

    # ---- encoder ----
    n_enc = len(layers_encoder)
    for i, ((cin, _), (wmat, bias)) in enumerate(zip(layers_encoder,
                                                     params["enc"])):
        relu = i != n_enc - 1
        h = conv2d_nhwc(h, cin, wmat, bias, kernel_size, stride, padding,
                        relu=relu, out_dtype=jnp.bfloat16)
        # TODO(synk): nn.Dropout treated as identity (inference semantics).

    # ---- flatten (PyTorch NCHW order) + fused fc1/fc2 + unflatten ----
    a_ch = layers_encoder[-1][1]
    side = input_dim // layers_encoder[0][1]
    h = h[..., :a_ch].transpose(0, 3, 1, 2).reshape(B, -1)   # nn.Flatten
    w1, b1 = params["fc1"]
    w2, b2 = params["fc2"]
    h = fc1_fc2_fused(h, w1, b1, w2, b2, out_dtype=jnp.bfloat16)
    h = h[:, :a_ch * side * side].reshape(B, a_ch, side, side)
    h = h.transpose(0, 2, 3, 1)                               # Unflatten->NHWC

    # ---- decoder ----
    dec_layers = layers_encoder[::-1]
    n_dec = len(dec_layers)
    for i, ((enc_in, enc_out), (wmat, bias)) in enumerate(zip(dec_layers,
                                                              params["dec"])):
        relu = i != n_dec - 1
        out_dtype = jnp.bfloat16 if relu else jnp.float32
        h = conv_transpose2d_nhwc(h, enc_out, enc_in, wmat, bias,
                                  relu=relu, out_dtype=out_dtype)
        # TODO(synk): nn.Dropout treated as identity (inference semantics).

    return h.transpose(0, 3, 1, 2).astype(jnp.float32)       # NHWC -> NCHW


if __name__ == "__main__":
    # 4 stride-2 encoder layers downsample by 16 -> input_dim multiple of 16.
    input_dim = 32
    latent_dim = 6
    layers_encoder = [(3, 16), (16, 32), (32, 64), (64, 128)]
    kernel_size, stride, padding = 3, 2, 1

    key = jax.random.PRNGKey(0)
    k_param, k_x = jax.random.split(key)
    params = make_ae_params(k_param, input_dim, latent_dim, layers_encoder,
                            kernel_size)
    x = jax.random.normal(k_x, (2, 3, input_dim, input_dim), jnp.float32)

    forward = jax.jit(functools.partial(
        ae_forward,
        layers_encoder=tuple(layers_encoder), input_dim=input_dim,
        latent_dim=latent_dim, kernel_size=kernel_size, stride=stride,
        padding=padding))

    out = jax.block_until_ready(forward(params, x))
    assert out.shape == (2, 3, input_dim, input_dim), out.shape
    assert out.dtype == jnp.float32
    assert bool(jnp.all(jnp.isfinite(out)))
    print("KERNEL_OK")
</pallas_src>

<mosaic_0001>
module attributes {stable_mosaic.version = 11 : i64} {
  func.func @_mm_bias_kernel(%arg0: i32, %arg1: memref<256x128xbf16, #tpu.memory_space<vmem>>, %arg2: memref<128x128xbf16, #tpu.memory_space<vmem>>, %arg3: memref<1x128xf32, #tpu.memory_space<vmem>>, %arg4: memref<256x128xbf16, #tpu.memory_space<vmem>>) attributes {dimension_semantics = [#tpu.dimension_semantics<parallel>], iteration_bounds = array<i64: 2>, scalar_prefetch = 0 : i64, scratch_operands = 0 : i64, tpu.core_type = #tpu.core_type<tc>, window_params = [{transform_indices = @transform_0, window_bounds = array<i64: 256, 128>}, {pipeline_mode = #tpu.pipeline_mode<synchronous>, transform_indices = @transform_1, window_bounds = array<i64: 128, 128>}, {pipeline_mode = #tpu.pipeline_mode<synchronous>, transform_indices = @transform_2, window_bounds = array<i64: 1, 128>}, {transform_indices = @transform_3, window_bounds = array<i64: 256, 128>}]} {
    %c0 = arith.constant 0 : index
    %c0_0 = arith.constant 0 : index
    %0 = vector.load %arg1[%c0, %c0_0] : memref<256x128xbf16, #tpu.memory_space<vmem>>, vector<256x128xbf16>
    %c0_1 = arith.constant 0 : index
    %c0_2 = arith.constant 0 : index
    %1 = vector.load %arg2[%c0_1, %c0_2] : memref<128x128xbf16, #tpu.memory_space<vmem>>, vector<128x128xbf16>
    %cst = arith.constant dense<0.000000e+00> : vector<256x128xf32>
    %2 = tpu.matmul %0, %1, %cst {dimension_numbers = #tpu.dot_dimension_numbers<[1], [0], [0], [1], [0, 0, 1, 1], [], []>} : vector<256x128xbf16>, vector<128x128xbf16>, vector<256x128xf32> -> vector<256x128xf32>
    %c0_3 = arith.constant 0 : index
    %c0_4 = arith.constant 0 : index
    %3 = vector.load %arg3[%c0_3, %c0_4] : memref<1x128xf32, #tpu.memory_space<vmem>>, vector<1x128xf32>
    %4 = vector.broadcast %3 : vector<1x128xf32> to vector<256x128xf32>
    %5 = arith.addf %2, %4 : vector<256x128xf32>
    %cst_5 = arith.constant 0.000000e+00 : f32
    %6 = vector.broadcast %cst_5 : f32 to vector<256x128xf32>
    %7 = arith.maximumf %5, %6 : vector<256x128xf32>
    %8 = arith.truncf %7 : vector<256x128xf32> to vector<256x128xbf16>
    %c0_6 = arith.constant 0 : index
    %c0_7 = arith.constant 0 : index
    %9 = vector.load %arg4[%c0_6, %c0_7] : memref<256x128xbf16, #tpu.memory_space<vmem>>, vector<256x128xbf16>
    tpu.vector_store %arg4[%c0_6, %c0_7], %8 {strides = array<i32>} : memref<256x128xbf16, #tpu.memory_space<vmem>>, vector<256x128xbf16>,
    return
  }
  func.func @transform_0(%arg0: i32) -> (i32, i32) {
    %c0_i32 = arith.constant 0 : i32
    %c0_i32_0 = arith.constant 0 : i32
    return %arg0, %c0_i32 : i32, i32
  }
  func.func @transform_1(%arg0: i32) -> (i32, i32) {
    %c0_i32 = arith.constant 0 : i32
    %c0_i32_0 = arith.constant 0 : i32
    %c0_i32_1 = arith.constant 0 : i32
    return %c0_i32, %c0_i32_0 : i32, i32
  }
  func.func @transform_2(%arg0: i32) -> (i32, i32) {
    %c0_i32 = arith.constant 0 : i32
    %c0_i32_0 = arith.constant 0 : i32
    %c0_i32_1 = arith.constant 0 : i32
    return %c0_i32, %c0_i32_0 : i32, i32
  }
  func.func @transform_3(%arg0: i32) -> (i32, i32) {
    %c0_i32 = arith.constant 0 : i32
    %c0_i32_0 = arith.constant 0 : i32
    return %arg0, %c0_i32 : i32, i32
  }
}

module attributes {stable_mosaic.version = 11 : i64} {
  func.func @_mm_bias_kernel(%arg0: i32, %arg1: memref<128x256xbf16, #tpu.memory_space<vmem>>, %arg2: memref<256x128xbf16, #tpu.memory_space<vmem>>, %arg3: memref<1x128xf32, #tpu.memory_space<vmem>>, %arg4: memref<128x128xbf16, #tpu.memory_space<vmem>>) attributes {dimension_semantics = [#tpu.dimension_semantics<parallel>], iteration_bounds = array<i64: 1>, scalar_prefetch = 0 : i64, scratch_operands = 0 : i64, tpu.core_type = #tpu.core_type<tc>, window_params = [{transform_indices = @transform_0, window_bounds = array<i64: 128, 256>}, {pipeline_mode = #tpu.pipeline_mode<synchronous>, transform_indices = @transform_1, window_bounds = array<i64: 256, 128>}, {pipeline_mode = #tpu.pipeline_mode<synchronous>, transform_indices = @transform_2, window_bounds = array<i64: 1, 128>}, {transform_indices = @transform_3, window_bounds = array<i64: 128, 128>}]} {
    %c0 = arith.constant 0 : index
    %c0_0 = arith.constant 0 : index
    %0 = vector.load %arg1[%c0, %c0_0] : memref<128x256xbf16, #tpu.memory_space<vmem>>, vector<128x256xbf16>
    %c0_1 = arith.constant 0 : index
    %c0_2 = arith.constant 0 : index
    %1 = vector.load %arg2[%c0_1, %c0_2] : memref<256x128xbf16, #tpu.memory_space<vmem>>, vector<256x128xbf16>
    %cst = arith.constant dense<0.000000e+00> : vector<128x128xf32>
    %2 = tpu.matmul %0, %1, %cst {dimension_numbers = #tpu.dot_dimension_numbers<[1], [0], [0], [1], [0, 0, 1, 1], [], []>} : vector<128x256xbf16>, vector<256x128xbf16>, vector<128x128xf32> -> vector<128x128xf32>
    %c0_3 = arith.constant 0 : index
    %c0_4 = arith.constant 0 : index
    %3 = vector.load %arg3[%c0_3, %c0_4] : memref<1x128xf32, #tpu.memory_space<vmem>>, vector<1x128xf32>
    %4 = vector.broadcast %3 : vector<1x128xf32> to vector<128x128xf32>
    %5 = arith.addf %2, %4 : vector<128x128xf32>
    %cst_5 = arith.constant 0.000000e+00 : f32
    %6 = vector.broadcast %cst_5 : f32 to vector<128x128xf32>
    %7 = arith.maximumf %5, %6 : vector<128x128xf32>
    %8 = arith.truncf %7 : vector<128x128xf32> to vector<128x128xbf16>
    %c0_6 = arith.constant 0 : index
    %c0_7 = arith.constant 0 : index
    %9 = vector.load %arg4[%c0_6, %c0_7] : memref<128x128xbf16, #tpu.memory_space<vmem>>, vector<128x128xbf16>
    tpu.vector_store %arg4[%c0_6, %c0_7], %8 {strides = array<i32>} : memref<128x128xbf16, #tpu.memory_space<vmem>>, vector<128x128xbf16>,
    return
  }
  func.func @transform_0(%arg0: i32) -> (i32, i32) {
    %c0_i32 = arith.constant 0 : i32
    %c0_i32_0 = arith.constant 0 : i32
    return %arg0, %c0_i32 : i32, i32
  }
  func.func @transform_1(%arg0: i32) -> (i32, i32) {
    %c0_i32 = arith.constant 0 : i32
    %c0_i32_0 = arith.constant 0 : i32
    %c0_i32_1 = arith.constant 0 : i32
    return %c0_i32, %c0_i32_0 : i32, i32
  }
  func.func @transform_2(%arg0: i32) -> (i32, i32) {
    %c0_i32 = arith.constant 0 : i32
    %c0_i32_0 = arith.constant 0 : i32
    %c0_i32_1 = arith.constant 0 : i32
    return %c0_i32, %c0_i32_0 : i32, i32
  }
  func.func @transform_3(%arg0: i32) -> (i32, i32) {
    %c0_i32 = arith.constant 0 : i32
    %c0_i32_0 = arith.constant 0 : i32
    return %arg0, %c0_i32 : i32, i32
  }
}

module attributes {stable_mosaic.version = 11 : i64} {
  func.func @_mm_bias_kernel(%arg0: i32, %arg1: memref<32x384xbf16, #tpu.memory_space<vmem>>, %arg2: memref<384x128xbf16, #tpu.memory_space<vmem>>, %arg3: memref<1x128xf32, #tpu.memory_space<vmem>>, %arg4: memref<32x128xbf16, #tpu.memory_space<vmem>>) attributes {dimension_semantics = [#tpu.dimension_semantics<parallel>], iteration_bounds = array<i64: 1>, scalar_prefetch = 0 : i64, scratch_operands = 0 : i64, tpu.core_type = #tpu.core_type<tc>, window_params = [{transform_indices = @transform_0, window_bounds = array<i64: 32, 384>}, {pipeline_mode = #tpu.pipeline_mode<synchronous>, transform_indices = @transform_1, window_bounds = array<i64: 384, 128>}, {pipeline_mode = #tpu.pipeline_mode<synchronous>, transform_indices = @transform_2, window_bounds = array<i64: 1, 128>}, {transform_indices = @transform_3, window_bounds = array<i64: 32, 128>}]} {
    %c0 = arith.constant 0 : index
    %c0_0 = arith.constant 0 : index
    %0 = vector.load %arg1[%c0, %c0_0] : memref<32x384xbf16, #tpu.memory_space<vmem>>, vector<32x384xbf16>
    %c0_1 = arith.constant 0 : index
    %c0_2 = arith.constant 0 : index
    %1 = vector.load %arg2[%c0_1, %c0_2] : memref<384x128xbf16, #tpu.memory_space<vmem>>, vector<384x128xbf16>
    %cst = arith.constant dense<0.000000e+00> : vector<32x128xf32>
    %2 = tpu.matmul %0, %1, %cst {dimension_numbers = #tpu.dot_dimension_numbers<[1], [0], [0], [1], [0, 0, 1, 1], [], []>} : vector<32x384xbf16>, vector<384x128xbf16>, vector<32x128xf32> -> vector<32x128xf32>
    %c0_3 = arith.constant 0 : index
    %c0_4 = arith.constant 0 : index
    %3 = vector.load %arg3[%c0_3, %c0_4] : memref<1x128xf32, #tpu.memory_space<vmem>>, vector<1x128xf32>
    %4 = vector.broadcast %3 : vector<1x128xf32> to vector<32x128xf32>
    %5 = arith.addf %2, %4 : vector<32x128xf32>
    %cst_5 = arith.constant 0.000000e+00 : f32
    %6 = vector.broadcast %cst_5 : f32 to vector<32x128xf32>
    %7 = arith.maximumf %5, %6 : vector<32x128xf32>
    %8 = arith.truncf %7 : vector<32x128xf32> to vector<32x128xbf16>
    %c0_6 = arith.constant 0 : index
    %c0_7 = arith.constant 0 : index
    %9 = vector.load %arg4[%c0_6, %c0_7] : memref<32x128xbf16, #tpu.memory_space<vmem>>, vector<32x128xbf16>
    tpu.vector_store %arg4[%c0_6, %c0_7], %8 {strides = array<i32>} : memref<32x128xbf16, #tpu.memory_space<vmem>>, vector<32x128xbf16>,
    return
  }
  func.func @transform_0(%arg0: i32) -> (i32, i32) {
    %c0_i32 = arith.constant 0 : i32
    %c0_i32_0 = arith.constant 0 : i32
    return %arg0, %c0_i32 : i32, i32
  }
  func.func @transform_1(%arg0: i32) -> (i32, i32) {
    %c0_i32 = arith.constant 0 : i32
    %c0_i32_0 = arith.constant 0 : i32
    %c0_i32_1 = arith.constant 0 : i32
    return %c0_i32, %c0_i32_0 : i32, i32
  }
  func.func @transform_2(%arg0: i32) -> (i32, i32) {
    %c0_i32 = arith.constant 0 : i32
    %c0_i32_0 = arith.constant 0 : i32
    %c0_i32_1 = arith.constant 0 : i32
    return %c0_i32, %c0_i32_0 : i32, i32
  }
  func.func @transform_3(%arg0: i32) -> (i32, i32) {
    %c0_i32 = arith.constant 0 : i32
    %c0_i32_0 = arith.constant 0 : i32
    return %arg0, %c0_i32 : i32, i32
  }
}

module attributes {stable_mosaic.version = 11 : i64} {
  func.func @_mm_bias_kernel(%arg0: i32, %arg1: memref<16x640xbf16, #tpu.memory_space<vmem>>, %arg2: memref<640x128xbf16, #tpu.memory_space<vmem>>, %arg3: memref<1x128xf32, #tpu.memory_space<vmem>>, %arg4: memref<16x128xbf16, #tpu.memory_space<vmem>>) attributes {dimension_semantics = [#tpu.dimension_semantics<parallel>], iteration_bounds = array<i64: 1>, scalar_prefetch = 0 : i64, scratch_operands = 0 : i64, tpu.core_type = #tpu.core_type<tc>, window_params = [{transform_indices = @transform_0, window_bounds = array<i64: 16, 640>}, {pipeline_mode = #tpu.pipeline_mode<synchronous>, transform_indices = @transform_1, window_bounds = array<i64: 640, 128>}, {pipeline_mode = #tpu.pipeline_mode<synchronous>, transform_indices = @transform_2, window_bounds = array<i64: 1, 128>}, {transform_indices = @transform_3, window_bounds = array<i64: 16, 128>}]} {
    %c0 = arith.constant 0 : index
    %c0_0 = arith.constant 0 : index
    %0 = vector.load %arg1[%c0, %c0_0] : memref<16x640xbf16, #tpu.memory_space<vmem>>, vector<16x640xbf16>
    %c0_1 = arith.constant 0 : index
    %c0_2 = arith.constant 0 : index
    %1 = vector.load %arg2[%c0_1, %c0_2] : memref<640x128xbf16, #tpu.memory_space<vmem>>, vector<640x128xbf16>
    %cst = arith.constant dense<0.000000e+00> : vector<16x128xf32>
    %2 = tpu.matmul %0, %1, %cst {dimension_numbers = #tpu.dot_dimension_numbers<[1], [0], [0], [1], [0, 0, 1, 1], [], []>} : vector<16x640xbf16>, vector<640x128xbf16>, vector<16x128xf32> -> vector<16x128xf32>
    %c0_3 = arith.constant 0 : index
    %c0_4 = arith.constant 0 : index
    %3 = vector.load %arg3[%c0_3, %c0_4] : memref<1x128xf32, #tpu.memory_space<vmem>>, vector<1x128xf32>
    %4 = vector.broadcast %3 : vector<1x128xf32> to vector<16x128xf32>
    %5 = arith.addf %2, %4 : vector<16x128xf32>
    %6 = arith.truncf %5 : vector<16x128xf32> to vector<16x128xbf16>
    %c0_5 = arith.constant 0 : index
    %c0_6 = arith.constant 0 : index
    %7 = vector.load %arg4[%c0_5, %c0_6] : memref<16x128xbf16, #tpu.memory_space<vmem>>, vector<16x128xbf16>
    tpu.vector_store %arg4[%c0_5, %c0_6], %6 {strides = array<i32>} : memref<16x128xbf16, #tpu.memory_space<vmem>>, vector<16x128xbf16>,
    return
  }
  func.func @transform_0(%arg0: i32) -> (i32, i32) {
    %c0_i32 = arith.constant 0 : i32
    %c0_i32_0 = arith.constant 0 : i32
    return %arg0, %c0_i32 : i32, i32
  }
  func.func @transform_1(%arg0: i32) -> (i32, i32) {
    %c0_i32 = arith.constant 0 : i32
    %c0_i32_0 = arith.constant 0 : i32
    %c0_i32_1 = arith.constant 0 : i32
    return %c0_i32, %c0_i32_0 : i32, i32
  }
  func.func @transform_2(%arg0: i32) -> (i32, i32) {
    %c0_i32 = arith.constant 0 : i32
    %c0_i32_0 = arith.constant 0 : i32
    %c0_i32_1 = arith.constant 0 : i32
    return %c0_i32, %c0_i32_0 : i32, i32
  }
  func.func @transform_3(%arg0: i32) -> (i32, i32) {
    %c0_i32 = arith.constant 0 : i32
    %c0_i32_0 = arith.constant 0 : i32
    return %arg0, %c0_i32 : i32, i32
  }
}

module attributes {stable_mosaic.version = 11 : i64} {
  func.func @_fc_fused_kernel(%arg0: i32, %arg1: memref<16x512xbf16, #tpu.memory_space<vmem>>, %arg2: memref<512x128xbf16, #tpu.memory_space<vmem>>, %arg3: memref<1x128xf32, #tpu.memory_space<vmem>>, %arg4: memref<128x512xbf16, #tpu.memory_space<vmem>>, %arg5: memref<1x512xf32, #tpu.memory_space<vmem>>, %arg6: memref<16x512xbf16, #tpu.memory_space<vmem>>) attributes {dimension_semantics = [#tpu.dimension_semantics<arbitrary>], iteration_bounds = array<i64: 1>, scalar_prefetch = 0 : i64, scratch_operands = 0 : i64, tpu.core_type = #tpu.core_type<tc>, window_params = [{pipeline_mode = #tpu.pipeline_mode<synchronous>, transform_indices = @transform_0, window_bounds = array<i64: 16, 512>}, {pipeline_mode = #tpu.pipeline_mode<synchronous>, transform_indices = @transform_1, window_bounds = array<i64: 512, 128>}, {pipeline_mode = #tpu.pipeline_mode<synchronous>, transform_indices = @transform_2, window_bounds = array<i64: 1, 128>}, {pipeline_mode = #tpu.pipeline_mode<synchronous>, transform_indices = @transform_3, window_bounds = array<i64: 128, 512>}, {pipeline_mode = #tpu.pipeline_mode<synchronous>, transform_indices = @transform_4, window_bounds = array<i64: 1, 512>}, {pipeline_mode = #tpu.pipeline_mode<synchronous>, transform_indices = @transform_5, window_bounds = array<i64: 16, 512>}]} {
    %c0 = arith.constant 0 : index
    %c0_0 = arith.constant 0 : index
    %0 = vector.load %arg1[%c0, %c0_0] : memref<16x512xbf16, #tpu.memory_space<vmem>>, vector<16x512xbf16>
    %c0_1 = arith.constant 0 : index
    %c0_2 = arith.constant 0 : index
    %1 = vector.load %arg2[%c0_1, %c0_2] : memref<512x128xbf16, #tpu.memory_space<vmem>>, vector<512x128xbf16>
    %cst = arith.constant dense<0.000000e+00> : vector<16x128xf32>
    %2 = tpu.matmul %0, %1, %cst {dimension_numbers = #tpu.dot_dimension_numbers<[1], [0], [0], [1], [0, 0, 1, 1], [], []>} : vector<16x512xbf16>, vector<512x128xbf16>, vector<16x128xf32> -> vector<16x128xf32>
    %c0_3 = arith.constant 0 : index
    %c0_4 = arith.constant 0 : index
    %3 = vector.load %arg3[%c0_3, %c0_4] : memref<1x128xf32, #tpu.memory_space<vmem>>, vector<1x128xf32>
    %4 = vector.broadcast %3 : vector<1x128xf32> to vector<16x128xf32>
    %5 = arith.addf %2, %4 : vector<16x128xf32>
    %6 = arith.truncf %5 : vector<16x128xf32> to vector<16x128xbf16>
    %c0_5 = arith.constant 0 : index
    %c0_6 = arith.constant 0 : index
    %7 = vector.load %arg4[%c0_5, %c0_6] : memref<128x512xbf16, #tpu.memory_space<vmem>>, vector<128x512xbf16>
    %cst_7 = arith.constant dense<0.000000e+00> : vector<16x512xf32>
    %8 = tpu.matmul %6, %7, %cst_7 {dimension_numbers = #tpu.dot_dimension_numbers<[1], [0], [0], [1], [0, 0, 1, 1], [], []>} : vector<16x128xbf16>, vector<128x512xbf16>, vector<16x512xf32> -> vector<16x512xf32>
    %c0_8 = arith.constant 0 : index
    %c0_9 = arith.constant 0 : index
    %9 = vector.load %arg5[%c0_8, %c0_9] : memref<1x512xf32, #tpu.memory_space<vmem>>, vector<1x512xf32>
    %10 = vector.broadcast %9 : vector<1x512xf32> to vector<16x512xf32>
    %11 = arith.addf %8, %10 : vector<16x512xf32>
    %12 = arith.truncf %11 : vector<16x512xf32> to vector<16x512xbf16>
    %c0_10 = arith.constant 0 : index
    %c0_11 = arith.constant 0 : index
    %13 = vector.load %arg6[%c0_10, %c0_11] : memref<16x512xbf16, #tpu.memory_space<vmem>>, vector<16x512xbf16>
    tpu.vector_store %arg6[%c0_10, %c0_11], %12 {strides = array<i32>} : memref<16x512xbf16, #tpu.memory_space<vmem>>, vector<16x512xbf16>,
    return
  }
  func.func @transform_0(%arg0: i32) -> (i32, i32) {
    %c0_i32 = arith.constant 0 : i32
    %c0_i32_0 = arith.constant 0 : i32
    %c0_i32_1 = arith.constant 0 : i32
    return %c0_i32, %c0_i32_0 : i32, i32
  }
  func.func @transform_1(%arg0: i32) -> (i32, i32) {
    %c0_i32 = arith.constant 0 : i32
    %c0_i32_0 = arith.constant 0 : i32
    %c0_i32_1 = arith.constant 0 : i32
    return %c0_i32, %c0_i32_0 : i32, i32
  }
  func.func @transform_2(%arg0: i32) -> (i32, i32) {
    %c0_i32 = arith.constant 0 : i32
    %c0_i32_0 = arith.constant 0 : i32
    %c0_i32_1 = arith.constant 0 : i32
    return %c0_i32, %c0_i32_0 : i32, i32
  }
  func.func @transform_3(%arg0: i32) -> (i32, i32) {
    %c0_i32 = arith.constant 0 : i32
    %c0_i32_0 = arith.constant 0 : i32
    %c0_i32_1 = arith.constant 0 : i32
    return %c0_i32, %c0_i32_0 : i32, i32
  }
  func.func @transform_4(%arg0: i32) -> (i32, i32) {
    %c0_i32 = arith.constant 0 : i32
    %c0_i32_0 = arith.constant 0 : i32
    %c0_i32_1 = arith.constant 0 : i32
    return %c0_i32, %c0_i32_0 : i32, i32
  }
  func.func @transform_5(%arg0: i32) -> (i32, i32) {
    %c0_i32 = arith.constant 0 : i32
    %c0_i32_0 = arith.constant 0 : i32
    %c0_i32_1 = arith.constant 0 : i32
    return %c0_i32, %c0_i32_0 : i32, i32
  }
}

module attributes {stable_mosaic.version = 11 : i64} {
  func.func @_mm_bias_kernel(%arg0: i32, %arg1: memref<16x512xbf16, #tpu.memory_space<vmem>>, %arg2: memref<512x256xbf16, #tpu.memory_space<vmem>>, %arg3: memref<1x256xf32, #tpu.memory_space<vmem>>, %arg4: memref<16x256xbf16, #tpu.memory_space<vmem>>) attributes {dimension_semantics = [#tpu.dimension_semantics<parallel>], iteration_bounds = array<i64: 1>, scalar_prefetch = 0 : i64, scratch_operands = 0 : i64, tpu.core_type = #tpu.core_type<tc>, window_params = [{transform_indices = @transform_0, window_bounds = array<i64: 16, 512>}, {pipeline_mode = #tpu.pipeline_mode<synchronous>, transform_indices = @transform_1, window_bounds = array<i64: 512, 256>}, {pipeline_mode = #tpu.pipeline_mode<synchronous>, transform_indices = @transform_2, window_bounds = array<i64: 1, 256>}, {transform_indices = @transform_3, window_bounds = array<i64: 16, 256>}]} {
    %c0 = arith.constant 0 : index
    %c0_0 = arith.constant 0 : index
    %0 = vector.load %arg1[%c0, %c0_0] : memref<16x512xbf16, #tpu.memory_space<vmem>>, vector<16x512xbf16>
    %c0_1 = arith.constant 0 : index
    %c0_2 = arith.constant 0 : index
    %1 = vector.load %arg2[%c0_1, %c0_2] : memref<512x256xbf16, #tpu.memory_space<vmem>>, vector<512x256xbf16>
    %cst = arith.constant dense<0.000000e+00> : vector<16x256xf32>
    %2 = tpu.matmul %0, %1, %cst {dimension_numbers = #tpu.dot_dimension_numbers<[1], [0], [0], [1], [0, 0, 1, 1], [], []>} : vector<16x512xbf16>, vector<512x256xbf16>, vector<16x256xf32> -> vector<16x256xf32>
    %c0_3 = arith.constant 0 : index
    %c0_4 = arith.constant 0 : index
    %3 = vector.load %arg3[%c0_3, %c0_4] : memref<1x256xf32, #tpu.memory_space<vmem>>, vector<1x256xf32>
    %4 = vector.broadcast %3 : vector<1x256xf32> to vector<16x256xf32>
    %5 = arith.addf %2, %4 : vector<16x256xf32>
    %cst_5 = arith.constant 0.000000e+00 : f32
    %6 = vector.broadcast %cst_5 : f32 to vector<16x256xf32>
    %7 = arith.maximumf %5, %6 : vector<16x256xf32>
    %8 = arith.truncf %7 : vector<16x256xf32> to vector<16x256xbf16>
    %c0_6 = arith.constant 0 : index
    %c0_7 = arith.constant 0 : index
    %9 = vector.load %arg4[%c0_6, %c0_7] : memref<16x256xbf16, #tpu.memory_space<vmem>>, vector<16x256xbf16>
    tpu.vector_store %arg4[%c0_6, %c0_7], %8 {strides = array<i32>} : memref<16x256xbf16, #tpu.memory_space<vmem>>, vector<16x256xbf16>,
    return
  }
  func.func @transform_0(%arg0: i32) -> (i32, i32) {
    %c0_i32 = arith.constant 0 : i32
    %c0_i32_0 = arith.constant 0 : i32
    return %arg0, %c0_i32 : i32, i32
  }
  func.func @transform_1(%arg0: i32) -> (i32, i32) {
    %c0_i32 = arith.constant 0 : i32
    %c0_i32_0 = arith.constant 0 : i32
    %c0_i32_1 = arith.constant 0 : i32
    return %c0_i32, %c0_i32_0 : i32, i32
  }
  func.func @transform_2(%arg0: i32) -> (i32, i32) {
    %c0_i32 = arith.constant 0 : i32
    %c0_i32_0 = arith.constant 0 : i32
    %c0_i32_1 = arith.constant 0 : i32
    return %c0_i32, %c0_i32_0 : i32, i32
  }
  func.func @transform_3(%arg0: i32) -> (i32, i32) {
    %c0_i32 = arith.constant 0 : i32
    %c0_i32_0 = arith.constant 0 : i32
    return %arg0, %c0_i32 : i32, i32
  }
}

module attributes {stable_mosaic.version = 11 : i64} {
  func.func @_mm_bias_kernel(%arg0: i32, %arg1: memref<32x256xbf16, #tpu.memory_space<vmem>>, %arg2: memref<256x128xbf16, #tpu.memory_space<vmem>>, %arg3: memref<1x128xf32, #tpu.memory_space<vmem>>, %arg4: memref<32x128xbf16, #tpu.memory_space<vmem>>) attributes {dimension_semantics = [#tpu.dimension_semantics<parallel>], iteration_bounds = array<i64: 1>, scalar_prefetch = 0 : i64, scratch_operands = 0 : i64, tpu.core_type = #tpu.core_type<tc>, window_params = [{transform_indices = @transform_0, window_bounds = array<i64: 32, 256>}, {pipeline_mode = #tpu.pipeline_mode<synchronous>, transform_indices = @transform_1, window_bounds = array<i64: 256, 128>}, {pipeline_mode = #tpu.pipeline_mode<synchronous>, transform_indices = @transform_2, window_bounds = array<i64: 1, 128>}, {transform_indices = @transform_3, window_bounds = array<i64: 32, 128>}]} {
    %c0 = arith.constant 0 : index
    %c0_0 = arith.constant 0 : index
    %0 = vector.load %arg1[%c0, %c0_0] : memref<32x256xbf16, #tpu.memory_space<vmem>>, vector<32x256xbf16>
    %c0_1 = arith.constant 0 : index
    %c0_2 = arith.constant 0 : index
    %1 = vector.load %arg2[%c0_1, %c0_2] : memref<256x128xbf16, #tpu.memory_space<vmem>>, vector<256x128xbf16>
    %cst = arith.constant dense<0.000000e+00> : vector<32x128xf32>
    %2 = tpu.matmul %0, %1, %cst {dimension_numbers = #tpu.dot_dimension_numbers<[1], [0], [0], [1], [0, 0, 1, 1], [], []>} : vector<32x256xbf16>, vector<256x128xbf16>, vector<32x128xf32> -> vector<32x128xf32>
    %c0_3 = arith.constant 0 : index
    %c0_4 = arith.constant 0 : index
    %3 = vector.load %arg3[%c0_3, %c0_4] : memref<1x128xf32, #tpu.memory_space<vmem>>, vector<1x128xf32>
    %4 = vector.broadcast %3 : vector<1x128xf32> to vector<32x128xf32>
    %5 = arith.addf %2, %4 : vector<32x128xf32>
    %cst_5 = arith.constant 0.000000e+00 : f32
    %6 = vector.broadcast %cst_5 : f32 to vector<32x128xf32>
    %7 = arith.maximumf %5, %6 : vector<32x128xf32>
    %8 = arith.truncf %7 : vector<32x128xf32> to vector<32x128xbf16>
    %c0_6 = arith.constant 0 : index
    %c0_7 = arith.constant 0 : index
    %9 = vector.load %arg4[%c0_6, %c0_7] : memref<32x128xbf16, #tpu.memory_space<vmem>>, vector<32x128xbf16>
    tpu.vector_store %arg4[%c0_6, %c0_7], %8 {strides = array<i32>} : memref<32x128xbf16, #tpu.memory_space<vmem>>, vector<32x128xbf16>,
    return
  }
  func.func @transform_0(%arg0: i32) -> (i32, i32) {
    %c0_i32 = arith.constant 0 : i32
    %c0_i32_0 = arith.constant 0 : i32
    return %arg0, %c0_i32 : i32, i32
  }
  func.func @transform_1(%arg0: i32) -> (i32, i32) {
    %c0_i32 = arith.constant 0 : i32
    %c0_i32_0 = arith.constant 0 : i32
    %c0_i32_1 = arith.constant 0 : i32
    return %c0_i32, %c0_i32_0 : i32, i32
  }
  func.func @transform_2(%arg0: i32) -> (i32, i32) {
    %c0_i32 = arith.constant 0 : i32
    %c0_i32_0 = arith.constant 0 : i32
    %c0_i32_1 = arith.constant 0 : i32
    return %c0_i32, %c0_i32_0 : i32, i32
  }
  func.func @transform_3(%arg0: i32) -> (i32, i32) {
    %c0_i32 = arith.constant 0 : i32
    %c0_i32_0 = arith.constant 0 : i32
    return %arg0, %c0_i32 : i32, i32
  }
}

module attributes {stable_mosaic.version = 11 : i64} {
  func.func @_mm_bias_kernel(%arg0: i32, %arg1: memref<128x128xbf16, #tpu.memory_space<vmem>>, %arg2: memref<128x128xbf16, #tpu.memory_space<vmem>>, %arg3: memref<1x128xf32, #tpu.memory_space<vmem>>, %arg4: memref<128x128xbf16, #tpu.memory_space<vmem>>) attributes {dimension_semantics = [#tpu.dimension_semantics<parallel>], iteration_bounds = array<i64: 1>, scalar_prefetch = 0 : i64, scratch_operands = 0 : i64, tpu.core_type = #tpu.core_type<tc>, window_params = [{transform_indices = @transform_0, window_bounds = array<i64: 128, 128>}, {pipeline_mode = #tpu.pipeline_mode<synchronous>, transform_indices = @transform_1, window_bounds = array<i64: 128, 128>}, {pipeline_mode = #tpu.pipeline_mode<synchronous>, transform_indices = @transform_2, window_bounds = array<i64: 1, 128>}, {transform_indices = @transform_3, window_bounds = array<i64: 128, 128>}]} {
    %c0 = arith.constant 0 : index
    %c0_0 = arith.constant 0 : index
    %0 = vector.load %arg1[%c0, %c0_0] : memref<128x128xbf16, #tpu.memory_space<vmem>>, vector<128x128xbf16>
    %c0_1 = arith.constant 0 : index
    %c0_2 = arith.constant 0 : index
    %1 = vector.load %arg2[%c0_1, %c0_2] : memref<128x128xbf16, #tpu.memory_space<vmem>>, vector<128x128xbf16>
    %cst = arith.constant dense<0.000000e+00> : vector<128x128xf32>
    %2 = tpu.matmul %0, %1, %cst {dimension_numbers = #tpu.dot_dimension_numbers<[1], [0], [0], [1], [0, 0, 1, 1], [], []>} : vector<128x128xbf16>, vector<128x128xbf16>, vector<128x128xf32> -> vector<128x128xf32>
    %c0_3 = arith.constant 0 : index
    %c0_4 = arith.constant 0 : index
    %3 = vector.load %arg3[%c0_3, %c0_4] : memref<1x128xf32, #tpu.memory_space<vmem>>, vector<1x128xf32>
    %4 = vector.broadcast %3 : vector<1x128xf32> to vector<128x128xf32>
    %5 = arith.addf %2, %4 : vector<128x128xf32>
    %cst_5 = arith.constant 0.000000e+00 : f32
    %6 = vector.broadcast %cst_5 : f32 to vector<128x128xf32>
    %7 = arith.maximumf %5, %6 : vector<128x128xf32>
    %8 = arith.truncf %7 : vector<128x128xf32> to vector<128x128xbf16>
    %c0_6 = arith.constant 0 : index
    %c0_7 = arith.constant 0 : index
    %9 = vector.load %arg4[%c0_6, %c0_7] : memref<128x128xbf16, #tpu.memory_space<vmem>>, vector<128x128xbf16>
    tpu.vector_store %arg4[%c0_6, %c0_7], %8 {strides = array<i32>} : memref<128x128xbf16, #tpu.memory_space<vmem>>, vector<128x128xbf16>,
    return
  }
  func.func @transform_0(%arg0: i32) -> (i32, i32) {
    %c0_i32 = arith.constant 0 : i32
    %c0_i32_0 = arith.constant 0 : i32
    return %arg0, %c0_i32 : i32, i32
  }
  func.func @transform_1(%arg0: i32) -> (i32, i32) {
    %c0_i32 = arith.constant 0 : i32
    %c0_i32_0 = arith.constant 0 : i32
    %c0_i32_1 = arith.constant 0 : i32
    return %c0_i32, %c0_i32_0 : i32, i32
  }
  func.func @transform_2(%arg0: i32) -> (i32, i32) {
    %c0_i32 = arith.constant 0 : i32
    %c0_i32_0 = arith.constant 0 : i32
    %c0_i32_1 = arith.constant 0 : i32
    return %c0_i32, %c0_i32_0 : i32, i32
  }
  func.func @transform_3(%arg0: i32) -> (i32, i32) {
    %c0_i32 = arith.constant 0 : i32
    %c0_i32_0 = arith.constant 0 : i32
    return %arg0, %c0_i32 : i32, i32
  }
}

module attributes {stable_mosaic.version = 11 : i64} {
  func.func @_mm_bias_kernel(%arg0: i32, %arg1: memref<256x128xbf16, #tpu.memory_space<vmem>>, %arg2: memref<128x128xbf16, #tpu.memory_space<vmem>>, %arg3: memref<1x128xf32, #tpu.memory_space<vmem>>, %arg4: memref<256x128xf32, #tpu.memory_space<vmem>>) attributes {dimension_semantics = [#tpu.dimension_semantics<parallel>], iteration_bounds = array<i64: 2>, scalar_prefetch = 0 : i64, scratch_operands = 0 : i64, tpu.core_type = #tpu.core_type<tc>, window_params = [{transform_indices = @transform_0, window_bounds = array<i64: 256, 128>}, {pipeline_mode = #tpu.pipeline_mode<synchronous>, transform_indices = @transform_1, window_bounds = array<i64: 128, 128>}, {pipeline_mode = #tpu.pipeline_mode<synchronous>, transform_indices = @transform_2, window_bounds = array<i64: 1, 128>}, {transform_indices = @transform_3, window_bounds = array<i64: 256, 128>}]} {
    %c0 = arith.constant 0 : index
    %c0_0 = arith.constant 0 : index
    %0 = vector.load %arg1[%c0, %c0_0] : memref<256x128xbf16, #tpu.memory_space<vmem>>, vector<256x128xbf16>
    %c0_1 = arith.constant 0 : index
    %c0_2 = arith.constant 0 : index
    %1 = vector.load %arg2[%c0_1, %c0_2] : memref<128x128xbf16, #tpu.memory_space<vmem>>, vector<128x128xbf16>
    %cst = arith.constant dense<0.000000e+00> : vector<256x128xf32>
    %2 = tpu.matmul %0, %1, %cst {dimension_numbers = #tpu.dot_dimension_numbers<[1], [0], [0], [1], [0, 0, 1, 1], [], []>} : vector<256x128xbf16>, vector<128x128xbf16>, vector<256x128xf32> -> vector<256x128xf32>
    %c0_3 = arith.constant 0 : index
    %c0_4 = arith.constant 0 : index
    %3 = vector.load %arg3[%c0_3, %c0_4] : memref<1x128xf32, #tpu.memory_space<vmem>>, vector<1x128xf32>
    %4 = vector.broadcast %3 : vector<1x128xf32> to vector<256x128xf32>
    %5 = arith.addf %2, %4 : vector<256x128xf32>
    %c0_5 = arith.constant 0 : index
    %c0_6 = arith.constant 0 : index
    %6 = vector.load %arg4[%c0_5, %c0_6] : memref<256x128xf32, #tpu.memory_space<vmem>>, vector<256x128xf32>
    tpu.vector_store %arg4[%c0_5, %c0_6], %5 {strides = array<i32>} : memref<256x128xf32, #tpu.memory_space<vmem>>, vector<256x128xf32>,
    return
  }
  func.func @transform_0(%arg0: i32) -> (i32, i32) {
    %c0_i32 = arith.constant 0 : i32
    %c0_i32_0 = arith.constant 0 : i32
    return %arg0, %c0_i32 : i32, i32
  }
  func.func @transform_1(%arg0: i32) -> (i32, i32) {
    %c0_i32 = arith.constant 0 : i32
    %c0_i32_0 = arith.constant 0 : i32
    %c0_i32_1 = arith.constant 0 : i32
    return %c0_i32, %c0_i32_0 : i32, i32
  }
  func.func @transform_2(%arg0: i32) -> (i32, i32) {
    %c0_i32 = arith.constant 0 : i32
    %c0_i32_0 = arith.constant 0 : i32
    %c0_i32_1 = arith.constant 0 : i32
    return %c0_i32, %c0_i32_0 : i32, i32
  }
  func.func @transform_3(%arg0: i32) -> (i32, i32) {
    %c0_i32 = arith.constant 0 : i32
    %c0_i32_0 = arith.constant 0 : i32
    return %arg0, %c0_i32 : i32, i32
  }
}

</mosaic_0001>

<bundles_post_ra>
// kernel: ae_forward.19
= control target key start
LH: loop header
LB: loop body
LE: loop exit
PB: predicated region body
PF: predicated region fallthrough
CT: control target
= control target key end

     0   :  { %s2327_s0 = inlined_call_operand.hbm [shape: bf16[128,128], index: 0, kind: input, shape index: {}]   ;;  %s2328_s1 = inlined_call_operand.hbm [shape: f32[1,128], index: 1, kind: input, shape index: {}]   ;;  %s2329_s2 = inlined_call_operand.vmem [shape: bf16[512,27], index: 2, kind: input, shape index: {}]   ;;  %s2330_s3 = inlined_call_operand.<no memory space> [shape: bf16[], index: 3, kind: input, shape index: {}]   ;;  %s2331_s4 = inlined_call_operand.vmem [shape: bf16[512,128], index: 4, kind: output, shape index: {}]  }
   0x1   :  { %v9_v0 = vstv %s2330_s3 }
   0x2   :  { %v2020_v1 = vunpack.i.l.bf16 %v9_v0 }
   0x3   :  { %14 = vsyncpa [#allocation8], 0 }
   0x4   :  { %15 = vsyncpa [#allocation10], 0  ;;  %s2022_s17 = smov 0  }
   0x5 LB: > { %s1541_s18 = sadd.s32 4294967295, %s1985_s17   ;;  %p1543_p0 = scmp.ge.s32.totalorder %s1985_s17, 1  ;;  %s1985_s17 = sphi %s2022_s17, %s21_s17  }
   0x6   : > { %p120_p1 = scmp.lt.s32.totalorder %s1985_s17, 3  ;;  %s1987_s19 = smov [#allocation7]  }
   0x7   : > { %s132_s3 = sshll.u32 %s1987_s19, 4  ;;  %p2036_p3 = scmp.eq.s32.totalorder %s1541_s18, 0  ;;  %s133_s3 = int_to_ptr.vmem [resolvable:$true] %s132_s3 }
   0x8   : > { %p2030_p2 = pnand %p1543_p0, %p120_p1  ;;  %s1988_s22 = smov [#allocation9]  }
   0x9   : > { %s2336_s21 = scalar_select %p2036_p3, 1, 0 }
   0xa   : > { %s2335_s20 = scalar_select %p2030_p2, 1, 0 }
   0xb   : > { %p1867_p4 = pneg %p2030_p2  ;;  %s146_s23 = sshll.u32 %s1988_s22, 4  ;;  %s2048_s23 = int_to_ptr.vmem [resolvable:$true] %s146_s23 }
   0xc   : > { %s1915_s27 = scalar_lea.hbm %s2327_s0, 1024 }
   0xd   : > { %p2044_p5 = pnand %p2036_p3, %p1867_p4  ;;  %p1916_p6 = scmp.ne.s32.totalorder %s2327_s0, %s1915_s27 }
   0xe   : > { %p1922_p10 = scmp.lt.u32.totalorder %s1915_s27, %s2327_s0 }
   0xf   : > { %p1917_p7 = pneg %p2044_p5 }
  0x11   : > { %p1918_p8 = pnand %p1917_p7, %p1916_p6 }
  0x13   : > { %p1919_p9 = pneg %p1918_p8 }
  0x15   : > { %p1924_p11 = pnand %p1922_p10, %p1919_p9 }
  0x17   : > { %1927 = shalt.err (!%p1924_p11)
}
  0x18   : > { %s1928_s6 = scalar_lea.vmem %s133_s3, 1024  ;;  %p1936_p1 = scmp.lt.s32.totalorder %s133_s3, %s133_s3 }
  0x19   : > { %p1929_p12 = scmp.ne.s32.totalorder %s133_s3, %s1928_s6  ;;  %p1937_p4 = scmp.lt.s32.totalorder %s1928_s6, %s1928_s6 }
  0x1b   : > { %p1931_p13 = pnand %p1929_p12, %p1917_p7  ;;  %p1938_p3 = por %p1937_p4, %p1936_p1 }
  0x1d   : > { %p1932_p0 = pneg %p1931_p13 }
  0x1f   : > { %p1939_p2 = pnand %p1938_p3, %p1932_p0 }
  0x21   : > { %1942 = shalt.err (!%p1939_p2)
}
  0x22   : > { %s1989_s7 = smov 64   ;;  %s1990_s8 = smov 4  }
  0x23   : > { %1870 = dma.hbm_to_vmem [thread:$0]  (!%p2044_p5), %s2327_s0, 1024, %s133_s3, [#allocation8], %s1989_s7, %s1989_s7, %s1990_s8  }
  0x24   : > { %s1943_s13 = scalar_lea.hbm %s2328_s1, 16 }
  0x25   : > { %p1944_p6 = scmp.ne.s32.totalorder %s2328_s1, %s1943_s13  ;;  %p1950_p8 = scmp.lt.u32.totalorder %s1943_s13, %s2328_s1 }
  0x27   : > { %p1946_p2 = pnand %p1944_p6, %p1917_p7 }
  0x29   : > { %p1947_p3 = pneg %p1946_p2 }
  0x2b   : > { %p1952_p9 = pnand %p1950_p8, %p1947_p3 }
  0x2d   : > { %1955 = shalt.err (!%p1952_p9)
}
  0x2e   : > { %s1956_s3 = scalar_lea.vmem %s2048_s23, 16  ;;  %s1963_s22 = scalar_lea.vmem %s2048_s23, 32 }
  0x2f   : > { %p1957_p10 = scmp.ne.s32.totalorder %s2048_s23, %s1956_s3  ;;  %p1964_p13 = scmp.lt.s32.totalorder %s2048_s23, %s2048_s23 }
  0x30   : > { %p1965_p0 = scmp.lt.s32.totalorder %s1963_s22, %s1956_s3 }
  0x31   : > { %p1959_p11 = pnand %p1957_p10, %p1917_p7 }
  0x32   : > { %p1966_p1 = por %p1965_p0, %p1964_p13 }
  0x33   : > { %p1960_p12 = pneg %p1959_p11 }
  0x35   : > { %p1967_p4 = pnand %p1966_p1, %p1960_p12 }
  0x37   : > { %1970 = shalt.err (!%p1967_p4)
}
  0x38   : > { %1873 = dma.hbm_to_vmem [thread:$0]  (!%p2044_p5), %s2328_s1, 16, %s2048_s23, [#allocation10]  }
  0x39   : > { %p2338_p6 = scmp.ne.s32.totalorder %s2335_s20, 0 }
  0x3b   : > { %168 = sbr.rel (%p2338_p6) target bundleno = 350 (0x15e), region = 32 }
  0x42   : > { %p2339_p7 = scmp.ne.s32.totalorder %s2336_s21, 0 }
  0x44   : > { %1976 = dma.done.wait (%p2339_p7), [#allocation8], 1024  }
  0x45   : > { %1978 = vsyncadd (%p2339_p7), [#allocation8], 4294966272 }
  0x46   : > { %1980 = dma.done.wait (%p2339_p7), [#allocation10], 16  }
  0x47   : > { %1982 = vsyncadd (%p2339_p7), [#allocation10], 4294967280  ;;  %s1550_s24 = sshll.u32 %s1541_s18, 5  ;;  %v1891_v2 = vld [vmem:[#allocation7] sm:$0xff]   ;;  %v220_v3 = vlaneseq  ;;  %v1892_v4 = vld [vmem:[#allocation7 + $0x8] sm:$0xff]   ;;  %v1991_v26 = vmov 0.0  }
  0x48   : > { %p197_p2 = scmp.lt.s32.totalorder %s1550_s24, 63  ;;  %1795 = vmatprep.subr.bf16.mxu0 %v1891_v2  ;;  %1843 = vmatprep.subr.bf16.mxu1 %v1891_v2  ;;  %v1893_v5 = vld [vmem:[#allocation7 + $0x10] sm:$0xff]   ;;  %v1894_v7 = vld [vmem:[#allocation7 + $0x18] sm:$0xff]   ;;  %v1895_v25 = vld [vmem:[#allocation7 + $0x20] sm:$0xff]  }
  0x49   : > { %1796 = vmatpush3.bf16.msra.mxu0 %v1891_v2  ;;  %1851 = vmatpush3.bf16.msra.mxu1 %v1891_v2  ;;  %v2113_v6 = vand.u32 127, %v220_v3  ;;  %v1896_v47 = vld [vmem:[#allocation7 + $0x28] sm:$0xff]   ;;  %v1897_v61 = vld [vmem:[#allocation7 + $0x30] sm:$0xff]  }
  0x4a   : > { %s2341_s24 = smov (!%p197_p2, %s1550_s24), 63  ;;  %1797 = vmatprep.subr.bf16.mxu0 %v1892_v4  ;;  %1844 = vmatprep.subr.bf16.mxu1 %v1892_v4 }
  0x4b   : > { %s1551_s20 = sshll.u32 %s2341_s24, 2  ;;  %vm223_vm0 = vcmp.lt.s32.totalorder %v2113_v6, 27 }
  0x4c   : > { %s2120_s23 = scalar_lea.vmem %s2329_s2, %s1551_s20  ;;  %s2282_s29 = scalar_lea.vmem %s2331_s4, %s1551_s20 }
  0x4d   : > { %1798 = vmatpush3.bf16.msra.mxu0 %v1892_v4  ;;  %1852 = vmatpush3.bf16.msra.mxu1 %v1892_v4  ;;  %v217_v8 = vld [vmem:[%s2120_s23] sm:$0xff]   ;;  %v1555_v10 = vld [vmem:[%s2120_s23 + $0x8] sm:$0xff]   ;;  %v1557_v16 = vld [vmem:[%s2120_s23 + $0x10] sm:$0xff]  }
  0x4e   : > { %1799 = vmatprep.subr.bf16.mxu0 %v1893_v5  ;;  %1845 = vmatprep.subr.bf16.mxu1 %v1893_v5  ;;  %v1569_v9 = vld [vmem:[%s2120_s23 + $0x40] sm:$0xff]   ;;  %v218_v11 = vunpack.c.l.bf16 %v217_v8  ;;  %v239_v12 = vunpack.c.h.bf16 %v217_v8  ;;  %v1571_v15 = vld [vmem:[%s2120_s23 + $0x48] sm:$0xff]   ;;  %v261_v17 = vunpack.c.l.bf16 %v1555_v10  ;;  %v283_v18 = vunpack.c.h.bf16 %v1555_v10  ;;  %v1573_v31 = vld [vmem:[%s2120_s23 + $0x50] sm:$0xff]  }
  0x4f   : > { %v569_v13 = vunpack.c.l.bf16 %v1569_v9  ;;  %v591_v14 = vunpack.c.h.bf16 %v1569_v9  ;;  %v613_v19 = vunpack.c.l.bf16 %v1571_v15  ;;  %v635_v20 = vunpack.c.h.bf16 %v1571_v15  ;;  %v1559_v40 = vld [vmem:[%s2120_s23 + $0x18] sm:$0xff]   ;;  %v1561_v46 = vld [vmem:[%s2120_s23 + $0x20] sm:$0xff]   ;;  %v1563_v8 = vld [vmem:[%s2120_s23 + $0x28] sm:$0xff]  }
  0x50   : > { %v224_v21 = vsel %vm223_vm0, %v218_v11, %v2020_v1  ;;  %v245_v22 = vsel %vm223_vm0, %v239_v12, %v2020_v1  ;;  %v305_v24 = vunpack.c.l.bf16 %v1557_v16  ;;  %v327_v30 = vunpack.c.h.bf16 %v1557_v16  ;;  %v1575_v41 = vld [vmem:[%s2120_s23 + $0x58] sm:$0xff]   ;;  %v1577_v56 = vld [vmem:[%s2120_s23 + $0x60] sm:$0xff]   ;;  %v1579_v9 = vld [vmem:[%s2120_s23 + $0x68] sm:$0xff]  }
  0x51   : > { %1800 = vmatpush3.bf16.msra.mxu0 %v1893_v5  ;;  %1853 = vmatpush3.bf16.msra.mxu1 %v1893_v5  ;;  %v575_v23 = vsel %vm223_vm0, %v569_v13, %v2020_v1  ;;  %v225_v27 = vpack.c.bf16 %v1991_v26, %v224_v21  ;;  %v247_v28 = vpack.c.bf16 %v1991_v26, %v245_v22  ;;  %v657_v45 = vunpack.c.l.bf16 %v1573_v31  ;;  %v1565_v10 = vld [vmem:[%s2120_s23 + $0x30] sm:$0xff]  }
  0x52   : > { %1801 = vmatprep.subr.bf16.mxu0 %v1894_v7  ;;  %1846 = vmatprep.subr.bf16.mxu1 %v1894_v7  ;;  %v577_v29 = vpack.c.bf16 %v1991_v26, %v575_v23  ;;  %v597_v32 = vsel %vm223_vm0, %v591_v14, %v2020_v1  ;;  %v267_v33 = vsel %vm223_vm0, %v261_v17, %v2020_v1  ;;  %v679_v51 = vunpack.c.h.bf16 %v1573_v31 }
  0x53   : > { %v289_v34 = vsel %vm223_vm0, %v283_v18, %v2020_v1  ;;  %v619_v35 = vsel %vm223_vm0, %v613_v19, %v2020_v1  ;;  %227 = vst [vmem:[#allocation11] sm:$0xf] %v225_v27  ;;  %249 = vst [vmem:[#allocation11 + $0x4] sm:$0xf] %v247_v28  ;;  %v599_v36 = vpack.c.bf16 %v1991_v26, %v597_v32  ;;  %v349_v53 = vunpack.c.l.bf16 %v1559_v40  ;;  %v1898_v27 = vld [vmem:[#allocation7 + $0x38] sm:$0xff]  }
  0x54   : > { %579 = vst [vmem:[#allocation11 + $0x40] sm:$0xf] %v577_v29  ;;  %v269_v37 = vpack.c.bf16 %v1991_v26, %v267_v33  ;;  %v291_v38 = vpack.c.bf16 %v1991_v26, %v289_v34  ;;  %v621_v39 = vpack.c.bf16 %v1991_v26, %v619_v35  ;;  %v641_v42 = vsel %vm223_vm0, %v635_v20, %v2020_v1  ;;  %v1581_v20 = vld [vmem:[%s2120_s23 + $0x70] sm:$0xff]  }
  0x55   : > { %1802 = vmatpush3.bf16.msra.mxu0 %v1894_v7  ;;  %1854 = vmatpush3.bf16.msra.mxu1 %v1894_v7  ;;  %v311_v43 = vsel %vm223_vm0, %v305_v24, %v2020_v1  ;;  %v333_v44 = vsel %vm223_vm0, %v327_v30, %v2020_v1  ;;  %601 = vst [vmem:[#allocation11 + $0x44] sm:$0xf] %v599_v36  ;;  %v371_v54 = vunpack.c.h.bf16 %v1559_v40  ;;  %v701_v55 = vunpack.c.l.bf16 %v1575_v41  ;;  %v1567_v36 = vld [vmem:[%s2120_s23 + $0x38] sm:$0xff]  }
  0x56   : > { %1803 = vmatprep.subr.bf16.mxu0 %v1895_v25  ;;  %1847 = vmatprep.subr.bf16.mxu1 %v1895_v25  ;;  %271 = vst [vmem:[#allocation11 + $0x8] sm:$0xf] %v269_v37  ;;  %293 = vst [vmem:[#allocation11 + $0xc] sm:$0xf] %v291_v38  ;;  %v643_v48 = vpack.c.bf16 %v1991_v26, %v641_v42  ;;  %v313_v49 = vpack.c.bf16 %v1991_v26, %v311_v43  ;;  %v723_v59 = vunpack.c.h.bf16 %v1575_v41 }
  0x57   : > { %623 = vst [vmem:[#allocation11 + $0x48] sm:$0xf] %v621_v39  ;;  %v335_v50 = vpack.c.bf16 %v1991_v26, %v333_v44  ;;  %v663_v52 = vsel %vm223_vm0, %v657_v45, %v2020_v1  ;;  %v685_v58 = vsel %vm223_vm0, %v679_v51, %v2020_v1  ;;  %v393_v60 = vunpack.c.l.bf16 %v1561_v46  ;;  %v1583_v45 = vld [vmem:[%s2120_s23 + $0x78] sm:$0xff]  }
  0x58   : > { %645 = vst [vmem:[#allocation11 + $0x4c] sm:$0xf] %v643_v48  ;;  %315 = vst [vmem:[#allocation11 + $0x10] sm:$0xf] %v313_v49  ;;  %v665_v57 = vpack.c.bf16 %v1991_v26, %v663_v52  ;;  %v687_v62 = vpack.c.bf16 %v1991_v26, %v685_v58  ;;  %v355_v63 = vsel %vm223_vm0, %v349_v53, %v2020_v1  ;;  %v415_v2 = vunpack.c.h.bf16 %v1561_v46 }
  0x59   : > { %337 = vst [vmem:[#allocation11 + $0x14] sm:$0xf] %v335_v50  ;;  %1804 = vmatpush3.bf16.msra.mxu0 %v1895_v25  ;;  %1855 = vmatpush3.bf16.msra.mxu1 %v1895_v25  ;;  %v377_v0 = vsel %vm223_vm0, %v371_v54, %v2020_v1  ;;  %v357_v3 = vpack.c.bf16 %v1991_v26, %v355_v63  ;;  %v745_v7 = vunpack.c.l.bf16 %v1577_v56  ;;  %v767_v23 = vunpack.c.h.bf16 %v1577_v56 }
  0x5a   : > { %1805 = vmatprep.subr.bf16.mxu0 %v1896_v47  ;;  %1848 = vmatprep.subr.bf16.mxu1 %v1896_v47  ;;  %667 = vst [vmem:[#allocation11 + $0x50] sm:$0xf] %v665_v57  ;;  %v379_v4 = vpack.c.bf16 %v1991_v26, %v377_v0  ;;  %v707_v5 = vsel %vm223_vm0, %v701_v55, %v2020_v1  ;;  %v1899_v11 = vld [vmem:[#allocation11] sm:$0xff]   ;;  %689 = vst [vmem:[#allocation11 + $0x54] sm:$0xf] %v687_v62  ;;  %v437_v24 = vunpack.c.l.bf16 %v1563_v8 }
  0x5b   : > { %v709_v12 = vpack.c.bf16 %v1991_v26, %v707_v5  ;;  %v729_v13 = vsel %vm223_vm0, %v723_v59, %v2020_v1  ;;  %v399_v14 = vsel %vm223_vm0, %v393_v60, %v2020_v1  ;;  %v421_v15 = vsel %vm223_vm0, %v415_v2, %v2020_v1  ;;  %359 = vst [vmem:[#allocation11 + $0x18] sm:$0xf] %v357_v3 }
  0x5c   : > { %381 = vst [vmem:[#allocation11 + $0x1c] sm:$0xf] %v379_v4  ;;  %v731_v16 = vpack.c.bf16 %v1991_v26, %v729_v13  ;;  %v401_v17 = vpack.c.bf16 %v1991_v26, %v399_v14  ;;  %v423_v18 = vpack.c.bf16 %v1991_v26, %v421_v15  ;;  %v751_v19 = vsel %vm223_vm0, %v745_v7, %v2020_v1  ;;  %v1900_v21 = vld [vmem:[#allocation11 + $0x40] sm:$0xff]  }
  0x5d   : > { %1806 = vmatpush3.bf16.msra.mxu0 %v1896_v47  ;;  %1856 = vmatpush3.bf16.msra.mxu1 %v1896_v47  ;;  %711 = vst [vmem:[#allocation11 + $0x58] sm:$0xf] %v709_v12  ;;  %v753_v22 = vpack.c.bf16 %v1991_v26, %v751_v19  ;;  %v459_v25 = vunpack.c.h.bf16 %v1563_v8  ;;  %v789_v28 = vunpack.c.l.bf16 %v1579_v9  ;;  %v811_v29 = vunpack.c.h.bf16 %v1579_v9  ;;  %v1901_v50 = vld [vmem:[#allocation11 + $0x8] sm:$0xff]  }
  0x5e   : > { %1807 = vmatprep.subr.bf16.mxu0 %v1897_v61  ;;  %1849 = vmatprep.subr.bf16.mxu1 %v1897_v61  ;;  %733 = vst [vmem:[#allocation11 + $0x5c] sm:$0xf] %v731_v16  ;;  %403 = vst [vmem:[#allocation11 + $0x20] sm:$0xf] %v401_v17  ;;  %v481_v30 = vunpack.c.l.bf16 %v1565_v10  ;;  %v503_v31 = vunpack.c.h.bf16 %v1565_v10  ;;  %v773_v32 = vsel %vm223_vm0, %v767_v23, %v2020_v1  ;;  %v833_v35 = vunpack.c.l.bf16 %v1581_v20  ;;  %v2267_v16 = vld [vmem:[#allocation9] ss:$0 sm:$0xff] }
  0x5f   : > { %425 = vst [vmem:[#allocation11 + $0x24] sm:$0xf] %v423_v18  ;;  %1811 = vmatprep.mubr.bf16.mxu0 %v1899_v11  ;;  %1827 = vmatprep.mubr.bf16.mxu1 %v1900_v21  ;;  %755 = vst [vmem:[#allocation11 + $0x60] sm:$0xf] %v753_v22  ;;  %v443_v33 = vsel %vm223_vm0, %v437_v24, %v2020_v1  ;;  %v465_v34 = vsel %vm223_vm0, %v459_v25, %v2020_v1  ;;  %v855_v44 = vunpack.c.h.bf16 %v1581_v20  ;;  %v1902_v55 = vld [vmem:[#allocation11 + $0x48] sm:$0xff]  }
  0x60   : > { %v775_v37 = vpack.c.bf16 %v1991_v26, %v773_v32  ;;  %v445_v38 = vpack.c.bf16 %v1991_v26, %v443_v33  ;;  %v467_v39 = vpack.c.bf16 %v1991_v26, %v465_v34  ;;  %v795_v40 = vsel %vm223_vm0, %v789_v28, %v2020_v1  ;;  %v1903_v56 = vld [vmem:[#allocation11 + $0x10] sm:$0xff]  }
  0x61   : > { %1808 = vmatpush3.bf16.msra.mxu0 %v1897_v61  ;;  %1857 = vmatpush3.bf16.msra.mxu1 %v1897_v61  ;;  %v797_v41 = vpack.c.bf16 %v1991_v26, %v795_v40  ;;  %v817_v42 = vsel %vm223_vm0, %v811_v29, %v2020_v1  ;;  %v487_v43 = vsel %vm223_vm0, %v481_v30, %v2020_v1  ;;  %v525_v49 = vunpack.c.l.bf16 %v1567_v36  ;;  %v1904_v61 = vld [vmem:[#allocation11 + $0x50] sm:$0xff]  }
  0x62   : > { %1809 = vmatprep.subr.bf16.mxu0 %v1898_v27  ;;  %1850 = vmatprep.subr.bf16.mxu1 %v1898_v27  ;;  %777 = vst [vmem:[#allocation11 + $0x64] sm:$0xf] %v775_v37  ;;  %447 = vst [vmem:[#allocation11 + $0x28] sm:$0xf] %v445_v38  ;;  %v819_v46 = vpack.c.bf16 %v1991_v26, %v817_v42  ;;  %v489_v47 = vpack.c.bf16 %v1991_v26, %v487_v43  ;;  %v547_v54 = vunpack.c.h.bf16 %v1567_v36 }
  0x63   : > { %469 = vst [vmem:[#allocation11 + $0x2c] sm:$0xf] %v467_v39  ;;  %v509_v48 = vsel %vm223_vm0, %v503_v31, %v2020_v1  ;;  %799 = vst [vmem:[#allocation11 + $0x68] sm:$0xf] %v797_v41  ;;  %v839_v52 = vsel %vm223_vm0, %v833_v35, %v2020_v1  ;;  %v861_v53 = vsel %vm223_vm0, %v855_v44, %v2020_v1  ;;  %v877_v60 = vunpack.c.l.bf16 %v1583_v45  ;;  %v1905_v8 = vld [vmem:[#allocation11 + $0x18] sm:$0xff]  }
  0x64   : > { %v511_v51 = vpack.c.bf16 %v1991_v26, %v509_v48  ;;  %821 = vst [vmem:[#allocation11 + $0x6c] sm:$0xf] %v819_v46  ;;  %491 = vst [vmem:[#allocation11 + $0x30] sm:$0xf] %v489_v47  ;;  %v841_v57 = vpack.c.bf16 %v1991_v26, %v839_v52  ;;  %v863_v58 = vpack.c.bf16 %v1991_v26, %v861_v53  ;;  %v899_v0 = vunpack.c.h.bf16 %v1583_v45 }
  0x65   : > { %v531_v59 = vsel %vm223_vm0, %v525_v49, %v2020_v1  ;;  %1810 = vmatpush3.bf16.msra.mxu0 %v1898_v27  ;;  %1858 = vmatpush3.bf16.msra.mxu1 %v1898_v27  ;;  %v553_v63 = vsel %vm223_vm0, %v547_v54, %v2020_v1  ;;  %v883_v3 = vsel %vm223_vm0, %v877_v60, %v2020_v1  ;;  %v1906_v9 = vld [vmem:[#allocation11 + $0x58] sm:$0xff]  }
  0x66   : > { %513 = vst [vmem:[#allocation11 + $0x34] sm:$0xf] %v511_v51  ;;  %v533_v62 = vpack.c.bf16 %v1991_v26, %v531_v59  ;;  %843 = vst [vmem:[#allocation11 + $0x70] sm:$0xf] %v841_v57  ;;  %v555_v2 = vpack.c.bf16 %v1991_v26, %v553_v63  ;;  %v885_v4 = vpack.c.bf16 %v1991_v26, %v883_v3  ;;  %v1907_v10 = vld [vmem:[#allocation11 + $0x20] sm:$0xff]  }
  0x67   : > { %865 = vst [vmem:[#allocation11 + $0x74] sm:$0xf] %v863_v58  ;;  %v905_v5 = vsel %vm223_vm0, %v899_v0, %v2020_v1 }
  0x68   : > { %535 = vst [vmem:[#allocation11 + $0x38] sm:$0xf] %v533_v62  ;;  %1812 = vmatmul.mubr.bf16.vlgmr.msra.gmra.mrb[0].mxu0 %v1901_v50  ;;  %1828 = vmatmul.mubr.bf16.vlgmr.msra.gmra.mrb[0].mxu1 %v1902_v55  ;;  %557 = vst [vmem:[#allocation11 + $0x3c] sm:$0xf] %v555_v2  ;;  %v907_v7 = vpack.c.bf16 %v1991_v26, %v905_v5 }
  0x69   : > { %1815 = vmatprep.mubr.bf16.mxu0 %v1903_v56  ;;  %1831 = vmatprep.mubr.bf16.mxu1 %v1904_v61  ;;  %887 = vst [vmem:[#allocation11 + $0x78] sm:$0xf] %v885_v4  ;;  %v1908_v11 = vld [vmem:[#allocation11 + $0x60] sm:$0xff]  }
  0x6a   : > { %909 = vst [vmem:[#allocation11 + $0x7c] sm:$0xf] %v907_v7  ;;  %v1909_v12 = vld [vmem:[#allocation11 + $0x28] sm:$0xff]  }
  0x6b   : > { %v1910_v6 = vld [vmem:[#allocation11 + $0x68] sm:$0xff]  }
  0x6d   : > { %v1911_v13 = vld [vmem:[#allocation11 + $0x30] sm:$0xff]  }
  0x6e   : > { %v1912_v14 = vld [vmem:[#allocation11 + $0x70] sm:$0xff]  }
  0x6f   : > { %v1913_v26 = vld [vmem:[#allocation11 + $0x38] sm:$0xff]  }
  0x70   : > { %1816 = vmatmul.mubr.bf16.gmra.mrb[4].mxu0 %v1905_v8  ;;  %1832 = vmatmul.mubr.bf16.gmra.mrb[4].mxu1 %v1906_v9 }
  0x71   : > { %1819 = vmatprep.mubr.bf16.mxu0 %v1907_v10  ;;  %1835 = vmatprep.mubr.bf16.mxu1 %v1908_v11  ;;  %v1914_v15 = vld [vmem:[#allocation11 + $0x78] sm:$0xff]  }
  0x78   : > { %1820 = vmatmul.mubr.bf16.gmra.mrb[8].mxu0 %v1909_v12  ;;  %1836 = vmatmul.mubr.bf16.gmra.mrb[8].mxu1 %v1910_v6 }
  0x79   : > { %1823 = vmatprep.mubr.bf16.mxu0 %v1911_v13  ;;  %1839 = vmatprep.mubr.bf16.mxu1 %v1912_v14 }
  0x80   : > { %1824 = vmatmul.mubr.bf16.gmra.mrb[12].mxu0 %v1913_v26  ;;  %1840 = vmatmul.mubr.bf16.gmra.mrb[12].mxu1 %v1914_v15 }
 0x13b   : > { %v1813_v17 = vpop.f32.mrb[0].mxu0  ;;  %v1829_v18 = vpop.f32.mrb[0].mxu1 }
 0x13c   : > { %v1153_v19 = vadd.f32 %v1813_v17, %v2267_v16  ;;  %v1217_v20 = vadd.f32 %v1829_v18, %v2267_v16  ;;  %v1144_v21 = vpop.f32.mrb[1].mxu0  ;;  %v1208_v22 = vpop.f32.mrb[1].mxu1 }
 0x13d   : > { %v1145_v23 = vadd.f32 %v2267_v16, %v1144_v21  ;;  %v1209_v24 = vadd.f32 %v2267_v16, %v1208_v22  ;;  %v1814_v25 = vpop.f32.mrb[2].mxu0  ;;  %v1830_v27 = vpop.f32.mrb[2].mxu1 }
 0x13e   : > { %v1156_v28 = vadd.f32 %v1814_v25, %v2267_v16  ;;  %v1220_v29 = vadd.f32 %v1830_v27, %v2267_v16  ;;  %v1147_v30 = vpop.f32.mrb[3].mxu0  ;;  %v1211_v31 = vpop.f32.mrb[3].mxu1  ;;  %v1273_v34 = vmax.f32 %v1153_v19, 0.0  ;;  %v1289_v35 = vmax.f32 %v1217_v20, 0.0 }
 0x13f   : > { %v1148_v32 = vadd.f32 %v2267_v16, %v1147_v30  ;;  %v1212_v33 = vadd.f32 %v2267_v16, %v1211_v31  ;;  %v1271_v38 = vmax.f32 %v1145_v23, 0.0  ;;  %v1287_v39 = vmax.f32 %v1209_v24, 0.0 }
 0x140   : > { %v1274_v36 = vmax.f32 %v1156_v28, 0.0  ;;  %v1290_v37 = vmax.f32 %v1220_v29, 0.0 }
 0x141   : > { %v1272_v40 = vmax.f32 %v1148_v32, 0.0  ;;  %v1288_v41 = vmax.f32 %v1212_v33, 0.0 }
 0x142   : > { %v1684_v42 = vpack.c.bf16 %v1274_v36, %v1273_v34  ;;  %v1724_v43 = vpack.c.bf16 %v1290_v37, %v1289_v35 }
 0x143   : > { %v1679_v44 = vpack.c.bf16 %v1272_v40, %v1271_v38  ;;  %v1719_v45 = vpack.c.bf16 %v1288_v41, %v1287_v39  ;;  %v1817_v46 = vpop.f32.mrb[4].mxu0  ;;  %v1833_v47 = vpop.f32.mrb[4].mxu1 }
 0x144   : > { %1756 = vst [vmem:[%s2282_s29 + $0x8] sm:$0xff] %v1684_v42   ;;  %1764 = vst [vmem:[%s2282_s29 + $0x48] sm:$0xff] %v1724_v43   ;;  %v1169_v48 = vadd.f32 %v1817_v46, %v2267_v16  ;;  %v1233_v49 = vadd.f32 %v1833_v47, %v2267_v16  ;;  %v1160_v50 = vpop.f32.mrb[5].mxu0  ;;  %v1224_v51 = vpop.f32.mrb[5].mxu1 }
 0x145   : > { %1680 = vst [vmem:[%s2282_s29] sm:$0xff] %v1679_v44   ;;  %1763 = vst [vmem:[%s2282_s29 + $0x40] sm:$0xff] %v1719_v45   ;;  %v1161_v52 = vadd.f32 %v2267_v16, %v1160_v50  ;;  %v1225_v53 = vadd.f32 %v2267_v16, %v1224_v51  ;;  %v1818_v54 = vpop.f32.mrb[6].mxu0  ;;  %v1834_v55 = vpop.f32.mrb[6].mxu1 }
 0x146   : > { %v1172_v56 = vadd.f32 %v1818_v54, %v2267_v16  ;;  %v1236_v57 = vadd.f32 %v1834_v55, %v2267_v16  ;;  %v1163_v58 = vpop.f32.mrb[7].mxu0  ;;  %v1227_v59 = vpop.f32.mrb[7].mxu1  ;;  %v1277_v62 = vmax.f32 %v1169_v48, 0.0  ;;  %v1293_v63 = vmax.f32 %v1233_v49, 0.0 }
 0x147   : > { %v1164_v60 = vadd.f32 %v2267_v16, %v1163_v58  ;;  %v1228_v61 = vadd.f32 %v2267_v16, %v1227_v59  ;;  %v1275_v3 = vmax.f32 %v1161_v52, 0.0  ;;  %v1291_v4 = vmax.f32 %v1225_v53, 0.0 }
 0x148   : > { %v1278_v0 = vmax.f32 %v1172_v56, 0.0  ;;  %v1294_v2 = vmax.f32 %v1236_v57, 0.0 }
 0x149   : > { %v1276_v5 = vmax.f32 %v1164_v60, 0.0  ;;  %v1292_v7 = vmax.f32 %v1228_v61, 0.0 }
 0x14a   : > { %v1694_v8 = vpack.c.bf16 %v1278_v0, %v1277_v62  ;;  %v1734_v9 = vpack.c.bf16 %v1294_v2, %v1293_v63 }
 0x14b   : > { %v1689_v10 = vpack.c.bf16 %v1276_v5, %v1275_v3  ;;  %v1729_v11 = vpack.c.bf16 %v1292_v7, %v1291_v4  ;;  %v1821_v12 = vpop.f32.mrb[8].mxu0  ;;  %v1837_v6 = vpop.f32.mrb[8].mxu1 }
 0x14c   : > { %1758 = vst [vmem:[%s2282_s29 + $0x18] sm:$0xff] %v1694_v8   ;;  %1766 = vst [vmem:[%s2282_s29 + $0x58] sm:$0xff] %v1734_v9   ;;  %v1185_v13 = vadd.f32 %v1821_v12, %v2267_v16  ;;  %v1249_v14 = vadd.f32 %v1837_v6, %v2267_v16  ;;  %v1176_v26 = vpop.f32.mrb[9].mxu0  ;;  %v1240_v15 = vpop.f32.mrb[9].mxu1 }
 0x14d   : > { %1757 = vst [vmem:[%s2282_s29 + $0x10] sm:$0xff] %v1689_v10   ;;  %1765 = vst [vmem:[%s2282_s29 + $0x50] sm:$0xff] %v1729_v11   ;;  %v1177_v17 = vadd.f32 %v2267_v16, %v1176_v26  ;;  %v1241_v18 = vadd.f32 %v2267_v16, %v1240_v15  ;;  %v1822_v19 = vpop.f32.mrb[10].mxu0  ;;  %v1838_v20 = vpop.f32.mrb[10].mxu1 }
 0x14e   : > { %v1188_v21 = vadd.f32 %v1822_v19, %v2267_v16  ;;  %v1252_v22 = vadd.f32 %v1838_v20, %v2267_v16  ;;  %v1179_v23 = vpop.f32.mrb[11].mxu0  ;;  %v1243_v24 = vpop.f32.mrb[11].mxu1  ;;  %v1281_v28 = vmax.f32 %v1185_v13, 0.0  ;;  %v1297_v29 = vmax.f32 %v1249_v14, 0.0 }
 0x14f   : > { %v1180_v25 = vadd.f32 %v2267_v16, %v1179_v23  ;;  %v1244_v27 = vadd.f32 %v2267_v16, %v1243_v24  ;;  %v1279_v32 = vmax.f32 %v1177_v17, 0.0  ;;  %v1295_v33 = vmax.f32 %v1241_v18, 0.0 }
 0x150   : > { %v1282_v30 = vmax.f32 %v1188_v21, 0.0  ;;  %v1298_v31 = vmax.f32 %v1252_v22, 0.0 }
 0x151   : > { %v1280_v34 = vmax.f32 %v1180_v25, 0.0  ;;  %v1296_v35 = vmax.f32 %v1244_v27, 0.0 }
 0x152   : > { %v1704_v36 = vpack.c.bf16 %v1282_v30, %v1281_v28  ;;  %v1744_v37 = vpack.c.bf16 %v1298_v31, %v1297_v29 }
 0x153   : > { %v1699_v38 = vpack.c.bf16 %v1280_v34, %v1279_v32  ;;  %v1739_v39 = vpack.c.bf16 %v1296_v35, %v1295_v33  ;;  %v1825_v40 = vpop.f32.mrb[12].mxu0  ;;  %v1841_v41 = vpop.f32.mrb[12].mxu1 }
 0x154   : > { %1760 = vst [vmem:[%s2282_s29 + $0x28] sm:$0xff] %v1704_v36   ;;  %1768 = vst [vmem:[%s2282_s29 + $0x68] sm:$0xff] %v1744_v37   ;;  %v1201_v42 = vadd.f32 %v1825_v40, %v2267_v16  ;;  %v1265_v43 = vadd.f32 %v1841_v41, %v2267_v16  ;;  %v1192_v44 = vpop.f32.mrb[13].mxu0  ;;  %v1256_v45 = vpop.f32.mrb[13].mxu1 }
 0x155   : > { %1759 = vst [vmem:[%s2282_s29 + $0x20] sm:$0xff] %v1699_v38   ;;  %1767 = vst [vmem:[%s2282_s29 + $0x60] sm:$0xff] %v1739_v39   ;;  %v1193_v46 = vadd.f32 %v2267_v16, %v1192_v44  ;;  %v1257_v47 = vadd.f32 %v2267_v16, %v1256_v45  ;;  %v1826_v48 = vpop.f32.mrb[14].mxu0  ;;  %v1842_v49 = vpop.f32.mrb[14].mxu1 }
 0x156   : > { %v1204_v50 = vadd.f32 %v1826_v48, %v2267_v16  ;;  %v1268_v51 = vadd.f32 %v1842_v49, %v2267_v16  ;;  %v1195_v52 = vpop.f32.mrb[15].mxu0  ;;  %v1259_v53 = vpop.f32.mrb[15].mxu1  ;;  %v1285_v56 = vmax.f32 %v1201_v42, 0.0  ;;  %v1301_v57 = vmax.f32 %v1265_v43, 0.0 }
 0x157   : > { %v1196_v54 = vadd.f32 %v2267_v16, %v1195_v52  ;;  %v1260_v55 = vadd.f32 %v2267_v16, %v1259_v53  ;;  %v1283_v60 = vmax.f32 %v1193_v46, 0.0  ;;  %v1299_v61 = vmax.f32 %v1257_v47, 0.0 }
 0x158   : > { %v1286_v58 = vmax.f32 %v1204_v50, 0.0  ;;  %v1302_v59 = vmax.f32 %v1268_v51, 0.0 }
 0x159   : > { %v1284_v62 = vmax.f32 %v1196_v54, 0.0  ;;  %v1300_v63 = vmax.f32 %v1260_v55, 0.0 }
 0x15a   : > { %v1714_v0 = vpack.c.bf16 %v1286_v58, %v1285_v56  ;;  %v1754_v2 = vpack.c.bf16 %v1302_v59, %v1301_v57 }
 0x15b   : > { %v1709_v3 = vpack.c.bf16 %v1284_v62, %v1283_v60  ;;  %v1749_v4 = vpack.c.bf16 %v1300_v63, %v1299_v61 }
 0x15c   : > { %1762 = vst [vmem:[%s2282_s29 + $0x38] sm:$0xff] %v1714_v0   ;;  %1770 = vst [vmem:[%s2282_s29 + $0x78] sm:$0xff] %v1754_v2  }
 0x15d   : > { %1761 = vst [vmem:[%s2282_s29 + $0x30] sm:$0xff] %v1709_v3   ;;  %1769 = vst [vmem:[%s2282_s29 + $0x70] sm:$0xff] %v1749_v4  }
 0x15e PF: > { %s21_s17 = sadd.s32 1, %s1985_s17  }
 0x15f   : > { %p18_p5 = scmp.ge.s32.totalorder %s21_s17, 4  }
 0x161   :  { %20 = sbr.rel (!%p18_p5) target bundleno = 5 (0x5), region = 133 }
 0x168   :  { %1485 = vsyncpa [#allocation8], 1 }
 0x169   :  { %1487 = vsyncpa [#allocation8 + $0x1], 1 }
 0x16a   :  { %1488 = vsyncpa [#allocation10], 1 }

// kernel: ae_forward.20
= control target key start
LH: loop header
LB: loop body
LE: loop exit
PB: predicated region body
PF: predicated region fallthrough
CT: control target
= control target key end

     0   :  { %s1538_s0 = inlined_call_operand.vmem [shape: bf16[256,128], index: 0, kind: input, shape index: {}]   ;;  %s1539_s1 = inlined_call_operand.vmem [shape: f32[1,128], index: 1, kind: input, shape index: {}]   ;;  %s1540_s2 = inlined_call_operand.vmem [shape: bf16[128,144], index: 2, kind: input, shape index: {}]   ;;  %s1541_s3 = inlined_call_operand.<no memory space> [shape: bf16[], index: 3, kind: input, shape index: {}]   ;;  %s1542_s4 = inlined_call_operand.vmem [shape: bf16[128,128], index: 4, kind: output, shape index: {}]  }
   0x1   :  { %v9_v0 = vstv %s1541_s3 }
   0x2   :  { %v1300_v1 = vunpack.i.l.bf16 %v9_v0 }
   0x3   :  { %v1231_v2 = vld [vmem:[%s1538_s0 + $0x40] sm:$0xff]   ;;  %v1233_v4 = vld [vmem:[%s1538_s0 + $0x48] sm:$0xff]   ;;  %v44_v6 = vlaneseq  ;;  %v1235_v7 = vld [vmem:[%s1538_s0 + $0x50] sm:$0xff]   ;;  %v1271_v38 = vmov 0.0  }
   0x4   :  { %v1232_v3 = vld [vmem:[%s1538_s0] sm:$0xff]   ;;  %1150 = vmatprep.subr.bf16.mxu0 %v1231_v2  ;;  %1214 = vmatprep.subr.bf16.mxu1 %v1231_v2  ;;  %v1234_v5 = vld [vmem:[%s1538_s0 + $0x8] sm:$0xff]   ;;  %v1236_v8 = vld [vmem:[%s1538_s0 + $0x10] sm:$0xff]  }
   0x5   :  { %1151 = vmatpush3.bf16.msra.mxu0 %v1232_v3  ;;  %1222 = vmatpush3.bf16.msra.mxu1 %v1232_v3  ;;  %v45_v9 = vand.u32 127, %v44_v6  ;;  %v1237_v10 = vld [vmem:[%s1538_s0 + $0x58] sm:$0xff]   ;;  %v1239_v13 = vld [vmem:[%s1538_s0 + $0x60] sm:$0xff]   ;;  %v1241_v15 = vld [vmem:[%s1538_s0 + $0x68] sm:$0xff]  }
   0x6   :  { %1152 = vmatprep.subr.bf16.mxu0 %v1233_v4  ;;  %1215 = vmatprep.subr.bf16.mxu1 %v1233_v4  ;;  %v1238_v11 = vld [vmem:[%s1538_s0 + $0x18] sm:$0xff]   ;;  %v1240_v14 = vld [vmem:[%s1538_s0 + $0x20] sm:$0xff]   ;;  %v1008_v18 = vld [vmem:[%s1540_s2 + $0x8] sm:$0xf] }
   0x7   :  { %v1326_v12 = vadd.s32 128, %v45_v9  ;;  %v20_v16 = vld [vmem:[%s1540_s2] sm:$0xf]  ;;  %v1007_v17 = vld [vmem:[%s1540_s2 + $0x4] ss:$8 sps:$4 sm:$0xff]   ;;  %v1362_v25 = vld [vmem:[%s1538_s0 + $0x70] sm:$0xff]  }
   0x8   :  { %v1242_v19 = vld [vmem:[%s1538_s0 + $0x28] sm:$0xff]   ;;  %30 = vst [vmem:[#allocation7] sm:$0xf] %v20_v16  ;;  %v42_v20 = vunpack.c.l.bf16 %v1007_v17  ;;  %65 = vst [vmem:[#allocation7 + $0x8] sm:$0xf] %v1008_v18  ;;  %v77_v21 = vunpack.c.h.bf16 %v1007_v17  ;;  %v1244_v46 = vld [vmem:[%s1538_s0 + $0x30] sm:$0xff]  }
   0x9   :  { %1153 = vmatpush3.bf16.msra.mxu0 %v1234_v5  ;;  %1223 = vmatpush3.bf16.msra.mxu1 %v1234_v5  ;;  %vm47_vm0 = vcmp.lt.s32.totalorder %v1326_v12, 144  ;;  %v1022_v22 = vld [vmem:[%s1540_s2 + $0x40] sm:$0xf]  ;;  %v1023_v23 = vld [vmem:[%s1540_s2 + $0x44] ss:$8 sps:$4 sm:$0xff]   ;;  %v1245_v5 = vld [vmem:[%s1538_s0 + $0x78] sm:$0xff]  }
   0xa   :  { %1154 = vmatprep.subr.bf16.mxu0 %v1235_v7  ;;  %1216 = vmatprep.subr.bf16.mxu1 %v1235_v7  ;;  %v1024_v24 = vld [vmem:[%s1540_s2 + $0x48] sm:$0xf]  ;;  %310 = vst [vmem:[#allocation7 + $0x40] sm:$0xf] %v1022_v22  ;;  %v322_v26 = vunpack.c.l.bf16 %v1023_v23  ;;  %v357_v27 = vunpack.c.h.bf16 %v1023_v23  ;;  %v1010_v28 = vld [vmem:[%s1540_s2 + $0x10] sm:$0xf]  ;;  %v48_v31 = vsel %vm47_vm0, %v42_v20, %v1300_v1  ;;  %v83_v32 = vsel %vm47_vm0, %v77_v21, %v1300_v1 }
   0xb   :  { %345 = vst [vmem:[#allocation7 + $0x48] sm:$0xf] %v1024_v24  ;;  %v1011_v29 = vld [vmem:[%s1540_s2 + $0x14] ss:$8 sps:$4 sm:$0xff]   ;;  %v1012_v30 = vld [vmem:[%s1540_s2 + $0x18] sm:$0xf]  ;;  %v50_v39 = vpack.c.bf16 %v1271_v38, %v48_v31  ;;  %v85_v40 = vpack.c.bf16 %v1271_v38, %v83_v32 }
   0xc   :  { %100 = vst [vmem:[#allocation7 + $0x10] sm:$0xf] %v1010_v28  ;;  %v112_v33 = vunpack.c.l.bf16 %v1011_v29  ;;  %135 = vst [vmem:[#allocation7 + $0x18] sm:$0xf] %v1012_v30  ;;  %v147_v34 = vunpack.c.h.bf16 %v1011_v29  ;;  %v1026_v35 = vld [vmem:[%s1540_s2 + $0x50] sm:$0xf]  ;;  %v328_v41 = vsel %vm47_vm0, %v322_v26, %v1300_v1  ;;  %v363_v48 = vsel %vm47_vm0, %v357_v27, %v1300_v1 }
   0xd   :  { %1155 = vmatpush3.bf16.msra.mxu0 %v1236_v8  ;;  %1224 = vmatpush3.bf16.msra.mxu1 %v1236_v8  ;;  %v1027_v36 = vld [vmem:[%s1540_s2 + $0x54] ss:$8 sps:$4 sm:$0xff]   ;;  %v1028_v37 = vld [vmem:[%s1540_s2 + $0x58] sm:$0xf]  ;;  %380 = vst [vmem:[#allocation7 + $0x50] sm:$0xf] %v1026_v35  ;;  %v330_v47 = vpack.c.bf16 %v1271_v38, %v328_v41  ;;  %v365_v54 = vpack.c.bf16 %v1271_v38, %v363_v48 }
   0xe   :  { %1156 = vmatprep.subr.bf16.mxu0 %v1237_v10  ;;  %1217 = vmatprep.subr.bf16.mxu1 %v1237_v10  ;;  %v392_v42 = vunpack.c.l.bf16 %v1027_v36  ;;  %415 = vst [vmem:[#allocation7 + $0x58] sm:$0xf] %v1028_v37  ;;  %v1014_v43 = vld [vmem:[%s1540_s2 + $0x20] sm:$0xf]  ;;  %v1015_v44 = vld [vmem:[%s1540_s2 + $0x24] ss:$8 sps:$4 sm:$0xff]   ;;  %v118_v49 = vsel %vm47_vm0, %v112_v33, %v1300_v1  ;;  %v153_v50 = vsel %vm47_vm0, %v147_v34, %v1300_v1  ;;  %v427_v62 = vunpack.c.h.bf16 %v1027_v36 }
   0xf   :  { %v1016_v45 = vld [vmem:[%s1540_s2 + $0x28] sm:$0xf]  ;;  %170 = vst [vmem:[#allocation7 + $0x20] sm:$0xf] %v1014_v43  ;;  %v1030_v51 = vld [vmem:[%s1540_s2 + $0x60] sm:$0xf]  ;;  %v120_v55 = vpack.c.bf16 %v1271_v38, %v118_v49  ;;  %v155_v56 = vpack.c.bf16 %v1271_v38, %v153_v50  ;;  %v182_v63 = vunpack.c.l.bf16 %v1015_v44  ;;  %v217_v0 = vunpack.c.h.bf16 %v1015_v44 }
  0x10   :  { %205 = vst [vmem:[#allocation7 + $0x28] sm:$0xf] %v1016_v45  ;;  %v1031_v52 = vld [vmem:[%s1540_s2 + $0x64] ss:$8 sps:$4 sm:$0xff]   ;;  %v1032_v53 = vld [vmem:[%s1540_s2 + $0x68] sm:$0xf]  ;;  %v398_v57 = vsel %vm47_vm0, %v392_v42, %v1300_v1  ;;  %v433_v10 = vsel %vm47_vm0, %v427_v62, %v1300_v1 }
  0x11   :  { %1157 = vmatpush3.bf16.msra.mxu0 %v1238_v11  ;;  %1225 = vmatpush3.bf16.msra.mxu1 %v1238_v11  ;;  %52 = vst [vmem:[#allocation7 + $0x4] sm:$0xf] %v50_v39  ;;  %87 = vst [vmem:[#allocation7 + $0xc] sm:$0xf] %v85_v40  ;;  %v1018_v58 = vld [vmem:[%s1540_s2 + $0x30] sm:$0xf]  ;;  %v400_v61 = vpack.c.bf16 %v1271_v38, %v398_v57  ;;  %v462_v6 = vunpack.c.l.bf16 %v1031_v52  ;;  %v497_v7 = vunpack.c.h.bf16 %v1031_v52 }
  0x12   :  { %1158 = vmatprep.subr.bf16.mxu0 %v1239_v13  ;;  %1218 = vmatprep.subr.bf16.mxu1 %v1239_v13  ;;  %450 = vst [vmem:[#allocation7 + $0x60] sm:$0xf] %v1030_v51  ;;  %485 = vst [vmem:[#allocation7 + $0x68] sm:$0xf] %v1032_v53  ;;  %v1019_v59 = vld [vmem:[%s1540_s2 + $0x34] ss:$8 sps:$4 sm:$0xff]   ;;  %v188_v11 = vsel %vm47_vm0, %v182_v63, %v1300_v1  ;;  %v223_v13 = vsel %vm47_vm0, %v217_v0, %v1300_v1 }
  0x13   :  { %v1020_v60 = vld [vmem:[%s1540_s2 + $0x38] sm:$0xf]  ;;  %332 = vst [vmem:[#allocation7 + $0x44] sm:$0xf] %v330_v47  ;;  %240 = vst [vmem:[#allocation7 + $0x30] sm:$0xf] %v1018_v58  ;;  %v252_v8 = vunpack.c.l.bf16 %v1019_v59  ;;  %v287_v9 = vunpack.c.h.bf16 %v1019_v59  ;;  %v190_v16 = vpack.c.bf16 %v1271_v38, %v188_v11  ;;  %v225_v17 = vpack.c.bf16 %v1271_v38, %v223_v13 }
  0x14   :  { %275 = vst [vmem:[#allocation7 + $0x38] sm:$0xf] %v1020_v60  ;;  %v1034_v2 = vld [vmem:[%s1540_s2 + $0x70] sm:$0xf]  ;;  %v1035_v3 = vld [vmem:[%s1540_s2 + $0x74] ss:$8 sps:$4 sm:$0xff]   ;;  %v468_v18 = vsel %vm47_vm0, %v462_v6, %v1300_v1  ;;  %v503_v21 = vsel %vm47_vm0, %v497_v7, %v1300_v1 }
  0x15   :  { %1159 = vmatpush3.bf16.msra.mxu0 %v1240_v14  ;;  %1226 = vmatpush3.bf16.msra.mxu1 %v1240_v14  ;;  %v1036_v4 = vld [vmem:[%s1540_s2 + $0x78] sm:$0xf]  ;;  %367 = vst [vmem:[#allocation7 + $0x4c] sm:$0xf] %v365_v54  ;;  %122 = vst [vmem:[#allocation7 + $0x14] sm:$0xf] %v120_v55  ;;  %v532_v14 = vunpack.c.l.bf16 %v1035_v3  ;;  %v470_v20 = vpack.c.bf16 %v1271_v38, %v468_v18  ;;  %v258_v22 = vsel %vm47_vm0, %v252_v8, %v1300_v1 }
  0x16   :  { %1160 = vmatprep.subr.bf16.mxu0 %v1241_v15  ;;  %1219 = vmatprep.subr.bf16.mxu1 %v1241_v15  ;;  %157 = vst [vmem:[#allocation7 + $0x1c] sm:$0xf] %v155_v56  ;;  %520 = vst [vmem:[#allocation7 + $0x70] sm:$0xf] %v1034_v2  ;;  %v435_v15 = vpack.c.bf16 %v1271_v38, %v433_v10  ;;  %v567_v23 = vunpack.c.h.bf16 %v1035_v3  ;;  %v505_v24 = vpack.c.bf16 %v1271_v38, %v503_v21  ;;  %v1247_v30 = vld [vmem:[#allocation7] ss:$8 sps:$4 sm:$0xff]  }
  0x17   :  { %555 = vst [vmem:[#allocation7 + $0x78] sm:$0xf] %v1036_v4  ;;  %402 = vst [vmem:[#allocation7 + $0x54] sm:$0xf] %v400_v61  ;;  %v293_v26 = vsel %vm47_vm0, %v287_v9, %v1300_v1  ;;  %v538_v28 = vsel %vm47_vm0, %v532_v14, %v1300_v1  ;;  %v1250_v34 = vld [vmem:[#allocation7 + $0x40] ss:$8 sps:$4 sm:$0xff]  }
  0x18   :  { %437 = vst [vmem:[#allocation7 + $0x5c] sm:$0xf] %v435_v15  ;;  %192 = vst [vmem:[#allocation7 + $0x24] sm:$0xf] %v190_v16  ;;  %v295_v27 = vpack.c.bf16 %v1271_v38, %v293_v26  ;;  %v573_v29 = vsel %vm47_vm0, %v567_v23, %v1300_v1  ;;  %v1249_v31 = vld [vmem:[#allocation7 + $0x4] ss:$8 sps:$4 sm:$0xff]   ;;  %v540_v32 = vpack.c.bf16 %v1271_v38, %v538_v28 }
  0x19   :  { %1161 = vmatpush3.bf16.msra.mxu0 %v1242_v19  ;;  %1227 = vmatpush3.bf16.msra.mxu1 %v1242_v19  ;;  %v1246_v19 = vld [vmem:[%s1538_s0 + $0x38] sm:$0xff]   ;;  %227 = vst [vmem:[#allocation7 + $0x2c] sm:$0xf] %v225_v17  ;;  %472 = vst [vmem:[#allocation7 + $0x64] sm:$0xf] %v470_v20  ;;  %v575_v33 = vpack.c.bf16 %v1271_v38, %v573_v29 }
  0x1a   :  { %1162 = vmatprep.subr.bf16.mxu0 %v1362_v25  ;;  %1220 = vmatprep.subr.bf16.mxu1 %v1362_v25  ;;  %v260_v25 = vpack.c.bf16 %v1271_v38, %v258_v22  ;;  %507 = vst [vmem:[#allocation7 + $0x6c] sm:$0xf] %v505_v24  ;;  %297 = vst [vmem:[#allocation7 + $0x3c] sm:$0xf] %v295_v27  ;;  %v1257_v12 = vld [vmem:[#allocation7 + $0x10] ss:$8 sps:$4 sm:$0xff]  }
  0x1b   :  { %842 = vmatprep.mubr.bf16.mxu0 %v1249_v31  ;;  %542 = vst [vmem:[#allocation7 + $0x74] sm:$0xf] %v540_v32  ;;  %577 = vst [vmem:[#allocation7 + $0x7c] sm:$0xf] %v575_v33  ;;  %v1258_v37 = vld [vmem:[#allocation7 + $0x50] ss:$8 sps:$4 sm:$0xff]  }
  0x1c   :  { %262 = vst [vmem:[#allocation7 + $0x34] sm:$0xf] %v260_v25  ;;  %v1252_v35 = vld [vmem:[#allocation7 + $0x44] ss:$8 sps:$4 sm:$0xff]   ;;  %v1263_v38 = vld [vmem:[#allocation7 + $0x20] ss:$8 sps:$4 sm:$0xff]  }
  0x1d   :  { %1163 = vmatpush3.bf16.msra.mxu0 %v1244_v46  ;;  %1228 = vmatpush3.bf16.msra.mxu1 %v1244_v46  ;;  %v1253_v36 = vld [vmem:[#allocation7 + $0x14] ss:$8 sps:$4 sm:$0xff]   ;;  %v1264_v41 = vld [vmem:[#allocation7 + $0x60] ss:$8 sps:$4 sm:$0xff]   ;;  %v1269_v44 = vld [vmem:[#allocation7 + $0x30] ss:$8 sps:$4 sm:$0xff]  }
  0x1e   :  { %1164 = vmatprep.subr.bf16.mxu0 %v1245_v5  ;;  %1221 = vmatprep.subr.bf16.mxu1 %v1245_v5  ;;  %v1270_v45 = vld [vmem:[#allocation7 + $0x70] ss:$8 sps:$4 sm:$0xff]   ;;  %v1496_v48 = vld [vmem:[%s1539_s1] ss:$0 sm:$0xff] }
  0x1f   :  { %874 = vmatprep.mubr.bf16.mxu1 %v1252_v35  ;;  %v1255_v1 = vld [vmem:[#allocation7 + $0x54] ss:$8 sps:$4 sm:$0xff]  }
  0x20   :  { %v1259_v39 = vld [vmem:[#allocation7 + $0x24] ss:$8 sps:$4 sm:$0xff]  }
  0x21   :  { %1165 = vmatpush3.bf16.msra.mxu0 %v1246_v19  ;;  %1229 = vmatpush3.bf16.msra.mxu1 %v1246_v19  ;;  %v1261_v40 = vld [vmem:[#allocation7 + $0x64] ss:$8 sps:$4 sm:$0xff]  }
  0x22   :  { %v1267_v43 = vld [vmem:[#allocation7 + $0x74] ss:$8 sps:$4 sm:$0xff]  }
  0x23   :  { %v1265_v42 = vld [vmem:[#allocation7 + $0x34] ss:$8 sps:$4 sm:$0xff]  }
  0x24   :  { %843 = vmatmul.mubr.bf16.vlgmr.msra.gmra.mrb[0].mxu0 %v1247_v30  ;;  %875 = vmatmul.mubr.bf16.vlgmr.msra.gmra.mrb[0].mxu1 %v1250_v34 }
  0x25   :  { %850 = vmatprep.mubr.bf16.mxu0 %v1253_v36  ;;  %882 = vmatprep.mubr.bf16.mxu1 %v1255_v1 }
  0x2c   :  { %851 = vmatmul.mubr.bf16.gmra.mrb[4].mxu0 %v1257_v12  ;;  %883 = vmatmul.mubr.bf16.gmra.mrb[4].mxu1 %v1258_v37 }
  0x2d   :  { %858 = vmatprep.mubr.bf16.mxu0 %v1259_v39  ;;  %890 = vmatprep.mubr.bf16.mxu1 %v1261_v40 }
  0x34   :  { %859 = vmatmul.mubr.bf16.gmra.mrb[8].mxu0 %v1263_v38  ;;  %891 = vmatmul.mubr.bf16.gmra.mrb[8].mxu1 %v1264_v41 }
  0x35   :  { %866 = vmatprep.mubr.bf16.mxu0 %v1265_v42  ;;  %898 = vmatprep.mubr.bf16.mxu1 %v1267_v43 }
  0x3c   :  { %867 = vmatmul.mubr.bf16.gmra.mrb[12].mxu0 %v1269_v44  ;;  %899 = vmatmul.mubr.bf16.gmra.mrb[12].mxu1 %v1270_v45 }
  0xf7   :  { %v1166_v46 = vpop.f32.mrb[0].mxu0  ;;  %v1190_v47 = vpop.f32.mrb[0].mxu1 }
  0xf8   :  { %v1167_v49 = vpop.f32.mrb[1].mxu0  ;;  %v1191_v50 = vpop.f32.mrb[1].mxu1 }
  0xf9   :  { %v1168_v51 = vadd.f32 %v1167_v49, %v1166_v46  ;;  %v1192_v52 = vadd.f32 %v1191_v50, %v1190_v47  ;;  %v1169_v53 = vpop.f32.mrb[2].mxu0  ;;  %v1193_v54 = vpop.f32.mrb[2].mxu1 }
  0xfa   :  { %v1170_v55 = vpop.f32.mrb[3].mxu0  ;;  %v1194_v56 = vpop.f32.mrb[3].mxu1 }
  0xfb   :  { %v845_v57 = vadd.f32 %v1168_v51, %v1496_v48  ;;  %v877_v58 = vadd.f32 %v1192_v52, %v1496_v48  ;;  %v1171_v59 = vadd.f32 %v1170_v55, %v1169_v53  ;;  %v1195_v60 = vadd.f32 %v1194_v56, %v1193_v54 }
  0xfd   :  { %v848_v61 = vadd.f32 %v1171_v59, %v1496_v48  ;;  %v880_v62 = vadd.f32 %v1195_v60, %v1496_v48  ;;  %v907_v63 = vmax.f32 %v845_v57, 0.0  ;;  %v915_v0 = vmax.f32 %v877_v58, 0.0 }
  0xff   :  { %v908_v2 = vmax.f32 %v848_v61, 0.0  ;;  %v916_v3 = vmax.f32 %v880_v62, 0.0  ;;  %v1172_v4 = vpop.f32.mrb[4].mxu0  ;;  %v1196_v5 = vpop.f32.mrb[4].mxu1 }
 0x100   :  { %v1173_v6 = vpop.f32.mrb[5].mxu0  ;;  %v1197_v7 = vpop.f32.mrb[5].mxu1 }
 0x101   :  { %v1106_v8 = vpack.c.bf16 %v908_v2, %v907_v63  ;;  %v1126_v9 = vpack.c.bf16 %v916_v3, %v915_v0  ;;  %v1174_v10 = vadd.f32 %v1173_v6, %v1172_v4  ;;  %v1198_v11 = vadd.f32 %v1197_v7, %v1196_v5  ;;  %v1175_v13 = vpop.f32.mrb[6].mxu0  ;;  %v1199_v14 = vpop.f32.mrb[6].mxu1 }
 0x102   :  { %v1176_v15 = vpop.f32.mrb[7].mxu0  ;;  %v1200_v16 = vpop.f32.mrb[7].mxu1 }
 0x103   :  { %1107 = vst [vmem:[%s1542_s4] sm:$0xff] %v1106_v8   ;;  %1146 = vst [vmem:[%s1542_s4 + $0x20] sm:$0xff] %v1126_v9   ;;  %v853_v17 = vadd.f32 %v1174_v10, %v1496_v48  ;;  %v885_v18 = vadd.f32 %v1198_v11, %v1496_v48  ;;  %v1177_v19 = vadd.f32 %v1176_v15, %v1175_v13 }
 0x104   :  { %v1201_v20 = vadd.f32 %v1200_v16, %v1199_v14 }
 0x105   :  { %v856_v21 = vadd.f32 %v1177_v19, %v1496_v48  ;;  %v909_v23 = vmax.f32 %v853_v17, 0.0  ;;  %v917_v24 = vmax.f32 %v885_v18, 0.0 }
 0x106   :  { %v888_v22 = vadd.f32 %v1201_v20, %v1496_v48 }
 0x107   :  { %v910_v25 = vmax.f32 %v856_v21, 0.0  ;;  %v1178_v27 = vpop.f32.mrb[8].mxu0  ;;  %v1202_v28 = vpop.f32.mrb[8].mxu1 }
 0x108   :  { %v918_v26 = vmax.f32 %v888_v22, 0.0  ;;  %v1179_v29 = vpop.f32.mrb[9].mxu0  ;;  %v1203_v30 = vpop.f32.mrb[9].mxu1 }
 0x109   :  { %v1111_v31 = vpack.c.bf16 %v910_v25, %v909_v23  ;;  %v1180_v33 = vadd.f32 %v1179_v29, %v1178_v27  ;;  %v1204_v34 = vadd.f32 %v1203_v30, %v1202_v28  ;;  %v1181_v35 = vpop.f32.mrb[10].mxu0  ;;  %v1205_v36 = vpop.f32.mrb[10].mxu1 }
 0x10a   :  { %v1131_v32 = vpack.c.bf16 %v918_v26, %v917_v24  ;;  %v1182_v1 = vpop.f32.mrb[11].mxu0  ;;  %v1206_v12 = vpop.f32.mrb[11].mxu1 }
 0x10b   :  { %1143 = vst [vmem:[%s1542_s4 + $0x8] sm:$0xff] %v1111_v31   ;;  %v861_v37 = vadd.f32 %v1180_v33, %v1496_v48  ;;  %v893_v39 = vadd.f32 %v1204_v34, %v1496_v48  ;;  %v1183_v40 = vadd.f32 %v1182_v1, %v1181_v35  ;;  %v1207_v38 = vadd.f32 %v1206_v12, %v1205_v36 }
 0x10c   :  { %1147 = vst [vmem:[%s1542_s4 + $0x28] sm:$0xff] %v1131_v32  }
 0x10d   :  { %v864_v41 = vadd.f32 %v1183_v40, %v1496_v48  ;;  %v896_v42 = vadd.f32 %v1207_v38, %v1496_v48  ;;  %v911_v43 = vmax.f32 %v861_v37, 0.0  ;;  %v919_v44 = vmax.f32 %v893_v39, 0.0 }
 0x10f   :  { %v912_v45 = vmax.f32 %v864_v41, 0.0  ;;  %v920_v46 = vmax.f32 %v896_v42, 0.0  ;;  %v1184_v47 = vpop.f32.mrb[12].mxu0  ;;  %v1208_v49 = vpop.f32.mrb[12].mxu1 }
 0x110   :  { %v1185_v50 = vpop.f32.mrb[13].mxu0  ;;  %v1209_v51 = vpop.f32.mrb[13].mxu1 }
 0x111   :  { %v1116_v52 = vpack.c.bf16 %v912_v45, %v911_v43  ;;  %v1136_v53 = vpack.c.bf16 %v920_v46, %v919_v44  ;;  %v1186_v54 = vadd.f32 %v1185_v50, %v1184_v47  ;;  %v1210_v55 = vadd.f32 %v1209_v51, %v1208_v49  ;;  %v1187_v56 = vpop.f32.mrb[14].mxu0  ;;  %v1211_v57 = vpop.f32.mrb[14].mxu1 }
 0x112   :  { %v1188_v58 = vpop.f32.mrb[15].mxu0  ;;  %v1212_v59 = vpop.f32.mrb[15].mxu1 }
 0x113   :  { %1144 = vst [vmem:[%s1542_s4 + $0x10] sm:$0xff] %v1116_v52   ;;  %1148 = vst [vmem:[%s1542_s4 + $0x30] sm:$0xff] %v1136_v53   ;;  %v869_v60 = vadd.f32 %v1186_v54, %v1496_v48  ;;  %v901_v61 = vadd.f32 %v1210_v55, %v1496_v48  ;;  %v1189_v62 = vadd.f32 %v1188_v58, %v1187_v56 }
 0x114   :  { %v1213_v63 = vadd.f32 %v1212_v59, %v1211_v57 }
 0x115   :  { %v872_v0 = vadd.f32 %v1189_v62, %v1496_v48  ;;  %v913_v3 = vmax.f32 %v869_v60, 0.0  ;;  %v921_v4 = vmax.f32 %v901_v61, 0.0 }
 0x116   :  { %v904_v2 = vadd.f32 %v1213_v63, %v1496_v48 }
 0x117   :  { %v914_v5 = vmax.f32 %v872_v0, 0.0 }
 0x118   :  { %v922_v6 = vmax.f32 %v904_v2, 0.0 }
 0x119   :  { %v1121_v7 = vpack.c.bf16 %v914_v5, %v913_v3 }
 0x11a   :  { %v1141_v8 = vpack.c.bf16 %v922_v6, %v921_v4 }
 0x11b   :  { %1145 = vst [vmem:[%s1542_s4 + $0x18] sm:$0xff] %v1121_v7  }
 0x11c   :  { %1149 = vst [vmem:[%s1542_s4 + $0x38] sm:$0xff] %v1141_v8  }

// kernel: ae_forward.22
= control target key start
LH: loop header
LB: loop body
LE: loop exit
PB: predicated region body
PF: predicated region fallthrough
CT: control target
= control target key end

     0   :  { %s883_s0 = inlined_call_operand.vmem [shape: bf16[384,128], index: 0, kind: input, shape index: {}]   ;;  %s884_s1 = inlined_call_operand.vmem [shape: f32[1,128], index: 1, kind: input, shape index: {}]   ;;  %s885_s2 = inlined_call_operand.vmem [shape: bf16[32,288], index: 2, kind: input, shape index: {}]   ;;  %s886_s3 = inlined_call_operand.<no memory space> [shape: bf16[], index: 3, kind: input, shape index: {}]   ;;  %s887_s4 = inlined_call_operand.vmem [shape: bf16[32,128], index: 4, kind: output, shape index: {}]  }
   0x1   :  { %v9_v0 = vstv %s886_s3 }
   0x2   :  { %v771_v1 = vunpack.i.l.bf16 %v9_v0 }
   0x3   :  { %v712_v2 = vld [vmem:[%s883_s0 + $0x40] sm:$0xff]   ;;  %v714_v4 = vld [vmem:[%s883_s0 + $0x48] sm:$0xff]   ;;  %v717_v7 = vld [vmem:[%s883_s0 + $0x50] sm:$0xff]   ;;  %v57_v14 = vlaneseq  ;;  %v742_v47 = vmov 0.0  }
   0x4   :  { %v713_v3 = vld [vmem:[%s883_s0] sm:$0xff]   ;;  %653 = vmatprep.subr.bf16.mxu0 %v712_v2  ;;  %v716_v6 = vld [vmem:[%s883_s0 + $0x8] sm:$0xff]   ;;  %v719_v9 = vld [vmem:[%s883_s0 + $0x10] sm:$0xff]  }
   0x5   :  { %654 = vmatpush3.bf16.msra.mxu0 %v713_v3  ;;  %v715_v5 = vld [vmem:[%s883_s0 + $0x80] sm:$0xff]   ;;  %v718_v8 = vld [vmem:[%s883_s0 + $0x88] sm:$0xff]   ;;  %v720_v10 = vld [vmem:[%s883_s0 + $0x58] sm:$0xff]   ;;  %v58_v18 = vand.u32 127, %v57_v14 }
   0x6   :  { %655 = vmatprep.subr.bf16.mxu0 %v714_v4  ;;  %691 = vmatprep.subr.bf16.mxu1 %v715_v5  ;;  %v721_v11 = vld [vmem:[%s883_s0 + $0x90] sm:$0xff]   ;;  %v722_v12 = vld [vmem:[%s883_s0 + $0x18] sm:$0xff]   ;;  %v723_v13 = vld [vmem:[%s883_s0 + $0x60] sm:$0xff]  }
   0x7   :  { %692 = vmatpush3.bf16.msra.mxu1 %v715_v5  ;;  %v724_v15 = vld [vmem:[%s883_s0 + $0x98] sm:$0xff]   ;;  %v725_v16 = vld [vmem:[%s883_s0 + $0x20] sm:$0xff]   ;;  %v726_v19 = vld [vmem:[%s883_s0 + $0x68] sm:$0xff]   ;;  %v59_v22 = vadd.s32 256, %v58_v18 }
   0x8   :  { %693 = vmatprep.subr.bf16.mxu1 %v718_v8  ;;  %v727_v17 = vld [vmem:[%s883_s0 + $0xa0] sm:$0xff]   ;;  %v728_v20 = vld [vmem:[%s883_s0 + $0x28] sm:$0xff]   ;;  %v729_v23 = vld [vmem:[%s883_s0 + $0x70] sm:$0xff]  }
   0x9   :  { %656 = vmatpush3.bf16.msra.mxu0 %v716_v6  ;;  %v730_v21 = vld [vmem:[%s883_s0 + $0xa8] sm:$0xff]   ;;  %v731_v24 = vld [vmem:[%s883_s0 + $0x30] sm:$0xff]   ;;  %v20_v26 = vld [vmem:[%s885_s2] sm:$0xff]   ;;  %vm60_vm0 = vcmp.lt.s32.totalorder %v59_v22, 288 }
   0xa   :  { %657 = vmatprep.subr.bf16.mxu0 %v717_v7  ;;  %v733_v25 = vld [vmem:[%s883_s0 + $0xb0] sm:$0xff]   ;;  %v577_v27 = vld [vmem:[%s885_s2 + $0x8] sm:$0xff]   ;;  %v732_v29 = vld [vmem:[%s883_s0 + $0x78] sm:$0xff]   ;;  %30 = vst [vmem:[#allocation7] sm:$0xff] %v20_v26  }
   0xb   :  { %694 = vmatpush3.bf16.msra.mxu1 %v718_v8  ;;  %v579_v28 = vld [vmem:[%s885_s2 + $0x10] sm:$0xf]  ;;  %v55_v30 = vunpack.c.l.bf16 %v577_v27  ;;  %v628_v31 = vunpack.c.h.bf16 %v577_v27  ;;  %v580_v32 = vld [vmem:[%s885_s2 + $0x14] ss:$24 sps:$4 sm:$0xff]   ;;  %v583_v33 = vld [vmem:[%s885_s2 + $0x20] sm:$0xff]  }
   0xc   :  { %695 = vmatprep.subr.bf16.mxu1 %v721_v11  ;;  %91 = vst [vmem:[#allocation7 + $0x10] sm:$0xf] %v579_v28  ;;  %v103_v35 = vunpack.c.l.bf16 %v580_v32  ;;  %v199_v36 = vunpack.c.h.bf16 %v580_v32  ;;  %v151_v37 = vunpack.c.l.bf16 %v583_v33  ;;  %v741_v38 = vld [vmem:[%s885_s2 + $0x18] sm:$0xff]   ;;  %v585_v39 = vld [vmem:[%s885_s2 + $0x28] sm:$0xf]  ;;  %v638_v43 = vunpack.c.h.bf16 %v583_v33 }
   0xd   :  { %658 = vmatpush3.bf16.msra.mxu0 %v719_v9  ;;  %v61_v34 = vsel %vm60_vm0, %v55_v30, %v771_v1  ;;  %v734_v40 = vld [vmem:[%s883_s0 + $0x38] sm:$0xff]   ;;  %187 = vst [vmem:[#allocation7 + $0x28] sm:$0xf] %v585_v39  ;;  %v587_v60 = vld [vmem:[%s884_s1] ss:$0 sm:$0xff] }
   0xe   :  { %659 = vmatprep.subr.bf16.mxu0 %v720_v10  ;;  %v629_v41 = vpack.c.bf16 %v628_v31, %v61_v34  ;;  %v738_v42 = vld [vmem:[%s883_s0 + $0xb8] sm:$0xff]   ;;  %v109_v44 = vsel %vm60_vm0, %v103_v35, %v771_v1  ;;  %v205_v45 = vsel %vm60_vm0, %v199_v36, %v771_v1  ;;  %v157_v46 = vsel %vm60_vm0, %v151_v37, %v771_v1 }
   0xf   :  { %696 = vmatpush3.bf16.msra.mxu1 %v721_v11  ;;  %v111_v48 = vpack.c.bf16 %v742_v47, %v109_v44  ;;  %v207_v49 = vpack.c.bf16 %v742_v47, %v205_v45  ;;  %v639_v50 = vpack.c.bf16 %v638_v43, %v157_v46 }
  0x10   :  { %697 = vmatprep.subr.bf16.mxu1 %v724_v15  ;;  %630 = vst [vmem:[#allocation7 + $0x8] sm:$0xff] %v629_v41  }
  0x11   :  { %660 = vmatpush3.bf16.msra.mxu0 %v722_v12  ;;  %113 = vst [vmem:[#allocation7 + $0x14] sm:$0xf] %v111_v48  ;;  %209 = vst [vmem:[#allocation7 + $0x2c] sm:$0xf] %v207_v49 }
  0x12   :  { %661 = vmatprep.subr.bf16.mxu0 %v723_v13  ;;  %640 = vst [vmem:[#allocation7 + $0x20] sm:$0xff] %v639_v50  }
  0x13   :  { %698 = vmatpush3.bf16.msra.mxu1 %v724_v15  ;;  %v737_v52 = vld [vmem:[#allocation7 + $0x4] ss:$12 sps:$4 sm:$0xff]  }
  0x14   :  { %699 = vmatprep.subr.bf16.mxu1 %v727_v17  ;;  %482 = vmatprep.mubr.bf16.mxu0 %v737_v52 }
  0x15   :  { %662 = vmatpush3.bf16.msra.mxu0 %v725_v16 }
  0x16   :  { %663 = vmatprep.subr.bf16.mxu0 %v726_v19 }
  0x17   :  { %700 = vmatpush3.bf16.msra.mxu1 %v727_v17  ;;  %v735_v51 = vld [vmem:[#allocation7] ss:$12 sps:$4 sm:$0xff]  }
  0x18   :  { %701 = vmatprep.subr.bf16.mxu1 %v730_v21  ;;  %v739_v53 = vld [vmem:[#allocation7 + $0x8] ss:$12 sps:$4 sm:$0xff]  }
  0x19   :  { %664 = vmatpush3.bf16.msra.mxu0 %v728_v20  ;;  %v740_v54 = vld [vmem:[#allocation7 + $0x20] ss:$12 sps:$4 sm:$0xff]   ;;  %v217_v55 = vld [vmem:[#allocation7 + $0x24] sm:$0xff]  ;;  %707 = vmatprep.mubr.bf16.mxu1 %v739_v53 }
  0x1a   :  { %665 = vmatprep.subr.bf16.mxu0 %v729_v23  ;;  %v592_v56 = vcombine.high %v741_v38, %v217_v55  ;;  %v591_v57 = vcombine.low %v741_v38, %v217_v55 }
  0x1b   :  { %702 = vmatpush3.bf16.msra.mxu1 %v730_v21 }
  0x1c   :  { %703 = vmatprep.subr.bf16.mxu1 %v733_v25 }
  0x1d   :  { %666 = vmatpush3.bf16.msra.mxu0 %v731_v24 }
  0x1e   :  { %667 = vmatprep.subr.bf16.mxu0 %v732_v29 }
  0x1f   :  { %704 = vmatpush3.bf16.msra.mxu1 %v733_v25 }
  0x20   :  { %705 = vmatprep.subr.bf16.mxu1 %v738_v42 }
  0x21   :  { %668 = vmatpush3.bf16.msra.mxu0 %v734_v40 }
  0x23   :  { %706 = vmatpush3.bf16.msra.mxu1 %v738_v42 }
  0x24   :  { %483 = vmatmul.mubr.bf16.vlgmr.msra.gmra.mrb[0].mxu0 %v735_v51 }
  0x25   :  { %490 = vmatprep.mubr.bf16.mxu0 %v592_v56 }
  0x26   :  { %708 = vmatmul.mubr.bf16.vlgmr.msra.gmra.mrb[0].mxu1 %v740_v54 }
  0x2c   :  { %491 = vmatmul.mubr.bf16.gmra.mrb[4].mxu0 %v591_v57 }
  0xf7   :  { %v669_v58 = vpop.f32.mrb[0].mxu0 }
  0xf8   :  { %v670_v59 = vpop.f32.mrb[1].mxu0 }
  0xf9   :  { %v671_v61 = vadd.f32 %v670_v59, %v669_v58  ;;  %v672_v62 = vpop.f32.mrb[2].mxu0  ;;  %v709_v63 = vpop.f32.mrb[0].mxu1 }
  0xfa   :  { %v673_v0 = vpop.f32.mrb[3].mxu0  ;;  %v533_v1 = vpop.f32.mrb[1].mxu1 }
  0xfb   :  { %v674_v2 = vadd.f32 %v673_v0, %v672_v62  ;;  %v485_v3 = vadd.f32 %v671_v61, %v587_v60  ;;  %v710_v4 = vpop.f32.mrb[2].mxu1 }
  0xfc   :  { %v536_v5 = vpop.f32.mrb[3].mxu1 }
  0xfd   :  { %v534_v6 = vadd.f32 %v533_v1, %v485_v3  ;;  %v488_v7 = vadd.f32 %v674_v2, %v587_v60 }
  0xff   :  { %v537_v8 = vadd.f32 %v536_v5, %v488_v7  ;;  %v675_v9 = vpop.f32.mrb[4].mxu0  ;;  %v548_v11 = vmax.f32 %v534_v6, 0.0 }
 0x100   :  { %v676_v10 = vpop.f32.mrb[5].mxu0 }
 0x101   :  { %v549_v12 = vmax.f32 %v537_v8, 0.0  ;;  %v677_v13 = vadd.f32 %v676_v10, %v675_v9  ;;  %v678_v14 = vpop.f32.mrb[6].mxu0 }
 0x102   :  { %v679_v15 = vpop.f32.mrb[7].mxu0 }
 0x103   :  { %v644_v16 = vpack.c.bf16 %v549_v12, %v548_v11  ;;  %v493_v17 = vadd.f32 %v677_v13, %v587_v60  ;;  %v680_v18 = vadd.f32 %v679_v15, %v678_v14 }
 0x105   :  { %645 = vst [vmem:[%s887_s4] sm:$0xff] %v644_v16   ;;  %v542_v19 = vadd.f32 %v709_v63, %v493_v17  ;;  %v496_v20 = vadd.f32 %v680_v18, %v587_v60 }
 0x107   :  { %v545_v21 = vadd.f32 %v710_v4, %v496_v20  ;;  %v550_v22 = vmax.f32 %v542_v19, 0.0 }
 0x109   :  { %v551_v23 = vmax.f32 %v545_v21, 0.0 }
 0x10b   :  { %v649_v24 = vpack.c.bf16 %v551_v23, %v550_v22 }
 0x10d   :  { %652 = vst [vmem:[%s887_s4 + $0x8] sm:$0xff] %v649_v24  }

// kernel: ae_forward.23
= control target key start
LH: loop header
LB: loop body
LE: loop exit
PB: predicated region body
PF: predicated region fallthrough
CT: control target
= control target key end

     0   :  { %s1016_s0 = inlined_call_operand.vmem [shape: bf16[640,128], index: 0, kind: input, shape index: {}]   ;;  %s1017_s1 = inlined_call_operand.vmem [shape: f32[1,128], index: 1, kind: input, shape index: {}]   ;;  %s1018_s2 = inlined_call_operand.vmem [shape: bf16[8,576], index: 2, kind: input, shape index: {}]   ;;  %s1019_s3 = inlined_call_operand.<no memory space> [shape: bf16[], index: 3, kind: input, shape index: {}]   ;;  %s1020_s4 = inlined_call_operand.vmem [shape: bf16[16,128], index: 4, kind: output, shape index: {}]  }
   0x1   :  { %v9_v0 = vstv %s1019_s3 }
   0x2   :  { %v875_v1 = vunpack.i.l.bf16 %v9_v0 }
   0x3   :  { %v800_v2 = vld [vmem:[%s1016_s0 + $0x40] sm:$0xff]   ;;  %v804_v7 = vld [vmem:[%s1016_s0 + $0x48] sm:$0xff]   ;;  %v808_v11 = vld [vmem:[%s1016_s0 + $0x50] sm:$0xff]   ;;  %v119_v23 = vlaneseq  ;;  %v845_v41 = vmov 0.0   ;;  %vm846_vm1 = vmmov 0  }
   0x4   :  { %v712_v3 = vpack.c.bf16 %v875_v1, %v875_v1  ;;  %v801_v4 = vld [vmem:[%s1016_s0] sm:$0xff]   ;;  %725 = vmatprep.subr.bf16.mxu0 %v800_v2  ;;  %v805_v8 = vld [vmem:[%s1016_s0 + $0x8] sm:$0xff]   ;;  %v809_v12 = vld [vmem:[%s1016_s0 + $0x10] sm:$0xff]  }
   0x5   :  { %v802_v5 = vld [vmem:[%s1016_s0 + $0xc0] sm:$0xff]   ;;  %726 = vmatpush3.bf16.msra.mxu0 %v801_v4  ;;  %v806_v9 = vld [vmem:[%s1016_s0 + $0xc8] sm:$0xff]   ;;  %v810_v13 = vld [vmem:[%s1016_s0 + $0xd0] sm:$0xff]   ;;  %v120_v28 = vand.u32 127, %v119_v23 }
   0x6   :  { %713 = vst [vmem:[#allocation7 + $0x18] sm:$0xff] %v712_v3   ;;  %718 = vst [vmem:[#allocation7 + $0x20] sm:$0xff] %v712_v3   ;;  %v803_v6 = vld [vmem:[%s1016_s0 + $0x80] sm:$0xff]   ;;  %747 = vmatprep.subr.bf16.mxu1 %v802_v5  ;;  %727 = vmatprep.subr.bf16.mxu0 %v804_v7  ;;  %v807_v10 = vld [vmem:[%s1016_s0 + $0x88] sm:$0xff]  }
   0x7   :  { %748 = vmatpush3.bf16.msra.mxu1 %v803_v6  ;;  %v811_v14 = vld [vmem:[%s1016_s0 + $0x90] sm:$0xff]   ;;  %v812_v15 = vld [vmem:[%s1016_s0 + $0x58] sm:$0xff]   ;;  %v816_v19 = vld [vmem:[%s1016_s0 + $0x60] sm:$0xff]   ;;  %v121_v33 = vadd.s32 512, %v120_v28 }
   0x8   :  { %749 = vmatprep.subr.bf16.mxu1 %v806_v9  ;;  %v813_v16 = vld [vmem:[%s1016_s0 + $0x18] sm:$0xff]   ;;  %v817_v20 = vld [vmem:[%s1016_s0 + $0x20] sm:$0xff]   ;;  %v820_v24 = vld [vmem:[%s1016_s0 + $0x68] sm:$0xff]  }
   0x9   :  { %728 = vmatpush3.bf16.msra.mxu0 %v805_v8  ;;  %v814_v17 = vld [vmem:[%s1016_s0 + $0xd8] sm:$0xff]   ;;  %v818_v21 = vld [vmem:[%s1016_s0 + $0xe0] sm:$0xff]   ;;  %v821_v25 = vld [vmem:[%s1016_s0 + $0x28] sm:$0xff]   ;;  %vm122_vm0 = vcmp.lt.s32.totalorder %v121_v33, 576 }
   0xa   :  { %729 = vmatprep.subr.bf16.mxu0 %v808_v11  ;;  %v815_v18 = vld [vmem:[%s1016_s0 + $0x98] sm:$0xff]   ;;  %v819_v22 = vld [vmem:[%s1016_s0 + $0xa0] sm:$0xff]   ;;  %v822_v26 = vld [vmem:[%s1016_s0 + $0xe8] sm:$0xff]  }
   0xb   :  { %750 = vmatpush3.bf16.msra.mxu1 %v807_v10  ;;  %v823_v27 = vld [vmem:[%s1016_s0 + $0xa8] sm:$0xff]   ;;  %v824_v29 = vld [vmem:[%s1016_s0 + $0x70] sm:$0xff]   ;;  %v828_v34 = vld [vmem:[%s1016_s0 + $0x78] sm:$0xff]  }
   0xc   :  { %751 = vmatprep.subr.bf16.mxu1 %v810_v13  ;;  %v825_v30 = vld [vmem:[%s1016_s0 + $0x30] sm:$0xff]   ;;  %v829_v35 = vld [vmem:[%s1016_s0 + $0x38] sm:$0xff]   ;;  %v29_v37 = vld [vmem:[%s1018_s2] sm:$0xff]  }
   0xd   :  { %730 = vmatpush3.bf16.msra.mxu0 %v809_v12  ;;  %v826_v31 = vld [vmem:[%s1016_s0 + $0xf0] sm:$0xff]   ;;  %v830_v36 = vld [vmem:[%s1016_s0 + $0xf8] sm:$0xff]   ;;  %39 = vst [vmem:[#allocation7] sm:$0xff] %v29_v37   ;;  %v835_v42 = vld [vmem:[%s1018_s2 + $0x8] sm:$0xff]  }
   0xe   :  { %731 = vmatprep.subr.bf16.mxu0 %v812_v15  ;;  %v827_v32 = vld [vmem:[%s1016_s0 + $0xb0] sm:$0xff]   ;;  %v834_v40 = vld [vmem:[%s1016_s0 + $0xb8] sm:$0xff]   ;;  %v836_v48 = vld [vmem:[%s1016_s0 + $0x100] sm:$0xff]  }
   0xf   :  { %752 = vmatpush3.bf16.msra.mxu1 %v811_v14  ;;  %v648_v38 = vld [vmem:[%s1018_s2 + $0x10] sm:$0xf]  ;;  %v153_v43 = vld [vmem:[#allocation7 + $0x1c] sm:$0xff]  ;;  %v837_v51 = vld [vmem:[%s1016_s0 + $0x108] sm:$0xff]  }
  0x10   :  { %753 = vmatprep.subr.bf16.mxu1 %v814_v17  ;;  %v117_v39 = vunpack.c.l.bf16 %v648_v38  ;;  %v652_v46 = vcombine.low %v835_v42, %v153_v43  ;;  %v653_v47 = vcombine.high %v835_v42, %v153_v43  ;;  %v838_v52 = vld [vmem:[%s1016_s0 + $0x110] sm:$0xff]   ;;  %v839_v53 = vld [vmem:[%s1016_s0 + $0x118] sm:$0xff]   ;;  %v840_v54 = vld [vmem:[%s1016_s0 + $0x120] sm:$0xff]  }
  0x11   :  { %732 = vmatpush3.bf16.msra.mxu0 %v813_v16  ;;  %v841_v55 = vld [vmem:[%s1016_s0 + $0x128] sm:$0xff]   ;;  %v842_v56 = vld [vmem:[%s1016_s0 + $0x130] sm:$0xff]   ;;  %v843_v57 = vld [vmem:[%s1016_s0 + $0x138] sm:$0xff]  }
  0x12   :  { %733 = vmatprep.subr.bf16.mxu0 %v816_v19  ;;  %v123_v44 = vsel %vm122_vm0, %v117_v39, %v875_v1  ;;  %581 = vmatprep.mubr.bf16.mxu1 %v653_v47  ;;  %v649_v2 = vld [vmem:[%s1017_s1] ss:$0 sm:$0xff] }
  0x13   :  { %754 = vmatpush3.bf16.msra.mxu1 %v815_v18  ;;  %v707_v45 = vpack.c.bf16 %v875_v1, %v123_v44 }
  0x14   :  { %755 = vmatprep.subr.bf16.mxu1 %v818_v21  ;;  %v833_v50 = vld [vmem:[#allocation7 + $0x4] ss:$20 sps:$4 sm:$0xff]  }
  0x15   :  { %734 = vmatpush3.bf16.msra.mxu0 %v817_v20  ;;  %708 = vst [vmem:[#allocation7 + $0x10] sm:$0xff] %v707_v45   ;;  %540 = vmatprep.mubr.bf16.mxu0 %v833_v50 }
  0x16   :  { %735 = vmatprep.subr.bf16.mxu0 %v820_v24 }
  0x17   :  { %756 = vmatpush3.bf16.msra.mxu1 %v819_v22 }
  0x18   :  { %757 = vmatprep.subr.bf16.mxu1 %v822_v26 }
  0x19   :  { %736 = vmatpush3.bf16.msra.mxu0 %v821_v25 }
  0x1a   :  { %737 = vmatprep.subr.bf16.mxu0 %v824_v29 }
  0x1b   :  { %758 = vmatpush3.bf16.msra.mxu1 %v823_v27 }
  0x1c   :  { %759 = vmatprep.subr.bf16.mxu1 %v826_v31  ;;  %v831_v49 = vld [vmem:[#allocation7] ss:$20 sps:$4 sm:$0xff]   ;;  %v844_v58 = vld [vmem:[#allocation7 + $0x10] ss:$20 sps:$4 sm:$0xff]  }
  0x1d   :  { %738 = vmatpush3.bf16.msra.mxu0 %v825_v30 }
  0x1e   :  { %739 = vmatprep.subr.bf16.mxu0 %v828_v34 }
  0x1f   :  { %760 = vmatpush3.bf16.msra.mxu1 %v827_v32 }
  0x20   :  { %761 = vmatprep.subr.bf16.mxu1 %v830_v36 }
  0x21   :  { %740 = vmatpush3.bf16.msra.mxu0 %v829_v35 }
  0x22   :  { %778 = vmatprep.subr.bf16.mxu0 %v845_v41 }
  0x23   :  { %762 = vmatpush3.bf16.msra.mxu1 %v834_v40 }
  0x24   :  { %541 = vmatmul.mubr.bf16.vlgmr.msra.gmra.mrb[0].mxu0 %v831_v49 }
  0x25   :  { %779 = vmatpush3.bf16.msra.mxu0 %v836_v48  ;;  %794 = vmatprep.mubr.msk.bf16.mxu0 %vm846_vm1, %v845_v41 }
  0x26   :  { %582 = vmatmul.mubr.bf16.vlgmr.msra.gmra.mrb[0].mxu1 %v652_v46  ;;  %780 = vmatprep.subr.bf16.mxu0 %v845_v41 }
  0x29   :  { %781 = vmatpush3.bf16.msra.mxu0 %v837_v51 }
  0x2a   :  { %782 = vmatprep.subr.bf16.mxu0 %v845_v41 }
  0x2d   :  { %783 = vmatpush3.bf16.msra.mxu0 %v838_v52 }
  0x2e   :  { %784 = vmatprep.subr.bf16.mxu0 %v845_v41 }
  0x31   :  { %785 = vmatpush3.bf16.msra.mxu0 %v839_v53 }
  0x32   :  { %786 = vmatprep.subr.bf16.mxu0 %v845_v41 }
  0x35   :  { %787 = vmatpush3.bf16.msra.mxu0 %v840_v54 }
  0x36   :  { %788 = vmatprep.subr.bf16.mxu0 %v845_v41 }
  0x39   :  { %789 = vmatpush3.bf16.msra.mxu0 %v841_v55 }
  0x3a   :  { %790 = vmatprep.subr.bf16.mxu0 %v845_v41 }
  0x3d   :  { %791 = vmatpush3.bf16.msra.mxu0 %v842_v56 }
  0x3e   :  { %792 = vmatprep.subr.bf16.mxu0 %v845_v41 }
  0x41   :  { %793 = vmatpush3.bf16.msra.mxu0 %v843_v57 }
  0x44   :  { %795 = vmatmul.mubr.bf16.vlgmr.msra.gmra.mrb[4].mxu0 %v844_v58 }
  0xf7   :  { %v741_v1 = vpop.f32.mrb[0].mxu0 }
  0xf8   :  { %v742_v3 = vpop.f32.mrb[1].mxu0 }
  0xf9   :  { %v763_v59 = vpop.f32.mrb[0].mxu1  ;;  %v743_v4 = vadd.f32 %v742_v3, %v741_v1  ;;  %v744_v5 = vpop.f32.mrb[2].mxu0 }
  0xfa   :  { %v764_v60 = vpop.f32.mrb[1].mxu1  ;;  %v745_v6 = vpop.f32.mrb[3].mxu0 }
  0xfb   :  { %v765_v61 = vadd.f32 %v764_v60, %v763_v59  ;;  %v766_v62 = vpop.f32.mrb[2].mxu1  ;;  %v543_v7 = vadd.f32 %v743_v4, %v649_v2  ;;  %v746_v8 = vadd.f32 %v745_v6, %v744_v5 }
  0xfc   :  { %v767_v63 = vpop.f32.mrb[3].mxu1 }
  0xfd   :  { %v768_v0 = vadd.f32 %v767_v63, %v766_v62  ;;  %v546_v9 = vadd.f32 %v746_v8, %v649_v2  ;;  %v584_v10 = vadd.f32 %v765_v61, %v543_v7 }
  0xff   :  { %v587_v11 = vadd.f32 %v768_v0, %v546_v9 }
 0x117   :  { %v624_v12 = vpop.f32.mrb[4].mxu0 }
 0x118   :  { %v625_v13 = vadd.f32 %v624_v12, %v584_v10  ;;  %v796_v14 = vpop.f32.mrb[5].mxu0 }
 0x119   :  { %v627_v15 = vpop.f32.mrb[6].mxu0 }
 0x11a   :  { %v628_v16 = vadd.f32 %v627_v15, %v587_v11  ;;  %v797_v17 = vpop.f32.mrb[7].mxu0 }
 0x11c   :  { %v722_v18 = vpack.c.bf16 %v628_v16, %v625_v13 }
 0x11e   :  { %723 = vst [vmem:[%s1020_s4] sm:$0xff] %v722_v18  }

// kernel: ae_forward.26
= control target key start
LH: loop header
LB: loop body
LE: loop exit
PB: predicated region body
PF: predicated region fallthrough
CT: control target
= control target key end

     0   :  { %s1314_s0 = inlined_call_operand.vmem [shape: bf16[512,128], index: 0, kind: input, shape index: {}]   ;;  %s1315_s1 = inlined_call_operand.vmem [shape: f32[1,128], index: 1, kind: input, shape index: {}]   ;;  %s1316_s2 = inlined_call_operand.vmem [shape: bf16[128,512], index: 2, kind: input, shape index: {}]   ;;  %s1317_s3 = inlined_call_operand.vmem [shape: f32[1,512], index: 3, kind: input, shape index: {}]   ;;  %s1318_s4 = inlined_call_operand.vmem [shape: bf16[2,512], index: 4, kind: input, shape index: {}]   ;;  %s1319_s5 = inlined_call_operand.<no memory space> [shape: bf16[], index: 5, kind: input, shape index: {}]   ;;  %s1320_s6 = inlined_call_operand.vmem [shape: bf16[16,512], index: 6, kind: output, shape index: {}]  }
   0x1   :  { %v11_v0 = vstv %s1319_s5 }
   0x2   :  { %v1063_v1 = vunpack.i.l.bf16 %v11_v0 }
   0x3   :  { %v943_v2 = vld [vmem:[%s1314_s0 + $0x40] sm:$0xff]   ;;  %v947_v7 = vld [vmem:[%s1314_s0 + $0x48] sm:$0xff]   ;;  %v951_v11 = vld [vmem:[%s1314_s0 + $0x50] sm:$0xff]   ;;  %v32_v27 = vlaneseq  ;;  %v1023_v50 = vmov 0.0  }
   0x4   :  { %v1070_v3 = vpack.c.bf16 %v1063_v1, %v1063_v1  ;;  %v944_v4 = vld [vmem:[%s1314_s0 + $0xc0] sm:$0xff]   ;;  %897 = vmatprep.subr.bf16.mxu0 %v943_v2  ;;  %v948_v8 = vld [vmem:[%s1314_s0 + $0xc8] sm:$0xff]   ;;  %v952_v12 = vld [vmem:[%s1314_s0 + $0xd0] sm:$0xff]  }
   0x5   :  { %v945_v5 = vld [vmem:[%s1314_s0] sm:$0xff]   ;;  %919 = vmatprep.subr.bf16.mxu1 %v944_v4  ;;  %v949_v9 = vld [vmem:[%s1314_s0 + $0x8] sm:$0xff]   ;;  %v953_v13 = vld [vmem:[%s1314_s0 + $0x10] sm:$0xff]   ;;  %v1153_v32 = vshrl.u32 %v32_v27, 7 }
   0x6   :  { %v946_v6 = vld [vmem:[%s1314_s0 + $0x80] sm:$0xff]   ;;  %898 = vmatpush3.bf16.msra.mxu0 %v945_v5  ;;  %v950_v10 = vld [vmem:[%s1314_s0 + $0x88] sm:$0xff]   ;;  %v954_v14 = vld [vmem:[%s1314_s0 + $0x90] sm:$0xff]  }
   0x7   :  { %920 = vmatpush3.bf16.msra.mxu1 %v946_v6  ;;  %899 = vmatprep.subr.bf16.mxu0 %v947_v7  ;;  %v955_v15 = vld [vmem:[%s1314_s0 + $0x58] sm:$0xff]   ;;  %v959_v19 = vld [vmem:[%s1314_s0 + $0x60] sm:$0xff]   ;;  %v963_v23 = vld [vmem:[%s1314_s0 + $0x68] sm:$0xff]   ;;  %vm35_vm0 = vcmp.lt.s32.totalorder %v1153_v32, 2 }
   0x8   :  { %921 = vmatprep.subr.bf16.mxu1 %v948_v8  ;;  %v956_v16 = vld [vmem:[%s1314_s0 + $0xd8] sm:$0xff]   ;;  %v960_v20 = vld [vmem:[%s1314_s0 + $0xe0] sm:$0xff]   ;;  %v964_v24 = vld [vmem:[%s1314_s0 + $0xe8] sm:$0xff]  }
   0x9   :  { %v957_v17 = vld [vmem:[%s1314_s0 + $0x18] sm:$0xff]   ;;  %v961_v21 = vld [vmem:[%s1314_s0 + $0x20] sm:$0xff]   ;;  %v965_v25 = vld [vmem:[%s1314_s0 + $0x28] sm:$0xff]  }
   0xa   :  { %900 = vmatpush3.bf16.msra.mxu0 %v949_v9  ;;  %v958_v18 = vld [vmem:[%s1314_s0 + $0x98] sm:$0xff]   ;;  %v962_v22 = vld [vmem:[%s1314_s0 + $0xa0] sm:$0xff]   ;;  %v966_v26 = vld [vmem:[%s1314_s0 + $0xa8] sm:$0xff]  }
   0xb   :  { %922 = vmatpush3.bf16.msra.mxu1 %v950_v10  ;;  %901 = vmatprep.subr.bf16.mxu0 %v951_v11  ;;  %v967_v28 = vld [vmem:[%s1314_s0 + $0x70] sm:$0xff]   ;;  %v971_v33 = vld [vmem:[%s1314_s0 + $0x78] sm:$0xff]   ;;  %v29_v37 = vld [vmem:[%s1318_s4] sm:$0x1] }
   0xc   :  { %923 = vmatprep.subr.bf16.mxu1 %v952_v12  ;;  %v968_v29 = vld [vmem:[%s1314_s0 + $0xf0] sm:$0xff]   ;;  %v972_v34 = vld [vmem:[%s1314_s0 + $0xf8] sm:$0xff]   ;;  %v807_v38 = vld [vmem:[%s1318_s4 + $0x1] sm:$0x1]  ;;  %v30_v40 = vunpack.c.l.bf16 %v29_v37 }
   0xd   :  { %v969_v30 = vld [vmem:[%s1314_s0 + $0x30] sm:$0xff]   ;;  %v973_v35 = vld [vmem:[%s1314_s0 + $0x38] sm:$0xff]   ;;  %v808_v39 = vld [vmem:[%s1318_s4 + $0x2] sm:$0x1]  ;;  %v45_v41 = vunpack.c.l.bf16 %v807_v38 }
   0xe   :  { %902 = vmatpush3.bf16.msra.mxu0 %v953_v13  ;;  %v970_v31 = vld [vmem:[%s1314_s0 + $0xb0] sm:$0xff]   ;;  %v974_v36 = vld [vmem:[%s1314_s0 + $0xb8] sm:$0xff]   ;;  %v61_v42 = vunpack.c.l.bf16 %v808_v39  ;;  %v809_v43 = vld [vmem:[%s1318_s4 + $0x3] sm:$0x1]  ;;  %v36_v46 = vsel %vm35_vm0, %v30_v40, %v1063_v1 }
   0xf   :  { %924 = vmatpush3.bf16.msra.mxu1 %v954_v14  ;;  %903 = vmatprep.subr.bf16.mxu0 %v955_v15  ;;  %v77_v44 = vunpack.c.l.bf16 %v809_v43  ;;  %v977_v45 = vld [vmem:[%s1316_s2 + $0x4] ss:$16 sps:$4 sm:$0xff]   ;;  %v51_v47 = vsel %vm35_vm0, %v45_v41, %v1063_v1  ;;  %v980_v49 = vld [vmem:[%s1316_s2 + $0xc] ss:$16 sps:$4 sm:$0xff]   ;;  %v37_v51 = vpack.c.bf16 %v1023_v50, %v36_v46  ;;  %v975_v56 = vld [vmem:[%s1316_s2] ss:$16 sps:$4 sm:$0xff]  }
  0x10   :  { %925 = vmatprep.subr.bf16.mxu1 %v956_v16  ;;  %v67_v48 = vsel %vm35_vm0, %v61_v42, %v1063_v1  ;;  %v53_v52 = vpack.c.bf16 %v1023_v50, %v51_v47  ;;  %v978_v58 = vld [vmem:[%s1316_s2 + $0x8] ss:$16 sps:$4 sm:$0xff]   ;;  %v983_v62 = vld [vmem:[%s1316_s2 + $0x24] ss:$16 sps:$4 sm:$0xff]   ;;  %v981_v2 = vld [vmem:[%s1316_s2 + $0x20] ss:$16 sps:$4 sm:$0xff]  }
  0x11   :  { %v69_v53 = vpack.c.bf16 %v1023_v50, %v67_v48  ;;  %v83_v54 = vsel %vm35_vm0, %v77_v44, %v1063_v1  ;;  %39 = vst [vmem:[#allocation7] sm:$0xf] %v37_v51  ;;  %v986_v1 = vld [vmem:[%s1316_s2 + $0x2c] ss:$16 sps:$4 sm:$0xff]   ;;  %v984_v4 = vld [vmem:[%s1316_s2 + $0x28] ss:$16 sps:$4 sm:$0xff]  }
  0x12   :  { %904 = vmatpush3.bf16.msra.mxu0 %v957_v17  ;;  %v85_v55 = vpack.c.bf16 %v1023_v50, %v83_v54  ;;  %55 = vst [vmem:[#allocation7 + $0x4] sm:$0xf] %v53_v52  ;;  %v992_v5 = vld [vmem:[%s1316_s2 + $0x4c] ss:$16 sps:$4 sm:$0xff]   ;;  %v987_v6 = vld [vmem:[%s1316_s2 + $0x40] ss:$16 sps:$4 sm:$0xff]  }
  0x13   :  { %926 = vmatpush3.bf16.msra.mxu1 %v958_v18  ;;  %905 = vmatprep.subr.bf16.mxu0 %v959_v19  ;;  %71 = vst [vmem:[#allocation7 + $0x8] sm:$0xf] %v69_v53  ;;  %v990_v7 = vld [vmem:[%s1316_s2 + $0x48] ss:$16 sps:$4 sm:$0xff]   ;;  %v995_v8 = vld [vmem:[%s1316_s2 + $0x64] ss:$16 sps:$4 sm:$0xff]  }
  0x14   :  { %927 = vmatprep.subr.bf16.mxu1 %v960_v20  ;;  %87 = vst [vmem:[#allocation7 + $0xc] sm:$0xf] %v85_v55  ;;  %v998_v9 = vld [vmem:[%s1316_s2 + $0x6c] ss:$16 sps:$4 sm:$0xff]   ;;  %v993_v10 = vld [vmem:[%s1316_s2 + $0x60] ss:$16 sps:$4 sm:$0xff]  }
  0x15   :  { %v996_v11 = vld [vmem:[%s1316_s2 + $0x68] ss:$16 sps:$4 sm:$0xff]   ;;  %v1001_v12 = vld [vmem:[%s1316_s2 + $0x84] ss:$16 sps:$4 sm:$0xff]   ;;  %v1004_v13 = vld [vmem:[%s1316_s2 + $0x8c] ss:$16 sps:$4 sm:$0xff]  }
  0x16   :  { %906 = vmatpush3.bf16.msra.mxu0 %v961_v21  ;;  %v999_v14 = vld [vmem:[%s1316_s2 + $0x80] ss:$16 sps:$4 sm:$0xff]   ;;  %v1002_v15 = vld [vmem:[%s1316_s2 + $0x88] ss:$16 sps:$4 sm:$0xff]   ;;  %v1007_v16 = vld [vmem:[%s1316_s2 + $0xa4] ss:$16 sps:$4 sm:$0xff]  }
  0x17   :  { %928 = vmatpush3.bf16.msra.mxu1 %v962_v22  ;;  %907 = vmatprep.subr.bf16.mxu0 %v963_v23  ;;  %v1010_v17 = vld [vmem:[%s1316_s2 + $0xac] ss:$16 sps:$4 sm:$0xff]   ;;  %v1005_v18 = vld [vmem:[%s1316_s2 + $0xa0] ss:$16 sps:$4 sm:$0xff]   ;;  %v1008_v19 = vld [vmem:[%s1316_s2 + $0xa8] ss:$16 sps:$4 sm:$0xff]  }
  0x18   :  { %929 = vmatprep.subr.bf16.mxu1 %v964_v24  ;;  %v1013_v20 = vld [vmem:[%s1316_s2 + $0xc4] ss:$16 sps:$4 sm:$0xff]   ;;  %v1016_v21 = vld [vmem:[%s1316_s2 + $0xcc] ss:$16 sps:$4 sm:$0xff]   ;;  %v1011_v22 = vld [vmem:[%s1316_s2 + $0xc0] ss:$16 sps:$4 sm:$0xff]  }
  0x19   :  { %v105_v57 = vld [vmem:[#allocation7] sm:$0xff]  ;;  %v1014_v23 = vld [vmem:[%s1316_s2 + $0xc8] ss:$16 sps:$4 sm:$0xff]   ;;  %v511_v48 = vsub.s32 0, %v1153_v32  ;;  %v515_v51 = vsub.s32 1, %v1153_v32  ;;  %v523_v52 = vsub.s32 3, %v1153_v32 }
  0x1a   :  { %908 = vmatpush3.bf16.msra.mxu0 %v965_v25  ;;  %v811_v59 = vcombine.low %v105_v57, %v1070_v3  ;;  %v812_v60 = vcombine.high %v105_v57, %v1070_v3  ;;  %v1019_v24 = vld [vmem:[%s1316_s2 + $0xe4] ss:$16 sps:$4 sm:$0xff]   ;;  %v1022_v25 = vld [vmem:[%s1316_s2 + $0xec] ss:$16 sps:$4 sm:$0xff]   ;;  %v1020_v27 = vld [vmem:[%s1316_s2 + $0xe8] ss:$16 sps:$4 sm:$0xff]  }
  0x1b   :  { %930 = vmatpush3.bf16.msra.mxu1 %v966_v26  ;;  %909 = vmatprep.subr.bf16.mxu0 %v967_v28  ;;  %v106_v61 = vld [vmem:[#allocation7 + $0x8] sm:$0xff]  ;;  %v1017_v26 = vld [vmem:[%s1316_s2 + $0xe0] ss:$16 sps:$4 sm:$0xff]   ;;  %v1024_v28 = vmov 0  }
  0x1c   :  { %931 = vmatprep.subr.bf16.mxu1 %v968_v29  ;;  %v813_v63 = vcombine.low %v106_v61, %v1070_v3  ;;  %v814_v0 = vcombine.high %v106_v61, %v1070_v3  ;;  %424 = vmatprep.mubr.bf16.mxu0 %v812_v60  ;;  %v989_v3 = vld [vmem:[%s1316_s2 + $0x44] ss:$16 sps:$4 sm:$0xff]   ;;  %v507_v50 = vld [vmem:[%s1317_s3] sm:$0xf] }
  0x1d   :  { %v512_v53 = vrot.slane %v507_v50, %v511_v48  ;;  %v516_v55 = vrot.slane %v507_v50, %v515_v51 }
  0x1e   :  { %910 = vmatpush3.bf16.msra.mxu0 %v969_v30  ;;  %465 = vmatprep.mubr.bf16.mxu1 %v814_v0 }
  0x1f   :  { %932 = vmatpush3.bf16.msra.mxu1 %v970_v31  ;;  %911 = vmatprep.subr.bf16.mxu0 %v971_v33  ;;  %v810_v31 = vld [vmem:[%s1315_s1] ss:$0 sm:$0xff] }
  0x20   :  { %933 = vmatprep.subr.bf16.mxu1 %v972_v34 }
  0x22   :  { %912 = vmatpush3.bf16.msra.mxu0 %v973_v35 }
  0x23   :  { %934 = vmatpush3.bf16.msra.mxu1 %v974_v36  ;;  %689 = vmatprep.subr.bf16.mxu0 %v977_v45 }
  0x24   :  { %732 = vmatprep.subr.bf16.mxu1 %v980_v49  ;;  %v519_v49 = vsub.s32 2, %v1153_v32 }
  0x25   :  { %425 = vmatmul.mubr.bf16.vlgmr.msra.gmra.mrb[0].mxu0 %v811_v59 }
  0x26   :  { %466 = vmatmul.mubr.bf16.vlgmr.msra.gmra.mrb[0].mxu1 %v813_v63  ;;  %690 = vmatpush1.bf16.msra.mxu0 %v975_v56  ;;  %v520_v54 = vrot.slane %v507_v50, %v519_v49  ;;  %v524_v56 = vrot.slane %v507_v50, %v523_v52 }
  0x27   :  { %733 = vmatpush1.bf16.msra.mxu1 %v978_v58  ;;  %691 = vmatprep.subr.bf16.mxu0 %v983_v62 }
  0x28   :  { %734 = vmatprep.subr.bf16.mxu1 %v986_v1  ;;  %721 = vmatprep.mubr.bf16.mxu0 %v1024_v28 }
  0x29   :  { %764 = vmatprep.mubr.bf16.mxu1 %v1024_v28 }
  0x2a   :  { %692 = vmatpush1.bf16.msra.mxu0 %v981_v2 }
  0x2b   :  { %735 = vmatpush1.bf16.msra.mxu1 %v984_v4  ;;  %693 = vmatprep.subr.bf16.mxu0 %v989_v3 }
  0x2c   :  { %736 = vmatprep.subr.bf16.mxu1 %v992_v5 }
  0x2e   :  { %694 = vmatpush1.bf16.msra.mxu0 %v987_v6 }
  0x2f   :  { %737 = vmatpush1.bf16.msra.mxu1 %v990_v7  ;;  %695 = vmatprep.subr.bf16.mxu0 %v995_v8 }
  0x30   :  { %738 = vmatprep.subr.bf16.mxu1 %v998_v9 }
  0x32   :  { %696 = vmatpush1.bf16.msra.mxu0 %v993_v10 }
  0x33   :  { %739 = vmatpush1.bf16.msra.mxu1 %v996_v11  ;;  %697 = vmatprep.subr.bf16.mxu0 %v1001_v12 }
  0x34   :  { %740 = vmatprep.subr.bf16.mxu1 %v1004_v13 }
  0x36   :  { %698 = vmatpush1.bf16.msra.mxu0 %v999_v14 }
  0x37   :  { %741 = vmatpush1.bf16.msra.mxu1 %v1002_v15  ;;  %699 = vmatprep.subr.bf16.mxu0 %v1007_v16 }
  0x38   :  { %742 = vmatprep.subr.bf16.mxu1 %v1010_v17 }
  0x3a   :  { %700 = vmatpush1.bf16.msra.mxu0 %v1005_v18 }
  0x3b   :  { %743 = vmatpush1.bf16.msra.mxu1 %v1008_v19  ;;  %701 = vmatprep.subr.bf16.mxu0 %v1013_v20 }
  0x3c   :  { %744 = vmatprep.subr.bf16.mxu1 %v1016_v21 }
  0x3e   :  { %702 = vmatpush1.bf16.msra.mxu0 %v1011_v22 }
  0x3f   :  { %745 = vmatpush1.bf16.msra.mxu1 %v1014_v23  ;;  %703 = vmatprep.subr.bf16.mxu0 %v1019_v24 }
  0x40   :  { %746 = vmatprep.subr.bf16.mxu1 %v1022_v25 }
  0x42   :  { %704 = vmatpush1.bf16.msra.mxu0 %v1017_v26 }
  0x43   :  { %747 = vmatpush1.bf16.msra.mxu1 %v1020_v27 }
  0xf8   :  { %v913_v29 = vpop.f32.mrb[0].mxu0 }
  0xf9   :  { %v935_v30 = vpop.f32.mrb[0].mxu1  ;;  %v914_v33 = vpop.f32.mrb[1].mxu0 }
  0xfa   :  { %v915_v34 = vadd.f32 %v914_v33, %v913_v29  ;;  %v936_v35 = vpop.f32.mrb[1].mxu1  ;;  %v916_v36 = vpop.f32.mrb[2].mxu0 }
  0xfb   :  { %v937_v37 = vadd.f32 %v936_v35, %v935_v30  ;;  %v938_v38 = vpop.f32.mrb[2].mxu1  ;;  %v917_v39 = vpop.f32.mrb[3].mxu0 }
  0xfc   :  { %v427_v40 = vadd.f32 %v915_v34, %v810_v31  ;;  %v918_v41 = vadd.f32 %v917_v39, %v916_v36  ;;  %v939_v42 = vpop.f32.mrb[3].mxu1 }
  0xfd   :  { %v940_v43 = vadd.f32 %v939_v42, %v938_v38 }
  0xfe   :  { %v468_v44 = vadd.f32 %v937_v37, %v427_v40  ;;  %v430_v45 = vadd.f32 %v918_v41, %v810_v31 }
 0x100   :  { %v471_v46 = vadd.f32 %v940_v43, %v430_v45 }
 0x102   :  { %v474_v47 = vpack.c.bf16 %v471_v46, %v468_v44 }
 0x104   :  { %722 = vmatmul.mubr.bf16.vlgmr.msra.gmra.mrb[4].mxu0 %v474_v47  ;;  %765 = vmatmul.mubr.bf16.vlgmr.msra.gmra.mrb[4].mxu1 %v474_v47 }
 0x1d7   :  { %v723_v57 = vpop.f32.mrb[4].mxu0  ;;  %v766_v58 = vpop.f32.mrb[4].mxu1 }
 0x1d8   :  { %v724_v59 = vadd.f32 %v723_v57, %v512_v53  ;;  %v767_v60 = vadd.f32 %v766_v58, %v520_v54  ;;  %v725_v61 = vpop.f32.mrb[5].mxu0  ;;  %v768_v62 = vpop.f32.mrb[5].mxu1 }
 0x1d9   :  { %v726_v63 = vadd.f32 %v725_v61, %v516_v55  ;;  %v769_v0 = vadd.f32 %v768_v62, %v524_v56  ;;  %v727_v1 = vpop.f32.mrb[6].mxu0  ;;  %v770_v2 = vpop.f32.mrb[6].mxu1 }
 0x1da   :  { %v728_v4 = vadd.f32 %v727_v1, %v512_v53  ;;  %v771_v3 = vadd.f32 %v770_v2, %v520_v54  ;;  %v729_v5 = vpop.f32.mrb[7].mxu0  ;;  %v772_v6 = vpop.f32.mrb[7].mxu1 }
 0x1db   :  { %v883_v7 = vpack.c.bf16 %v726_v63, %v724_v59  ;;  %v884_v32 = vpack.c.bf16 %v769_v0, %v767_v60  ;;  %v730_v8 = vadd.f32 %v729_v5, %v516_v55  ;;  %v773_v9 = vadd.f32 %v772_v6, %v524_v56 }
 0x1dd   :  { %799 = vst [vmem:[%s1320_s6] sm:$0xff] %v883_v7  ;;  %800 = vst [vmem:[%s1320_s6 + $0x8] sm:$0xff] %v884_v32  ;;  %v885_v10 = vpack.c.bf16 %v730_v8, %v728_v4  ;;  %v886_v11 = vpack.c.bf16 %v773_v9, %v771_v3 }
 0x1df   :  { %801 = vst [vmem:[%s1320_s6 + $0x10] sm:$0xff] %v885_v10  ;;  %802 = vst [vmem:[%s1320_s6 + $0x18] sm:$0xff] %v886_v11 }

// kernel: ae_forward.25
= control target key start
LH: loop header
LB: loop body
LE: loop exit
PB: predicated region body
PF: predicated region fallthrough
CT: control target
= control target key end

     0   :  { %s1067_s0 = inlined_call_operand.vmem [shape: bf16[512,256], index: 0, kind: input, shape index: {}]   ;;  %s1068_s1 = inlined_call_operand.vmem [shape: f32[1,256], index: 1, kind: input, shape index: {}]   ;;  %s1069_s2 = inlined_call_operand.vmem [shape: bf16[8,512], index: 2, kind: input, shape index: {}]   ;;  %s1070_s3 = inlined_call_operand.<no memory space> [shape: bf16[], index: 3, kind: input, shape index: {}]   ;;  %s1071_s4 = inlined_call_operand.vmem [shape: bf16[16,256], index: 4, kind: output, shape index: {}]  }
   0x1   :  { %v9_v0 = vstv %s1070_s3 }
   0x2   :  { %v10_v1 = vunpack.i.l.bf16 %v9_v0 }
   0x3   :  { %v729_v2 = vld [vmem:[%s1067_s0 + $0x4] ss:$8 sps:$4 sm:$0xff]   ;;  %v733_v5 = vld [vmem:[%s1067_s0] ss:$8 sps:$4 sm:$0xff]   ;;  %v735_v7 = vld [vmem:[%s1067_s0 + $0x14] ss:$8 sps:$4 sm:$0xff]  }
   0x4   :  { %v857_v3 = vpack.c.bf16 %v10_v1, %v10_v1  ;;  %v731_v4 = vld [vmem:[%s1067_s0 + $0x104] ss:$8 sps:$4 sm:$0xff]   ;;  %522 = vmatprep.subr.bf16.mxu1 %v729_v2  ;;  %v734_v6 = vld [vmem:[%s1067_s0 + $0x100] ss:$8 sps:$4 sm:$0xff]   ;;  %v737_v8 = vld [vmem:[%s1067_s0 + $0x114] ss:$8 sps:$4 sm:$0xff]  }
   0x5   :  { %565 = vmatprep.subr.bf16.mxu0 %v731_v4  ;;  %523 = vmatpush1.bf16.msra.mxu1 %v733_v5  ;;  %v739_v9 = vld [vmem:[%s1067_s0 + $0x10] ss:$8 sps:$4 sm:$0xff]   ;;  %v741_v11 = vld [vmem:[%s1067_s0 + $0x24] ss:$8 sps:$4 sm:$0xff]   ;;  %v745_v13 = vld [vmem:[%s1067_s0 + $0x20] ss:$8 sps:$4 sm:$0xff]  }
   0x6   :  { %566 = vmatpush1.bf16.msra.mxu0 %v734_v6  ;;  %524 = vmatprep.subr.bf16.mxu1 %v735_v7  ;;  %v740_v10 = vld [vmem:[%s1067_s0 + $0x110] ss:$8 sps:$4 sm:$0xff]   ;;  %v743_v12 = vld [vmem:[%s1067_s0 + $0x124] ss:$8 sps:$4 sm:$0xff]   ;;  %v746_v14 = vld [vmem:[%s1067_s0 + $0x120] ss:$8 sps:$4 sm:$0xff]  }
   0x7   :  { %567 = vmatprep.subr.bf16.mxu0 %v737_v8  ;;  %v747_v15 = vld [vmem:[%s1067_s0 + $0x34] ss:$8 sps:$4 sm:$0xff]   ;;  %v751_v17 = vld [vmem:[%s1067_s0 + $0x30] ss:$8 sps:$4 sm:$0xff]   ;;  %v753_v19 = vld [vmem:[%s1067_s0 + $0x44] ss:$8 sps:$4 sm:$0xff]  }
   0x8   :  { %v749_v16 = vld [vmem:[%s1067_s0 + $0x134] ss:$8 sps:$4 sm:$0xff]   ;;  %v752_v18 = vld [vmem:[%s1067_s0 + $0x130] ss:$8 sps:$4 sm:$0xff]   ;;  %v755_v20 = vld [vmem:[%s1067_s0 + $0x144] ss:$8 sps:$4 sm:$0xff]  }
   0x9   :  { %525 = vmatpush1.bf16.msra.mxu1 %v739_v9  ;;  %v757_v21 = vld [vmem:[%s1067_s0 + $0x40] ss:$8 sps:$4 sm:$0xff]   ;;  %v759_v23 = vld [vmem:[%s1067_s0 + $0x54] ss:$8 sps:$4 sm:$0xff]   ;;  %v763_v25 = vld [vmem:[%s1067_s0 + $0x50] ss:$8 sps:$4 sm:$0xff]  }
   0xa   :  { %568 = vmatpush1.bf16.msra.mxu0 %v740_v10  ;;  %526 = vmatprep.subr.bf16.mxu1 %v741_v11  ;;  %v758_v22 = vld [vmem:[%s1067_s0 + $0x140] ss:$8 sps:$4 sm:$0xff]   ;;  %v761_v24 = vld [vmem:[%s1067_s0 + $0x154] ss:$8 sps:$4 sm:$0xff]   ;;  %v764_v26 = vld [vmem:[%s1067_s0 + $0x150] ss:$8 sps:$4 sm:$0xff]   ;;  %v172_v11 = vlaneseq }
   0xb   :  { %569 = vmatprep.subr.bf16.mxu0 %v743_v12  ;;  %v765_v27 = vld [vmem:[%s1067_s0 + $0x64] ss:$8 sps:$4 sm:$0xff]   ;;  %v769_v29 = vld [vmem:[%s1067_s0 + $0x60] ss:$8 sps:$4 sm:$0xff]   ;;  %v771_v31 = vld [vmem:[%s1067_s0 + $0x74] ss:$8 sps:$4 sm:$0xff]  }
   0xc   :  { %v767_v28 = vld [vmem:[%s1067_s0 + $0x164] ss:$8 sps:$4 sm:$0xff]   ;;  %v770_v30 = vld [vmem:[%s1067_s0 + $0x160] ss:$8 sps:$4 sm:$0xff]   ;;  %v773_v32 = vld [vmem:[%s1067_s0 + $0x174] ss:$8 sps:$4 sm:$0xff]  }
   0xd   :  { %527 = vmatpush1.bf16.msra.mxu1 %v745_v13  ;;  %v775_v33 = vld [vmem:[%s1067_s0 + $0x70] ss:$8 sps:$4 sm:$0xff]   ;;  %v777_v35 = vld [vmem:[%s1067_s0 + $0x84] ss:$8 sps:$4 sm:$0xff]   ;;  %v781_v37 = vld [vmem:[%s1067_s0 + $0x80] ss:$8 sps:$4 sm:$0xff]  }
   0xe   :  { %570 = vmatpush1.bf16.msra.mxu0 %v746_v14  ;;  %528 = vmatprep.subr.bf16.mxu1 %v747_v15  ;;  %v776_v34 = vld [vmem:[%s1067_s0 + $0x170] ss:$8 sps:$4 sm:$0xff]   ;;  %v779_v36 = vld [vmem:[%s1067_s0 + $0x184] ss:$8 sps:$4 sm:$0xff]   ;;  %v782_v38 = vld [vmem:[%s1067_s0 + $0x180] ss:$8 sps:$4 sm:$0xff]  }
   0xf   :  { %571 = vmatprep.subr.bf16.mxu0 %v749_v16  ;;  %v783_v39 = vld [vmem:[%s1067_s0 + $0x94] ss:$8 sps:$4 sm:$0xff]   ;;  %v787_v41 = vld [vmem:[%s1067_s0 + $0x90] ss:$8 sps:$4 sm:$0xff]   ;;  %v789_v43 = vld [vmem:[%s1067_s0 + $0xa4] ss:$8 sps:$4 sm:$0xff]  }
  0x10   :  { %v785_v40 = vld [vmem:[%s1067_s0 + $0x194] ss:$8 sps:$4 sm:$0xff]   ;;  %v788_v42 = vld [vmem:[%s1067_s0 + $0x190] ss:$8 sps:$4 sm:$0xff]   ;;  %v791_v44 = vld [vmem:[%s1067_s0 + $0x1a4] ss:$8 sps:$4 sm:$0xff]  }
  0x11   :  { %529 = vmatpush1.bf16.msra.mxu1 %v751_v17  ;;  %v793_v45 = vld [vmem:[%s1067_s0 + $0xa0] ss:$8 sps:$4 sm:$0xff]   ;;  %v795_v47 = vld [vmem:[%s1067_s0 + $0xb4] ss:$8 sps:$4 sm:$0xff]   ;;  %v799_v51 = vld [vmem:[%s1067_s0 + $0xb0] ss:$8 sps:$4 sm:$0xff]  }
  0x12   :  { %572 = vmatpush1.bf16.msra.mxu0 %v752_v18  ;;  %530 = vmatprep.subr.bf16.mxu1 %v753_v19  ;;  %v794_v46 = vld [vmem:[%s1067_s0 + $0x1a0] ss:$8 sps:$4 sm:$0xff]   ;;  %v797_v48 = vld [vmem:[%s1067_s0 + $0x1b4] ss:$8 sps:$4 sm:$0xff]   ;;  %v800_v52 = vld [vmem:[%s1067_s0 + $0x1b0] ss:$8 sps:$4 sm:$0xff]  }
  0x13   :  { %573 = vmatprep.subr.bf16.mxu0 %v755_v20  ;;  %v29_v49 = vld [vmem:[%s1069_s2] sm:$0xff]   ;;  %v825_v50 = vld [vmem:[%s1069_s2 + $0x8] sm:$0xff]   ;;  %v807_v58 = vld [vmem:[%s1067_s0 + $0xd4] ss:$8 sps:$4 sm:$0xff]   ;;  %v173_v12 = vshrl.u32 %v172_v11, 7 }
  0x14   :  { %34 = vst [vmem:[#allocation7] sm:$0xff] %v29_v49   ;;  %v801_v53 = vld [vmem:[%s1067_s0 + $0xc4] ss:$8 sps:$4 sm:$0xff]   ;;  %v636_v55 = vcombine.high %v825_v50, %v857_v3  ;;  %v805_v56 = vld [vmem:[%s1067_s0 + $0xc0] ss:$8 sps:$4 sm:$0xff]   ;;  %v635_v10 = vcombine.low %v825_v50, %v857_v3 }
  0x15   :  { %531 = vmatpush1.bf16.msra.mxu1 %v757_v21  ;;  %v803_v54 = vld [vmem:[%s1067_s0 + $0x1c4] ss:$8 sps:$4 sm:$0xff]   ;;  %v806_v57 = vld [vmem:[%s1067_s0 + $0x1c0] ss:$8 sps:$4 sm:$0xff]   ;;  %v809_v59 = vld [vmem:[%s1067_s0 + $0x1d4] ss:$8 sps:$4 sm:$0xff]  }
  0x16   :  { %574 = vmatpush1.bf16.msra.mxu0 %v758_v22  ;;  %532 = vmatprep.subr.bf16.mxu1 %v759_v23  ;;  %v811_v62 = vld [vmem:[%s1067_s0 + $0xd0] ss:$8 sps:$4 sm:$0xff]   ;;  %v813_v0 = vld [vmem:[%s1067_s0 + $0xe4] ss:$8 sps:$4 sm:$0xff]   ;;  %v817_v2 = vld [vmem:[%s1067_s0 + $0xe0] ss:$8 sps:$4 sm:$0xff]  }
  0x17   :  { %575 = vmatprep.subr.bf16.mxu0 %v761_v24  ;;  %597 = vmatprep.mubr.bf16.mxu0 %v636_v55  ;;  %v812_v63 = vld [vmem:[%s1067_s0 + $0x1d0] ss:$8 sps:$4 sm:$0xff]   ;;  %v815_v1 = vld [vmem:[%s1067_s0 + $0x1e4] ss:$8 sps:$4 sm:$0xff]   ;;  %v818_v4 = vld [vmem:[%s1067_s0 + $0x1e0] ss:$8 sps:$4 sm:$0xff]  }
  0x18   :  { %v819_v5 = vld [vmem:[%s1067_s0 + $0xf4] ss:$8 sps:$4 sm:$0xff]   ;;  %v823_v7 = vld [vmem:[%s1067_s0 + $0xf0] ss:$8 sps:$4 sm:$0xff]   ;;  %v174_v13 = vsub.s32 0, %v173_v12  ;;  %v178_v15 = vsub.s32 1, %v173_v12 }
  0x19   :  { %533 = vmatpush1.bf16.msra.mxu1 %v763_v25  ;;  %v821_v6 = vld [vmem:[%s1067_s0 + $0x1f4] ss:$8 sps:$4 sm:$0xff]   ;;  %v824_v8 = vld [vmem:[%s1067_s0 + $0x1f0] ss:$8 sps:$4 sm:$0xff]   ;;  %v170_v14 = vld [vmem:[%s1068_s1] sm:$0x3] }
  0x1a   :  { %576 = vmatpush1.bf16.msra.mxu0 %v764_v26  ;;  %534 = vmatprep.subr.bf16.mxu1 %v765_v27  ;;  %v175_v16 = vrot.slane %v170_v14, %v174_v13  ;;  %v179_v17 = vrot.slane %v170_v14, %v178_v15 }
  0x1b   :  { %577 = vmatprep.subr.bf16.mxu0 %v767_v28  ;;  %v102_v60 = vld [vmem:[#allocation7] sm:$0xff] }
  0x1c   :  { %v634_v61 = vcombine.high %v102_v60, %v857_v3  ;;  %v633_v9 = vcombine.low %v102_v60, %v857_v3 }
  0x1d   :  { %535 = vmatpush1.bf16.msra.mxu1 %v769_v29 }
  0x1e   :  { %578 = vmatpush1.bf16.msra.mxu0 %v770_v30  ;;  %536 = vmatprep.subr.bf16.mxu1 %v771_v31 }
  0x1f   :  { %579 = vmatprep.subr.bf16.mxu0 %v773_v32  ;;  %554 = vmatprep.mubr.bf16.mxu1 %v634_v61 }
  0x21   :  { %537 = vmatpush1.bf16.msra.mxu1 %v775_v33 }
  0x22   :  { %580 = vmatpush1.bf16.msra.mxu0 %v776_v34  ;;  %538 = vmatprep.subr.bf16.mxu1 %v777_v35 }
  0x23   :  { %581 = vmatprep.subr.bf16.mxu0 %v779_v36 }
  0x25   :  { %539 = vmatpush1.bf16.msra.mxu1 %v781_v37 }
  0x26   :  { %582 = vmatpush1.bf16.msra.mxu0 %v782_v38  ;;  %540 = vmatprep.subr.bf16.mxu1 %v783_v39 }
  0x27   :  { %583 = vmatprep.subr.bf16.mxu0 %v785_v40 }
  0x29   :  { %541 = vmatpush1.bf16.msra.mxu1 %v787_v41 }
  0x2a   :  { %584 = vmatpush1.bf16.msra.mxu0 %v788_v42  ;;  %542 = vmatprep.subr.bf16.mxu1 %v789_v43 }
  0x2b   :  { %585 = vmatprep.subr.bf16.mxu0 %v791_v44 }
  0x2d   :  { %543 = vmatpush1.bf16.msra.mxu1 %v793_v45 }
  0x2e   :  { %586 = vmatpush1.bf16.msra.mxu0 %v794_v46  ;;  %544 = vmatprep.subr.bf16.mxu1 %v795_v47 }
  0x2f   :  { %587 = vmatprep.subr.bf16.mxu0 %v797_v48 }
  0x31   :  { %545 = vmatpush1.bf16.msra.mxu1 %v799_v51 }
  0x32   :  { %588 = vmatpush1.bf16.msra.mxu0 %v800_v52  ;;  %546 = vmatprep.subr.bf16.mxu1 %v801_v53 }
  0x33   :  { %589 = vmatprep.subr.bf16.mxu0 %v803_v54 }
  0x35   :  { %547 = vmatpush1.bf16.msra.mxu1 %v805_v56 }
  0x36   :  { %590 = vmatpush1.bf16.msra.mxu0 %v806_v57  ;;  %548 = vmatprep.subr.bf16.mxu1 %v807_v58 }
  0x37   :  { %591 = vmatprep.subr.bf16.mxu0 %v809_v59 }
  0x39   :  { %549 = vmatpush1.bf16.msra.mxu1 %v811_v62 }
  0x3a   :  { %592 = vmatpush1.bf16.msra.mxu0 %v812_v63  ;;  %550 = vmatprep.subr.bf16.mxu1 %v813_v0 }
  0x3b   :  { %593 = vmatprep.subr.bf16.mxu0 %v815_v1 }
  0x3d   :  { %551 = vmatpush1.bf16.msra.mxu1 %v817_v2 }
  0x3e   :  { %594 = vmatpush1.bf16.msra.mxu0 %v818_v4  ;;  %552 = vmatprep.subr.bf16.mxu1 %v819_v5 }
  0x3f   :  { %595 = vmatprep.subr.bf16.mxu0 %v821_v6 }
  0x41   :  { %553 = vmatpush1.bf16.msra.mxu1 %v823_v7 }
  0x42   :  { %596 = vmatpush1.bf16.msra.mxu0 %v824_v8 }
  0x44   :  { %555 = vmatmul.mubr.bf16.vlgmr.msra.gmra.mrb[0].mxu1 %v633_v9 }
  0x45   :  { %598 = vmatmul.mubr.bf16.vlgmr.msra.gmra.mrb[0].mxu0 %v635_v10 }
 0x117   :  { %v556_v18 = vpop.f32.mrb[0].mxu1 }
 0x118   :  { %v599_v19 = vpop.f32.mrb[0].mxu0  ;;  %v557_v20 = vadd.f32 %v556_v18, %v175_v16  ;;  %v558_v21 = vpop.f32.mrb[1].mxu1 }
 0x119   :  { %v601_v22 = vpop.f32.mrb[1].mxu0  ;;  %v559_v3 = vadd.f32 %v558_v21, %v179_v17  ;;  %v560_v23 = vpop.f32.mrb[2].mxu1 }
 0x11a   :  { %v603_v24 = vpop.f32.mrb[2].mxu0  ;;  %v600_v25 = vadd.f32 %v599_v19, %v557_v20  ;;  %v561_v26 = vadd.f32 %v560_v23, %v175_v16  ;;  %v562_v27 = vpop.f32.mrb[3].mxu1 }
 0x11b   :  { %v605_v28 = vpop.f32.mrb[3].mxu0  ;;  %v602_v29 = vadd.f32 %v601_v22, %v559_v3  ;;  %v563_v30 = vadd.f32 %v562_v27, %v179_v17 }
 0x11c   :  { %v608_v31 = vmax.f32 %v600_v25, 0.0  ;;  %v604_v32 = vadd.f32 %v603_v24, %v561_v26 }
 0x11d   :  { %v609_v33 = vmax.f32 %v602_v29, 0.0  ;;  %v606_v34 = vadd.f32 %v605_v28, %v563_v30 }
 0x11e   :  { %v610_v35 = vmax.f32 %v604_v32, 0.0 }
 0x11f   :  { %v703_v36 = vpack.c.bf16 %v609_v33, %v608_v31  ;;  %v611_v37 = vmax.f32 %v606_v34, 0.0 }
 0x121   :  { %624 = vst [vmem:[%s1071_s4] sm:$0xff] %v703_v36  ;;  %v704_v38 = vpack.c.bf16 %v611_v37, %v610_v35 }
 0x123   :  { %625 = vst [vmem:[%s1071_s4 + $0x8] sm:$0xff] %v704_v38 }

// kernel: ae_forward.24
= control target key start
LH: loop header
LB: loop body
LE: loop exit
PB: predicated region body
PF: predicated region fallthrough
CT: control target
= control target key end

     0   :  { %s1292_s0 = inlined_call_operand.vmem [shape: bf16[256,128], index: 0, kind: input, shape index: {}]   ;;  %s1293_s1 = inlined_call_operand.vmem [shape: f32[1,128], index: 1, kind: input, shape index: {}]   ;;  %s1294_s2 = inlined_call_operand.vmem [shape: bf16[32,64], index: 2, kind: input, shape index: {}]   ;;  %s1295_s3 = inlined_call_operand.<no memory space> [shape: bf16[], index: 3, kind: input, shape index: {}]   ;;  %s1296_s4 = inlined_call_operand.vmem [shape: bf16[32,64], index: 4, kind: input, shape index: {}]   ;;  %s1297_s5 = inlined_call_operand.vmem [shape: bf16[32,64], index: 5, kind: input, shape index: {}]   ;;  %s1298_s6 = inlined_call_operand.vmem [shape: bf16[32,64], index: 6, kind: input, shape index: {}]   ;;  %s1299_s7 = inlined_call_operand.vmem [shape: bf16[32,128], index: 7, kind: output, shape index: {}]  }
   0x1   :  { %v12_v0 = vstv %s1295_s3 }
   0x2   :  { %v1109_v1 = vunpack.i.l.bf16 %v12_v0 }
   0x3   :  { %v170_v2 = vlaneseq  ;;  %v920_v3 = vld [vmem:[%s1297_s5 + $0x8] sm:$0xff]   ;;  %v167_v4 = vld [vmem:[%s1297_s5] sm:$0xff]   ;;  %v1046_v30 = vld [vmem:[%s1292_s0 + $0x50] sm:$0xff]   ;;  %s1064_s20 = smov 64  }
   0x4   :  { %v918_v5 = vld [vmem:[%s1294_s2 + $0x8] sm:$0xff]   ;;  %v137_v6 = vld [vmem:[%s1294_s2] sm:$0xff]   ;;  %v434_v9 = vunpack.c.l.bf16 %v920_v3  ;;  %v168_v10 = vunpack.c.l.bf16 %v167_v4  ;;  %v570_v11 = vunpack.c.h.bf16 %v920_v3  ;;  %v298_v12 = vunpack.c.h.bf16 %v167_v4  ;;  %v1047_v38 = vld [vmem:[%s1292_s0 + $0x10] sm:$0xff]  }
   0x5   :  { %v1123_v7 = vand.u32 127, %v170_v2  ;;  %v1042_v8 = vld [vmem:[%s1292_s0 + $0x40] sm:$0xff]   ;;  %v1044_v16 = vld [vmem:[%s1292_s0 + $0x48] sm:$0xff]   ;;  %v401_v17 = vunpack.c.l.bf16 %v918_v5  ;;  %v537_v18 = vunpack.c.h.bf16 %v918_v5  ;;  %v138_v20 = vunpack.c.l.bf16 %v137_v6  ;;  %v1048_v46 = vld [vmem:[%s1292_s0 + $0x58] sm:$0xff]  }
   0x6   :  { %v1043_v13 = vld [vmem:[%s1292_s0] sm:$0xff]   ;;  %966 = vmatprep.subr.bf16.mxu0 %v1042_v8  ;;  %994 = vmatprep.subr.bf16.mxu1 %v1042_v8  ;;  %v1045_v19 = vld [vmem:[%s1292_s0 + $0x8] sm:$0xff]   ;;  %v265_v21 = vunpack.c.h.bf16 %v137_v6  ;;  %v1049_v49 = vld [vmem:[%s1292_s0 + $0x18] sm:$0xff]  }
   0x7   :  { %v1132_v14 = vadd.s32 128, %v1123_v7  ;;  %v215_v15 = vadd.s32 256, %v1123_v7  ;;  %vm177_vm0 = vcmp.lt.s32.totalorder %v1123_v7, 64  ;;  %967 = vmatpush3.bf16.msra.mxu0 %v1043_v13  ;;  %1002 = vmatpush3.bf16.msra.mxu1 %v1043_v13  ;;  %v1050_v52 = vld [vmem:[%s1292_s0 + $0x60] sm:$0xff]   ;;  %v1052_v54 = vld [vmem:[%s1292_s0 + $0x68] sm:$0xff]   ;;  %v1054_v56 = vld [vmem:[%s1292_s0 + $0x70] sm:$0xff]  }
   0x8   :  { %968 = vmatprep.subr.bf16.mxu0 %v1044_v16  ;;  %995 = vmatprep.subr.bf16.mxu1 %v1044_v16  ;;  %v1051_v53 = vld [vmem:[%s1292_s0 + $0x20] sm:$0xff]   ;;  %v1053_v55 = vld [vmem:[%s1292_s0 + $0x28] sm:$0xff]   ;;  %v1055_v57 = vld [vmem:[%s1292_s0 + $0x30] sm:$0xff]  }
   0x9   :  { %vm173_vm1 = vcmp.lt.s32.totalorder %v1132_v14, 192  ;;  %vm216_vm2 = vcmp.lt.s32.totalorder %v215_v15, 320  ;;  %v1056_v58 = vld [vmem:[%s1292_s0 + $0x78] sm:$0xff]   ;;  %v921_v60 = vld [vmem:[%s1298_s6 + $0x8] sm:$0xff]   ;;  %v190_v61 = vld [vmem:[%s1298_s6] sm:$0xff]  }
   0xa   :  { %v441_v22 = vsel %vm173_vm1, %v434_v9, %v1109_v1  ;;  %v174_v23 = vsel %vm173_vm1, %v168_v10, %v1109_v1  ;;  %v577_v24 = vsel %vm173_vm1, %v570_v11, %v1109_v1  ;;  %v305_v25 = vsel %vm173_vm1, %v298_v12, %v1109_v1  ;;  %v1057_v59 = vld [vmem:[%s1292_s0 + $0x38] sm:$0xff]   ;;  %v919_v63 = vld [vmem:[%s1296_s4 + $0x8] sm:$0xff]   ;;  %v152_v2 = vld [vmem:[%s1296_s4] sm:$0xff]  }
   0xb   :  { %v445_v26 = vsel %vm177_vm0, %v441_v22, %v1109_v1  ;;  %v504_v27 = vsel %vm177_vm0, %v1109_v1, %v441_v22  ;;  %v178_v28 = vsel %vm177_vm0, %v174_v23, %v1109_v1  ;;  %v232_v29 = vsel %vm177_vm0, %v1109_v1, %v174_v23  ;;  %969 = vmatpush3.bf16.msra.mxu0 %v1045_v19 }
   0xc   :  { %v1022_v31 = vpack.i.bf16 %v504_v27, %v445_v26  ;;  %v1012_v32 = vpack.i.bf16 %v232_v29, %v178_v28  ;;  %v581_v33 = vsel %vm177_vm0, %v577_v24, %v1109_v1  ;;  %v640_v34 = vsel %vm177_vm0, %v1109_v1, %v577_v24  ;;  %1003 = vmatpush3.bf16.msra.mxu1 %v1045_v19 }
   0xd   :  { %v309_v35 = vsel %vm177_vm0, %v305_v25, %v1109_v1  ;;  %v368_v36 = vsel %vm177_vm0, %v1109_v1, %v305_v25  ;;  %v487_v37 = vsel %vm216_vm2, %v401_v17, %v1109_v1  ;;  %v1027_v39 = vpack.i.bf16 %v640_v34, %v581_v33  ;;  %970 = vmatprep.subr.bf16.mxu0 %v1046_v30 }
   0xe   :  { %1023 = vrot.lane.b32.xlu1 %v1022_v31, %s1064_s20  ;;  %1013 = vrot.lane.b32.xlu0 %v1012_v32, %s1064_s20  ;;  %v1017_v40 = vpack.i.bf16 %v368_v36, %v309_v35  ;;  %v623_v41 = vsel %vm216_vm2, %v537_v18, %v1109_v1  ;;  %v491_v42 = vsel %vm177_vm0, %v487_v37, %v1109_v1  ;;  %v459_v62 = vunpack.c.l.bf16 %v921_v60 }
   0xf   :  { %v627_v43 = vsel %vm177_vm0, %v623_v41, %v1109_v1  ;;  %v217_v44 = vsel %vm216_vm2, %v138_v20, %v1109_v1  ;;  %v351_v45 = vsel %vm216_vm2, %v265_v21, %v1109_v1  ;;  %996 = vmatprep.subr.bf16.mxu1 %v1046_v30  ;;  %971 = vmatpush3.bf16.msra.mxu0 %v1047_v38  ;;  %v191_v0 = vunpack.c.l.bf16 %v190_v61 }
  0x10   :  { %v221_v47 = vsel %vm177_vm0, %v217_v44, %v1109_v1  ;;  %v355_v48 = vsel %vm177_vm0, %v351_v45, %v1109_v1  ;;  %1004 = vmatpush3.bf16.msra.mxu1 %v1047_v38  ;;  %v1037_v50 = vpack.i.bf16 %v627_v43, %v491_v42  ;;  %972 = vmatprep.subr.bf16.mxu0 %v1048_v46  ;;  %v418_v3 = vunpack.c.l.bf16 %v919_v63 }
  0x11   :  { %v1032_v51 = vpack.i.bf16 %v355_v48, %v221_v47  ;;  %997 = vmatprep.subr.bf16.mxu1 %v1048_v46  ;;  %v465_v4 = vsel %vm177_vm0, %v459_v62, %v1109_v1  ;;  %v554_v5 = vunpack.c.h.bf16 %v919_v63  ;;  %v197_v8 = vsel %vm177_vm0, %v191_v0, %v1109_v1 }
  0x12   :  { %1028 = vrot.lane.b32.xlu1 %v1027_v39, %s1064_s20  ;;  %1018 = vrot.lane.b32.xlu0 %v1017_v40, %s1064_s20  ;;  %v153_v10 = vunpack.c.l.bf16 %v152_v2  ;;  %v595_v11 = vunpack.c.h.bf16 %v921_v60  ;;  %v282_v12 = vunpack.c.h.bf16 %v152_v2  ;;  %v323_v17 = vunpack.c.h.bf16 %v190_v61 }
  0x13   :  { %973 = vmatpush3.bf16.msra.mxu0 %v1049_v49  ;;  %v499_v22 = vsel %vm173_vm1, %v418_v3, %v1109_v1  ;;  %v635_v25 = vsel %vm173_vm1, %v554_v5, %v1109_v1  ;;  %v1065_v44 = vmov 0.0  }
  0x14   :  { %1005 = vmatpush3.bf16.msra.mxu1 %v1049_v49  ;;  %974 = vmatprep.subr.bf16.mxu0 %v1050_v52  ;;  %v228_v23 = vsel %vm173_vm1, %v153_v10, %v1109_v1  ;;  %v601_v24 = vsel %vm177_vm0, %v595_v11, %v1109_v1  ;;  %v329_v30 = vsel %vm177_vm0, %v323_v17, %v1109_v1  ;;  %v926_v10 = vld [vmem:[%s1293_s1] ss:$0 sm:$0xff] }
  0x15   :  { %998 = vmatprep.subr.bf16.mxu1 %v1050_v52  ;;  %v363_v31 = vsel %vm173_vm1, %v282_v12, %v1109_v1 }
  0x16   :  { %1038 = vrot.lane.b32.xlu1 %v1037_v50, %s1064_s20  ;;  %1033 = vrot.lane.b32.xlu0 %v1032_v51, %s1064_s20 }
  0x17   :  { %975 = vmatpush3.bf16.msra.mxu0 %v1051_v53 }
  0x18   :  { %1006 = vmatpush3.bf16.msra.mxu1 %v1051_v53  ;;  %976 = vmatprep.subr.bf16.mxu0 %v1052_v54 }
  0x19   :  { %999 = vmatprep.subr.bf16.mxu1 %v1052_v54 }
  0x1b   :  { %977 = vmatpush3.bf16.msra.mxu0 %v1053_v55 }
  0x1c   :  { %1007 = vmatpush3.bf16.msra.mxu1 %v1053_v55  ;;  %978 = vmatprep.subr.bf16.mxu0 %v1054_v56 }
  0x1d   :  { %1000 = vmatprep.subr.bf16.mxu1 %v1054_v56 }
  0x1f   :  { %979 = vmatpush3.bf16.msra.mxu0 %v1055_v57 }
  0x20   :  { %1008 = vmatpush3.bf16.msra.mxu1 %v1055_v57  ;;  %980 = vmatprep.subr.bf16.mxu0 %v1056_v58 }
  0x21   :  { %1001 = vmatprep.subr.bf16.mxu1 %v1056_v58 }
  0x23   :  { %981 = vmatpush3.bf16.msra.mxu0 %v1057_v59 }
  0x24   :  { %1009 = vmatpush3.bf16.msra.mxu1 %v1057_v59 }
  0x80   :  { %v1024_v6 = vpop.permute.xlu1 %1023  ;;  %v1014_v9 = vpop.permute.xlu0 %1013 }
  0x81   :  { %v1026_v13 = vunpack.i.h.bf16 %v1024_v6  ;;  %v1025_v15 = vunpack.i.l.bf16 %v1024_v6  ;;  %v1015_v16 = vunpack.i.l.bf16 %v1014_v9  ;;  %v1016_v20 = vunpack.i.h.bf16 %v1014_v9 }
  0x83   :  { %v509_v18 = vmax.f32 %v1109_v1, %v1026_v13  ;;  %v468_v19 = vmax.f32 %v465_v4, %v1025_v15  ;;  %v200_v21 = vmax.f32 %v197_v8, %v1015_v16  ;;  %v237_v38 = vmax.f32 %v1109_v1, %v1016_v20 }
  0x84   :  { %v1029_v26 = vpop.permute.xlu1 %1028  ;;  %v1019_v27 = vpop.permute.xlu0 %1018 }
  0x85   :  { %v472_v28 = vmax.f32 %v468_v19, %v1109_v1  ;;  %v204_v29 = vmax.f32 %v200_v21, %v1109_v1  ;;  %v1031_v32 = vunpack.i.h.bf16 %v1029_v26  ;;  %v1030_v33 = vunpack.i.l.bf16 %v1029_v26 }
  0x86   :  { %v1021_v34 = vunpack.i.h.bf16 %v1019_v27  ;;  %v1020_v35 = vunpack.i.l.bf16 %v1019_v27  ;;  %v513_v36 = vmax.f32 %v509_v18, %v499_v22  ;;  %v241_v53 = vmax.f32 %v237_v38, %v228_v23 }
  0x87   :  { %v476_v37 = vmax.f32 %v472_v28, %v1109_v1  ;;  %v208_v39 = vmax.f32 %v204_v29, %v1109_v1  ;;  %v645_v40 = vmax.f32 %v1109_v1, %v1031_v32  ;;  %v604_v41 = vmax.f32 %v601_v24, %v1030_v33 }
  0x88   :  { %v373_v7 = vmax.f32 %v1109_v1, %v1021_v34  ;;  %v332_v42 = vmax.f32 %v329_v30, %v1020_v35  ;;  %v1039_v43 = vpop.permute.xlu1 %1038  ;;  %v1034_v14 = vpop.permute.xlu0 %1033 }
  0x89   :  { %v479_v45 = vpack.c.bf16 %v1065_v44, %v476_v37  ;;  %v210_v46 = vpack.c.bf16 %v1065_v44, %v208_v39  ;;  %v1041_v47 = vunpack.i.h.bf16 %v1039_v43  ;;  %v1040_v48 = vunpack.i.l.bf16 %v1039_v43 }
  0x8a   :  { %v649_v49 = vmax.f32 %v645_v40, %v635_v25  ;;  %v608_v50 = vmax.f32 %v604_v41, %v1109_v1  ;;  %v377_v51 = vmax.f32 %v373_v7, %v363_v31  ;;  %v336_v52 = vmax.f32 %v332_v42, %v1109_v1 }
  0x8b   :  { %481 = vst [vmem:[#allocation22 + $0x10] sm:$0xf] %v479_v45  ;;  %212 = vst [vmem:[#allocation22] sm:$0xf] %v210_v46  ;;  %v517_v54 = vmax.f32 %v513_v36, %v1040_v48  ;;  %v1036_v55 = vunpack.i.h.bf16 %v1034_v14  ;;  %v1035_v56 = vunpack.i.l.bf16 %v1034_v14 }
  0x8c   :  { %v612_v57 = vmax.f32 %v608_v50, %v1109_v1  ;;  %v340_v58 = vmax.f32 %v336_v52, %v1109_v1  ;;  %v653_v59 = vmax.f32 %v649_v49, %v1041_v47 }
  0x8d   :  { %v520_v60 = vpack.c.bf16 %v1065_v44, %v517_v54  ;;  %v381_v61 = vmax.f32 %v377_v51, %v1036_v55  ;;  %v245_v62 = vmax.f32 %v241_v53, %v1035_v56 }
  0x8e   :  { %v615_v63 = vpack.c.bf16 %v1065_v44, %v612_v57  ;;  %v343_v0 = vpack.c.bf16 %v1065_v44, %v340_v58  ;;  %v656_v2 = vpack.c.bf16 %v1065_v44, %v653_v59 }
  0x8f   :  { %522 = vst [vmem:[#allocation22 + $0x14] sm:$0xf] %v520_v60  ;;  %v384_v3 = vpack.c.bf16 %v1065_v44, %v381_v61  ;;  %v248_v4 = vpack.c.bf16 %v1065_v44, %v245_v62 }
  0x90   :  { %617 = vst [vmem:[#allocation22 + $0x18] sm:$0xf] %v615_v63  ;;  %345 = vst [vmem:[#allocation22 + $0x8] sm:$0xf] %v343_v0 }
  0x91   :  { %658 = vst [vmem:[#allocation22 + $0x1c] sm:$0xf] %v656_v2  ;;  %386 = vst [vmem:[#allocation22 + $0xc] sm:$0xf] %v384_v3 }
  0x92   :  { %250 = vst [vmem:[#allocation22 + $0x4] sm:$0xf] %v248_v4 }
  0x97   :  { %v1061_v5 = vld [vmem:[#allocation22 + $0x10] ss:$8 sps:$4 sm:$0xff]   ;;  %v1058_v8 = vld [vmem:[#allocation22] ss:$8 sps:$4 sm:$0xff]  }
  0x98   :  { %v1063_v6 = vld [vmem:[#allocation22 + $0x14] ss:$8 sps:$4 sm:$0xff]  }
  0x99   :  { %v1060_v9 = vld [vmem:[#allocation22 + $0x4] ss:$8 sps:$4 sm:$0xff]   ;;  %859 = vmatprep.mubr.bf16.mxu1 %v1063_v6 }
  0x9a   :  { %860 = vmatmul.mubr.bf16.vlgmr.msra.gmra.mrb[0].mxu1 %v1061_v5  ;;  %851 = vmatprep.mubr.bf16.mxu0 %v1060_v9 }
  0x9b   :  { %852 = vmatmul.mubr.bf16.vlgmr.msra.gmra.mrb[0].mxu0 %v1058_v8 }
 0x16d   :  { %v988_v1 = vpop.f32.mrb[0].mxu1 }
 0x16e   :  { %v989_v11 = vpop.f32.mrb[1].mxu1  ;;  %v982_v12 = vpop.f32.mrb[0].mxu0 }
 0x16f   :  { %v990_v13 = vadd.f32 %v989_v11, %v988_v1  ;;  %v991_v15 = vpop.f32.mrb[2].mxu1  ;;  %v983_v16 = vpop.f32.mrb[1].mxu0 }
 0x170   :  { %v992_v17 = vpop.f32.mrb[3].mxu1  ;;  %v984_v18 = vadd.f32 %v983_v16, %v982_v12  ;;  %v985_v20 = vpop.f32.mrb[2].mxu0 }
 0x171   :  { %v862_v19 = vadd.f32 %v990_v13, %v926_v10  ;;  %v993_v21 = vadd.f32 %v992_v17, %v991_v15  ;;  %v986_v22 = vpop.f32.mrb[3].mxu0 }
 0x172   :  { %v854_v23 = vadd.f32 %v984_v18, %v926_v10  ;;  %v987_v24 = vadd.f32 %v986_v22, %v985_v20 }
 0x173   :  { %v865_v25 = vadd.f32 %v993_v21, %v926_v10  ;;  %v870_v26 = vmax.f32 %v862_v19, 0.0 }
 0x174   :  { %v857_v27 = vadd.f32 %v987_v24, %v926_v10  ;;  %v868_v29 = vmax.f32 %v854_v23, 0.0 }
 0x175   :  { %v871_v28 = vmax.f32 %v865_v25, 0.0 }
 0x176   :  { %v869_v30 = vmax.f32 %v857_v27, 0.0 }
 0x177   :  { %v963_v31 = vpack.c.bf16 %v871_v28, %v870_v26 }
 0x178   :  { %v958_v32 = vpack.c.bf16 %v869_v30, %v868_v29 }
 0x179   :  { %965 = vst [vmem:[%s1299_s7 + $0x8] sm:$0xff] %v963_v31  }
 0x17a   :  { %959 = vst [vmem:[%s1299_s7] sm:$0xff] %v958_v32  }

// kernel: ae_forward.21
= control target key start
LH: loop header
LB: loop body
LE: loop exit
PB: predicated region body
PF: predicated region fallthrough
CT: control target
= control target key end

     0   :  { %s3313_s0 = inlined_call_operand.vmem [shape: bf16[128,128], index: 0, kind: input, shape index: {}]   ;;  %s3314_s1 = inlined_call_operand.vmem [shape: f32[1,128], index: 1, kind: input, shape index: {}]   ;;  %s3315_s2 = inlined_call_operand.vmem [shape: bf16[128,32], index: 2, kind: input, shape index: {}]   ;;  %s3316_s3 = inlined_call_operand.<no memory space> [shape: bf16[], index: 3, kind: input, shape index: {}]   ;;  %s3317_s4 = inlined_call_operand.vmem [shape: bf16[128,32], index: 4, kind: input, shape index: {}]   ;;  %s3318_s5 = inlined_call_operand.vmem [shape: bf16[128,32], index: 5, kind: input, shape index: {}]   ;;  %s3319_s6 = inlined_call_operand.vmem [shape: bf16[128,32], index: 6, kind: input, shape index: {}]   ;;  %s3320_s7 = inlined_call_operand.vmem [shape: bf16[128,128], index: 7, kind: output, shape index: {}]  }
   0x1   :  { %v12_v0 = vstv %s3316_s3 }
   0x2   :  { %v2763_v1 = vunpack.i.l.bf16 %v12_v0 }
   0x3   :  { %v140_v2 = vlaneseq  ;;  %v2362_v3 = vld [vmem:[%s3318_s5 + $0x8] sm:$0xff]   ;;  %v189_v4 = vld [vmem:[%s3318_s5] sm:$0xff]   ;;  %s2716_s24 = smov 32   ;;  %s2717_s13 = smov 64  }
   0x4   :  { %v2394_v5 = vld [vmem:[%s3318_s5 + $0x28] sm:$0xff]   ;;  %v423_v6 = vunpack.c.l.bf16 %v2362_v3  ;;  %v541_v7 = vunpack.c.h.bf16 %v2362_v3  ;;  %v190_v8 = vunpack.c.l.bf16 %v189_v4  ;;  %v2386_v9 = vld [vmem:[%s3318_s5 + $0x20] sm:$0xff]   ;;  %v305_v13 = vunpack.c.h.bf16 %v189_v4  ;;  %s2718_s26 = smov 96  }
   0x5   :  { %v2385_v10 = vld [vmem:[%s3317_s4 + $0x20] sm:$0xff]   ;;  %v2783_v12 = vand.u32 127, %v140_v2  ;;  %v1367_v14 = vunpack.c.l.bf16 %v2394_v5  ;;  %v1485_v15 = vunpack.c.h.bf16 %v2394_v5  ;;  %v2393_v16 = vld [vmem:[%s3317_s4 + $0x28] sm:$0xff]   ;;  %v1131_v18 = vunpack.c.l.bf16 %v2386_v9 }
   0x6   :  { %v163_v11 = vld [vmem:[%s3317_s4] sm:$0xff]   ;;  %v2791_v17 = vld [vmem:[%s3317_s4 + $0x8] sm:$0xff]   ;;  %v1249_v19 = vunpack.c.h.bf16 %v2386_v9  ;;  %v1103_v20 = vunpack.c.l.bf16 %v2385_v10  ;;  %v1221_v21 = vunpack.c.h.bf16 %v2385_v10  ;;  %v1339_v26 = vunpack.c.l.bf16 %v2393_v16 }
   0x7   :  { %v2796_v22 = vld [vmem:[%s3315_s2 + $0x20] sm:$0xff]   ;;  %v2799_v23 = vadd.s32 128, %v2783_v12  ;;  %vm199_vm0 = vcmp.lt.s32.totalorder %v2783_v12, 96  ;;  %vm173_vm1 = vcmp.lt.s32.totalorder %v2783_v12, 64  ;;  %v164_v24 = vunpack.c.l.bf16 %v163_v11  ;;  %v2701_v62 = vld [vmem:[%s3313_s0 + $0x8] sm:$0xff]  }
   0x8   :  { %v277_v25 = vunpack.c.h.bf16 %v163_v11  ;;  %v1457_v27 = vunpack.c.h.bf16 %v2393_v16  ;;  %v395_v28 = vunpack.c.l.bf16 %v2791_v17  ;;  %vm147_vm3 = vcmp.lt.s32.totalorder %v2783_v12, 32  ;;  %v137_v40 = vld [vmem:[%s3315_s2] sm:$0xff]  }
   0x9   :  { %vm143_vm2 = vcmp.lt.s32.totalorder %v2799_v23, 160  ;;  %v513_v29 = vunpack.c.h.bf16 %v2791_v17  ;;  %v1075_v30 = vunpack.c.l.bf16 %v2796_v22  ;;  %v1193_v31 = vunpack.c.h.bf16 %v2796_v22  ;;  %v2700_v49 = vld [vmem:[%s3313_s0] sm:$0xff]  }
   0xa   :  { %v430_v32 = vsel %vm143_vm2, %v423_v6, %v2763_v1  ;;  %v548_v33 = vsel %vm143_vm2, %v541_v7, %v2763_v1  ;;  %v196_v34 = vsel %vm143_vm2, %v190_v8, %v2763_v1  ;;  %v312_v35 = vsel %vm143_vm2, %v305_v13, %v2763_v1  ;;  %2528 = vmatprep.subr.bf16.mxu0 %v2700_v49  ;;  %v2392_v13 = vld [vmem:[%s3315_s2 + $0x28] sm:$0xff]  }
   0xb   :  { %v434_v36 = vsel %vm199_vm0, %v430_v32, %v2763_v1  ;;  %v552_v37 = vsel %vm199_vm0, %v548_v33, %v2763_v1  ;;  %v200_v38 = vsel %vm199_vm0, %v196_v34, %v2763_v1  ;;  %v316_v39 = vsel %vm199_vm0, %v312_v35, %v2763_v1  ;;  %2560 = vmatprep.subr.bf16.mxu1 %v2700_v49 }
   0xc   :  { %v2590_v41 = vpack.i.bf16 %v552_v37, %v434_v36  ;;  %v2580_v42 = vpack.i.bf16 %v316_v39, %v200_v38  ;;  %v1374_v43 = vsel %vm143_vm2, %v1367_v14, %v2763_v1  ;;  %v1492_v44 = vsel %vm143_vm2, %v1485_v15, %v2763_v1  ;;  %2529 = vmatpush3.bf16.msra.mxu0 %v2700_v49 }
   0xd   :  { %v1378_v45 = vsel %vm199_vm0, %v1374_v43, %v2763_v1  ;;  %v1496_v46 = vsel %vm199_vm0, %v1492_v44, %v2763_v1  ;;  %v1138_v47 = vsel %vm143_vm2, %v1131_v18, %v2763_v1  ;;  %v1256_v48 = vsel %vm143_vm2, %v1249_v19, %v2763_v1  ;;  %2568 = vmatpush3.bf16.msra.mxu1 %v2700_v49  ;;  %v2360_v18 = vld [vmem:[%s3315_s2 + $0x8] sm:$0xff]   ;;  %v2702_v19 = vld [vmem:[%s3313_s0 + $0x10] sm:$0xff]   ;;  %v2703_v43 = vld [vmem:[%s3313_s0 + $0x18] sm:$0xff]  }
   0xe   :  { %2591 = vrot.lane.b32.xlu1 %v2590_v41, %s2716_s24  ;;  %2581 = vrot.lane.b32.xlu0 %v2580_v42, %s2716_s24  ;;  %v2595_v50 = vpack.i.bf16 %v1496_v46, %v1378_v45  ;;  %v1142_v51 = vsel %vm199_vm0, %v1138_v47, %v2763_v1  ;;  %v1260_v52 = vsel %vm199_vm0, %v1256_v48, %v2763_v1  ;;  %v138_v53 = vunpack.c.l.bf16 %v137_v40  ;;  %v2410_v48 = vld [vmem:[%s3318_s5 + $0x38] sm:$0xff]  }
   0xf   :  { %v2585_v54 = vpack.i.bf16 %v1260_v52, %v1142_v51  ;;  %v1110_v55 = vsel %vm143_vm2, %v1103_v20, %v2763_v1  ;;  %v1228_v56 = vsel %vm143_vm2, %v1221_v21, %v2763_v1  ;;  %v170_v57 = vsel %vm143_vm2, %v164_v24, %v2763_v1  ;;  %2530 = vmatprep.subr.bf16.mxu0 %v2701_v62  ;;  %v2378_v51 = vld [vmem:[%s3318_s5 + $0x18] sm:$0xff]  }
  0x10   :  { %v1114_v58 = vsel %vm173_vm1, %v1110_v55, %v2763_v1  ;;  %v1232_v59 = vsel %vm173_vm1, %v1228_v56, %v2763_v1  ;;  %v174_v60 = vsel %vm173_vm1, %v170_v57, %v2763_v1  ;;  %v284_v61 = vsel %vm143_vm2, %v277_v25, %v2763_v1  ;;  %v2402_v25 = vld [vmem:[%s3318_s5 + $0x30] sm:$0xff]   ;;  %2561 = vmatprep.subr.bf16.mxu1 %v2701_v62 }
  0x11   :  { %v2605_v63 = vpack.i.bf16 %v1232_v59, %v1114_v58  ;;  %v288_v0 = vsel %vm173_vm1, %v284_v61, %v2763_v1  ;;  %v1346_v2 = vsel %vm143_vm2, %v1339_v26, %v2763_v1  ;;  %v1464_v3 = vsel %vm143_vm2, %v1457_v27, %v2763_v1  ;;  %v2370_v26 = vld [vmem:[%s3318_s5 + $0x10] sm:$0xff]   ;;  %2531 = vmatpush3.bf16.msra.mxu0 %v2701_v62 }
  0x12   :  { %2596 = vrot.lane.b32.xlu1 %v2595_v50, %s2716_s24  ;;  %2586 = vrot.lane.b32.xlu0 %v2585_v54, %s2716_s24  ;;  %v2600_v4 = vpack.i.bf16 %v288_v0, %v174_v60  ;;  %v1350_v5 = vsel %vm173_vm1, %v1346_v2, %v2763_v1  ;;  %v1468_v6 = vsel %vm173_vm1, %v1464_v3, %v2763_v1  ;;  %v249_v7 = vunpack.c.h.bf16 %v137_v40  ;;  %v2401_v56 = vld [vmem:[%s3317_s4 + $0x30] sm:$0xff]  }
  0x13   :  { %v2615_v8 = vpack.i.bf16 %v1468_v6, %v1350_v5  ;;  %v402_v9 = vsel %vm143_vm2, %v395_v28, %v2763_v1  ;;  %v520_v10 = vsel %vm143_vm2, %v513_v29, %v2763_v1  ;;  %v1082_v11 = vsel %vm143_vm2, %v1075_v30, %v2763_v1  ;;  %2569 = vmatpush3.bf16.msra.mxu1 %v2701_v62  ;;  %v2369_v57 = vld [vmem:[%s3317_s4 + $0x10] sm:$0xff]   ;;  %v2704_v62 = vld [vmem:[%s3313_s0 + $0x20] sm:$0xff]  }
  0x14   :  { %v406_v14 = vsel %vm173_vm1, %v402_v9, %v2763_v1  ;;  %v524_v15 = vsel %vm173_vm1, %v520_v10, %v2763_v1  ;;  %v1086_v16 = vsel %vm147_vm3, %v1082_v11, %v2763_v1  ;;  %v1200_v17 = vsel %vm143_vm2, %v1193_v31, %v2763_v1  ;;  %2532 = vmatprep.subr.bf16.mxu0 %v2702_v19  ;;  %v2409_v11 = vld [vmem:[%s3317_s4 + $0x38] sm:$0xff]  }
  0x15   :  { %v2610_v20 = vpack.i.bf16 %v524_v15, %v406_v14  ;;  %v1204_v21 = vsel %vm147_vm3, %v1200_v17, %v2763_v1  ;;  %v144_v22 = vsel %vm143_vm2, %v138_v53, %v2763_v1  ;;  %v256_v24 = vsel %vm143_vm2, %v249_v7, %v2763_v1  ;;  %2562 = vmatprep.subr.bf16.mxu1 %v2702_v19 }
  0x16   :  { %2606 = vrot.lane.b32.xlu1 %v2605_v63, %s2717_s13  ;;  %2601 = vrot.lane.b32.xlu0 %v2600_v4, %s2717_s13  ;;  %v2625_v27 = vpack.i.bf16 %v1204_v21, %v1086_v16  ;;  %v148_v28 = vsel %vm147_vm3, %v144_v22, %v2763_v1  ;;  %v260_v29 = vsel %vm147_vm3, %v256_v24, %v2763_v1  ;;  %v1311_v30 = vunpack.c.l.bf16 %v2392_v13 }
  0x17   :  { %v2620_v31 = vpack.i.bf16 %v260_v29, %v148_v28  ;;  %v1429_v32 = vunpack.c.h.bf16 %v2392_v13  ;;  %v367_v33 = vunpack.c.l.bf16 %v2360_v18  ;;  %v485_v34 = vunpack.c.h.bf16 %v2360_v18  ;;  %2533 = vmatpush3.bf16.msra.mxu0 %v2702_v19  ;;  %2570 = vmatpush3.bf16.msra.mxu1 %v2702_v19  ;;  %v2705_v13 = vld [vmem:[%s3313_s0 + $0x28] sm:$0xff]   ;;  %v2377_v18 = vld [vmem:[%s3317_s4 + $0x18] sm:$0xff]  }
  0x18   :  { %v1318_v35 = vsel %vm143_vm2, %v1311_v30, %v2763_v1  ;;  %v1603_v36 = vunpack.c.l.bf16 %v2402_v25  ;;  %v1721_v37 = vunpack.c.h.bf16 %v2402_v25  ;;  %v659_v38 = vunpack.c.l.bf16 %v2370_v26  ;;  %2534 = vmatprep.subr.bf16.mxu0 %v2703_v43  ;;  %2563 = vmatprep.subr.bf16.mxu1 %v2703_v43  ;;  %v2400_v30 = vld [vmem:[%s3315_s2 + $0x30] sm:$0xff]  }
  0x19   :  { %v1322_v39 = vsel %vm147_vm3, %v1318_v35, %v2763_v1  ;;  %v1436_v40 = vsel %vm143_vm2, %v1429_v32, %v2763_v1  ;;  %v374_v41 = vsel %vm143_vm2, %v367_v33, %v2763_v1  ;;  %v492_v42 = vsel %vm143_vm2, %v485_v34, %v2763_v1  ;;  %v2368_v35 = vld [vmem:[%s3315_s2 + $0x10] sm:$0xff]  }
  0x1a   :  { %2616 = vrot.lane.b32.xlu1 %v2615_v8, %s2717_s13  ;;  %2611 = vrot.lane.b32.xlu0 %v2610_v20, %s2717_s13  ;;  %v1440_v44 = vsel %vm147_vm3, %v1436_v40, %v2763_v1  ;;  %v378_v45 = vsel %vm147_vm3, %v374_v41, %v2763_v1  ;;  %v496_v46 = vsel %vm147_vm3, %v492_v42, %v2763_v1  ;;  %v777_v47 = vunpack.c.h.bf16 %v2370_v26 }
  0x1b   :  { %v1610_v49 = vsel %vm143_vm2, %v1603_v36, %v2763_v1  ;;  %v1728_v50 = vsel %vm143_vm2, %v1721_v37, %v2763_v1  ;;  %v2635_v52 = vpack.i.bf16 %v1440_v44, %v1322_v39  ;;  %v2630_v53 = vpack.i.bf16 %v496_v46, %v378_v45  ;;  %2535 = vmatpush3.bf16.msra.mxu0 %v2703_v43 }
  0x1c   :  { %v666_v54 = vsel %vm143_vm2, %v659_v38, %v2763_v1  ;;  %v784_v55 = vsel %vm143_vm2, %v777_v47, %v2763_v1  ;;  %v1614_v58 = vsel %vm199_vm0, %v1610_v49, %v2763_v1  ;;  %v1732_v59 = vsel %vm199_vm0, %v1728_v50, %v2763_v1  ;;  %2571 = vmatpush3.bf16.msra.mxu1 %v2703_v43  ;;  %v2408_v49 = vld [vmem:[%s3315_s2 + $0x38] sm:$0xff]  }
  0x1d   :  { %v670_v60 = vsel %vm199_vm0, %v666_v54, %v2763_v1  ;;  %v1839_v61 = vunpack.c.l.bf16 %v2410_v48  ;;  %v788_v63 = vsel %vm199_vm0, %v784_v55, %v2763_v1  ;;  %v1957_v0 = vunpack.c.h.bf16 %v2410_v48  ;;  %2536 = vmatprep.subr.bf16.mxu0 %v2704_v62  ;;  %2564 = vmatprep.subr.bf16.mxu1 %v2704_v62  ;;  %v2707_v50 = vld [vmem:[%s3313_s0 + $0x38] sm:$0xff]  }
  0x1e   :  { %2626 = vrot.lane.b32.xlu1 %v2625_v27, %s2718_s26  ;;  %2621 = vrot.lane.b32.xlu0 %v2620_v31, %s2718_s26  ;;  %v895_v2 = vunpack.c.l.bf16 %v2378_v51  ;;  %v1013_v3 = vunpack.c.h.bf16 %v2378_v51  ;;  %v1575_v5 = vunpack.c.l.bf16 %v2401_v56  ;;  %v1693_v6 = vunpack.c.h.bf16 %v2401_v56  ;;  %v2706_v31 = vld [vmem:[%s3313_s0 + $0x30] sm:$0xff]   ;;  %v2376_v54 = vld [vmem:[%s3315_s2 + $0x18] sm:$0xff]  }
  0x1f   :  { %v1846_v4 = vsel %vm143_vm2, %v1839_v61, %v2763_v1  ;;  %v631_v7 = vunpack.c.l.bf16 %v2369_v57  ;;  %v1964_v8 = vsel %vm143_vm2, %v1957_v0, %v2763_v1  ;;  %v2645_v14 = vpack.i.bf16 %v1732_v59, %v1614_v58  ;;  %2537 = vmatpush3.bf16.msra.mxu0 %v2704_v62 }
  0x20   :  { %v902_v9 = vsel %vm143_vm2, %v895_v2, %v2763_v1  ;;  %v1020_v10 = vsel %vm143_vm2, %v1013_v3, %v2763_v1  ;;  %v2640_v15 = vpack.i.bf16 %v788_v63, %v670_v60  ;;  %v1850_v16 = vsel %vm199_vm0, %v1846_v4, %v2763_v1  ;;  %2572 = vmatpush3.bf16.msra.mxu1 %v2704_v62 }
  0x21   :  { %v1968_v17 = vsel %vm199_vm0, %v1964_v8, %v2763_v1  ;;  %v906_v19 = vsel %vm199_vm0, %v902_v9, %v2763_v1  ;;  %v1024_v20 = vsel %vm199_vm0, %v1020_v10, %v2763_v1  ;;  %v1582_v21 = vsel %vm143_vm2, %v1575_v5, %v2763_v1  ;;  %2538 = vmatprep.subr.bf16.mxu0 %v2705_v13 }
  0x22   :  { %2636 = vrot.lane.b32.xlu1 %v2635_v52, %s2718_s26  ;;  %2631 = vrot.lane.b32.xlu0 %v2630_v53, %s2718_s26  ;;  %v749_v22 = vunpack.c.h.bf16 %v2369_v57  ;;  %v1700_v24 = vsel %vm143_vm2, %v1693_v6, %v2763_v1  ;;  %v638_v25 = vsel %vm143_vm2, %v631_v7, %v2763_v1  ;;  %v1811_v26 = vunpack.c.l.bf16 %v2409_v11 }
  0x23   :  { %v1929_v27 = vunpack.c.h.bf16 %v2409_v11  ;;  %v867_v29 = vunpack.c.l.bf16 %v2377_v18  ;;  %v2655_v32 = vpack.i.bf16 %v1968_v17, %v1850_v16  ;;  %v2650_v33 = vpack.i.bf16 %v1024_v20, %v906_v19  ;;  %2565 = vmatprep.subr.bf16.mxu1 %v2705_v13  ;;  %2539 = vmatpush3.bf16.msra.mxu0 %v2705_v13 }
  0x24   :  { %v756_v28 = vsel %vm143_vm2, %v749_v22, %v2763_v1  ;;  %v1586_v34 = vsel %vm173_vm1, %v1582_v21, %v2763_v1  ;;  %v1704_v36 = vsel %vm173_vm1, %v1700_v24, %v2763_v1  ;;  %v642_v37 = vsel %vm173_vm1, %v638_v25, %v2763_v1  ;;  %2573 = vmatpush3.bf16.msra.mxu1 %v2705_v13  ;;  %v2363_v22 = vld [vmem:[%s3319_s6 + $0x8] sm:$0xff]   ;;  %v212_v24 = vld [vmem:[%s3319_s6] sm:$0xff]  }
  0x25   :  { %v760_v38 = vsel %vm173_vm1, %v756_v28, %v2763_v1  ;;  %v985_v39 = vunpack.c.h.bf16 %v2377_v18  ;;  %v1818_v40 = vsel %vm143_vm2, %v1811_v26, %v2763_v1  ;;  %v1936_v41 = vsel %vm143_vm2, %v1929_v27, %v2763_v1  ;;  %2540 = vmatprep.subr.bf16.mxu0 %v2706_v31  ;;  %2566 = vmatprep.subr.bf16.mxu1 %v2706_v31  ;;  %v2387_v25 = vld [vmem:[%s3319_s6 + $0x20] sm:$0xff]  }
  0x26   :  { %2646 = vrot.lane.b32.xlu1 %v2645_v14, %s2716_s24  ;;  %2641 = vrot.lane.b32.xlu0 %v2640_v15, %s2716_s24  ;;  %v1547_v42 = vunpack.c.l.bf16 %v2400_v30  ;;  %v1665_v43 = vunpack.c.h.bf16 %v2400_v30  ;;  %v874_v44 = vsel %vm143_vm2, %v867_v29, %v2763_v1  ;;  %v603_v46 = vunpack.c.l.bf16 %v2368_v35  ;;  %v2395_v29 = vld [vmem:[%s3319_s6 + $0x28] sm:$0xff]  }
  0x27   :  { %v992_v45 = vsel %vm143_vm2, %v985_v39, %v2763_v1  ;;  %v721_v47 = vunpack.c.h.bf16 %v2368_v35  ;;  %v2665_v48 = vpack.i.bf16 %v1704_v36, %v1586_v34  ;;  %v2660_v51 = vpack.i.bf16 %v760_v38, %v642_v37  ;;  %2541 = vmatpush3.bf16.msra.mxu0 %v2706_v31 }
  0x28   :  { %v1822_v52 = vsel %vm173_vm1, %v1818_v40, %v2763_v1  ;;  %v1940_v53 = vsel %vm173_vm1, %v1936_v41, %v2763_v1  ;;  %v878_v55 = vsel %vm173_vm1, %v874_v44, %v2763_v1  ;;  %v996_v56 = vsel %vm173_vm1, %v992_v45, %v2763_v1  ;;  %2574 = vmatpush3.bf16.msra.mxu1 %v2706_v31 }
  0x29   :  { %v1554_v57 = vsel %vm143_vm2, %v1547_v42, %v2763_v1  ;;  %v1672_v58 = vsel %vm143_vm2, %v1665_v43, %v2763_v1  ;;  %v610_v59 = vsel %vm143_vm2, %v603_v46, %v2763_v1  ;;  %v728_v60 = vsel %vm143_vm2, %v721_v47, %v2763_v1  ;;  %2542 = vmatprep.subr.bf16.mxu0 %v2707_v50 }
  0x2a   :  { %2656 = vrot.lane.b32.xlu1 %v2655_v32, %s2716_s24  ;;  %2651 = vrot.lane.b32.xlu0 %v2650_v33, %s2716_s24  ;;  %v1783_v61 = vunpack.c.l.bf16 %v2408_v49  ;;  %v1901_v62 = vunpack.c.h.bf16 %v2408_v49  ;;  %v839_v63 = vunpack.c.l.bf16 %v2376_v54  ;;  %v957_v0 = vunpack.c.h.bf16 %v2376_v54 }
  0x2b   :  { %2567 = vmatprep.subr.bf16.mxu1 %v2707_v50  ;;  %v2675_v2 = vpack.i.bf16 %v1940_v53, %v1822_v52  ;;  %v2670_v3 = vpack.i.bf16 %v996_v56, %v878_v55  ;;  %v1558_v4 = vsel %vm147_vm3, %v1554_v57, %v2763_v1  ;;  %v1676_v5 = vsel %vm147_vm3, %v1672_v58, %v2763_v1 }
  0x2c   :  { %v614_v6 = vsel %vm147_vm3, %v610_v59, %v2763_v1  ;;  %v732_v7 = vsel %vm147_vm3, %v728_v60, %v2763_v1  ;;  %2543 = vmatpush3.bf16.msra.mxu0 %v2707_v50  ;;  %v1790_v8 = vsel %vm143_vm2, %v1783_v61, %v2763_v1  ;;  %v1908_v9 = vsel %vm143_vm2, %v1901_v62, %v2763_v1 }
  0x2d   :  { %v846_v10 = vsel %vm143_vm2, %v839_v63, %v2763_v1  ;;  %v964_v11 = vsel %vm143_vm2, %v957_v0, %v2763_v1  ;;  %2575 = vmatpush3.bf16.msra.mxu1 %v2707_v50  ;;  %v2685_v13 = vpack.i.bf16 %v1676_v5, %v1558_v4  ;;  %v2680_v14 = vpack.i.bf16 %v732_v7, %v614_v6 }
  0x2e   :  { %2666 = vrot.lane.b32.xlu1 %v2665_v48, %s2717_s13  ;;  %2661 = vrot.lane.b32.xlu0 %v2660_v51, %s2717_s13  ;;  %v1794_v15 = vsel %vm147_vm3, %v1790_v8, %v2763_v1  ;;  %v1912_v16 = vsel %vm147_vm3, %v1908_v9, %v2763_v1  ;;  %v850_v23 = vsel %vm147_vm3, %v846_v10, %v2763_v1  ;;  %v448_v26 = vunpack.c.l.bf16 %v2363_v22 }
  0x2f   :  { %v968_v17 = vsel %vm147_vm3, %v964_v11, %v2763_v1  ;;  %v2695_v18 = vpack.i.bf16 %v1912_v16, %v1794_v15  ;;  %v213_v30 = vunpack.c.l.bf16 %v212_v24  ;;  %v330_v31 = vunpack.c.h.bf16 %v212_v24 }
  0x30   :  { %v2690_v19 = vpack.i.bf16 %v968_v17, %v850_v23  ;;  %v1156_v32 = vunpack.c.l.bf16 %v2387_v25  ;;  %v1274_v33 = vunpack.c.h.bf16 %v2387_v25  ;;  %v454_v34 = vsel %vm147_vm3, %v448_v26, %v2763_v1 }
  0x31   :  { %v566_v35 = vunpack.c.h.bf16 %v2363_v22  ;;  %v1392_v36 = vunpack.c.l.bf16 %v2395_v29  ;;  %v1510_v37 = vunpack.c.h.bf16 %v2395_v29  ;;  %v219_v44 = vsel %vm147_vm3, %v213_v30, %v2763_v1 }
  0x32   :  { %2676 = vrot.lane.b32.xlu1 %v2675_v2, %s2717_s13  ;;  %2671 = vrot.lane.b32.xlu0 %v2670_v3, %s2717_s13  ;;  %v336_v45 = vsel %vm147_vm3, %v330_v31, %v2763_v1  ;;  %v1162_v46 = vsel %vm147_vm3, %v1156_v32, %v2763_v1  ;;  %v1280_v47 = vsel %vm147_vm3, %v1274_v33, %v2763_v1  ;;  %v2719_v31 = vmov 0.0  }
  0x33   :  { %v572_v52 = vsel %vm147_vm3, %v566_v35, %v2763_v1  ;;  %v1398_v53 = vsel %vm147_vm3, %v1392_v36, %v2763_v1  ;;  %v1516_v54 = vsel %vm147_vm3, %v1510_v37, %v2763_v1 }
  0x36   :  { %2686 = vrot.lane.b32.xlu1 %v2685_v13, %s2718_s26  ;;  %2681 = vrot.lane.b32.xlu0 %v2680_v14, %s2718_s26 }
  0x3a   :  { %2696 = vrot.lane.b32.xlu1 %v2695_v18, %s2718_s26  ;;  %2691 = vrot.lane.b32.xlu0 %v2690_v19, %s2718_s26 }
  0x80   :  { %v2592_v20 = vpop.permute.xlu1 %2591  ;;  %v2582_v21 = vpop.permute.xlu0 %2581 }
  0x81   :  { %v2584_v40 = vunpack.i.h.bf16 %v2582_v21  ;;  %v2583_v41 = vunpack.i.l.bf16 %v2582_v21  ;;  %v2594_v61 = vunpack.i.h.bf16 %v2592_v20  ;;  %v2593_v62 = vunpack.i.l.bf16 %v2592_v20 }
  0x83   :  { %v339_v57 = vmax.f32 %v336_v45, %v2584_v40  ;;  %v222_v58 = vmax.f32 %v219_v44, %v2583_v41  ;;  %v575_v23 = vmax.f32 %v572_v52, %v2594_v61  ;;  %v457_v17 = vmax.f32 %v454_v34, %v2593_v62 }
  0x84   :  { %v2597_v27 = vpop.permute.xlu1 %2596  ;;  %v2587_v28 = vpop.permute.xlu0 %2586 }
  0x85   :  { %v2589_v42 = vunpack.i.h.bf16 %v2587_v28  ;;  %v2588_v43 = vunpack.i.l.bf16 %v2587_v28  ;;  %v2599_v63 = vunpack.i.h.bf16 %v2597_v27  ;;  %v2598_v0 = vunpack.i.l.bf16 %v2597_v27 }
  0x87   :  { %v1283_v59 = vmax.f32 %v1280_v47, %v2589_v42  ;;  %v1165_v60 = vmax.f32 %v1162_v46, %v2588_v43  ;;  %v1519_v18 = vmax.f32 %v1516_v54, %v2599_v63  ;;  %v1401_v19 = vmax.f32 %v1398_v53, %v2598_v0  ;;  %v2411_v54 = vld [vmem:[%s3319_s6 + $0x38] sm:$0xff]  }
  0x88   :  { %v2607_v38 = vpop.permute.xlu1 %2606  ;;  %v2602_v39 = vpop.permute.xlu0 %2601  ;;  %v1864_v62 = vunpack.c.l.bf16 %v2411_v54  ;;  %v1982_v63 = vunpack.c.h.bf16 %v2411_v54 }
  0x89   :  { %v2609_v48 = vunpack.i.h.bf16 %v2607_v38  ;;  %v2608_v49 = vunpack.i.l.bf16 %v2607_v38  ;;  %v2604_v50 = vunpack.i.h.bf16 %v2602_v39  ;;  %v2603_v51 = vunpack.i.l.bf16 %v2602_v39 }
  0x8b   :  { %v1169_v2 = vmax.f32 %v1165_v60, %v2608_v49  ;;  %v1287_v3 = vmax.f32 %v1283_v59, %v2609_v48  ;;  %v343_v4 = vmax.f32 %v339_v57, %v2604_v50  ;;  %v226_v5 = vmax.f32 %v222_v58, %v2603_v51  ;;  %v2403_v50 = vld [vmem:[%s3319_s6 + $0x30] sm:$0xff]  }
  0x8c   :  { %v2617_v55 = vpop.permute.xlu1 %2616  ;;  %v2612_v56 = vpop.permute.xlu0 %2611  ;;  %v2371_v51 = vld [vmem:[%s3319_s6 + $0x10] sm:$0xff]   ;;  %v1746_v57 = vunpack.c.h.bf16 %v2403_v50 }
  0x8d   :  { %v2619_v6 = vunpack.i.h.bf16 %v2617_v55  ;;  %v2618_v7 = vunpack.i.l.bf16 %v2617_v55  ;;  %v2614_v8 = vunpack.i.h.bf16 %v2612_v56  ;;  %v2613_v9 = vunpack.i.l.bf16 %v2612_v56  ;;  %v2379_v55 = vld [vmem:[%s3319_s6 + $0x18] sm:$0xff]  }
  0x8e   :  { %v1628_v56 = vunpack.c.l.bf16 %v2403_v50  ;;  %v684_v58 = vunpack.c.l.bf16 %v2371_v51  ;;  %v802_v59 = vunpack.c.h.bf16 %v2371_v51  ;;  %v920_v0 = vunpack.c.l.bf16 %v2379_v55 }
  0x8f   :  { %v1405_v25 = vmax.f32 %v1401_v19, %v2618_v7  ;;  %v1523_v26 = vmax.f32 %v1519_v18, %v2619_v6  ;;  %v579_v27 = vmax.f32 %v575_v23, %v2614_v8  ;;  %v461_v28 = vmax.f32 %v457_v17, %v2613_v9 }
  0x90   :  { %v2627_v10 = vpop.permute.xlu1 %2626  ;;  %v2622_v11 = vpop.permute.xlu0 %2621  ;;  %v1634_v9 = vsel %vm147_vm3, %v1628_v56, %v2763_v1  ;;  %v1870_v18 = vsel %vm147_vm3, %v1864_v62, %v2763_v1  ;;  %v1988_v19 = vsel %vm147_vm3, %v1982_v63, %v2763_v1 }
  0x91   :  { %v2629_v13 = vunpack.i.h.bf16 %v2627_v10  ;;  %v2628_v14 = vunpack.i.l.bf16 %v2627_v10  ;;  %v2624_v15 = vunpack.i.h.bf16 %v2622_v11  ;;  %v2623_v16 = vunpack.i.l.bf16 %v2622_v11 }
  0x92   :  { %v1752_v10 = vsel %vm147_vm3, %v1746_v57, %v2763_v1  ;;  %v690_v11 = vsel %vm147_vm3, %v684_v58, %v2763_v1 }
  0x93   :  { %v1173_v20 = vmax.f32 %v1169_v2, %v2628_v14  ;;  %v1291_v21 = vmax.f32 %v1287_v3, %v2629_v13  ;;  %v347_v22 = vmax.f32 %v343_v4, %v2624_v15  ;;  %v230_v24 = vmax.f32 %v226_v5, %v2623_v16 }
  0x94   :  { %v2637_v29 = vpop.permute.xlu1 %2636  ;;  %v2632_v30 = vpop.permute.xlu0 %2631  ;;  %v1038_v2 = vunpack.c.h.bf16 %v2379_v55  ;;  %v808_v13 = vsel %vm147_vm3, %v802_v59, %v2763_v1 }
  0x95   :  { %v1176_v32 = vpack.c.bf16 %v2719_v31, %v1173_v20  ;;  %v1294_v33 = vpack.c.bf16 %v2719_v31, %v1291_v21  ;;  %v350_v35 = vpack.c.bf16 %v2719_v31, %v347_v22  ;;  %v232_v34 = vpack.c.bf16 %v2719_v31, %v230_v24 }
  0x96   :  { %v2639_v36 = vunpack.i.h.bf16 %v2637_v29  ;;  %v2638_v37 = vunpack.i.l.bf16 %v2637_v29  ;;  %v2634_v38 = vunpack.i.h.bf16 %v2632_v30  ;;  %v2633_v39 = vunpack.i.l.bf16 %v2632_v30 }
  0x97   :  { %1178 = vst [vmem:[#allocation22 + $0x20] sm:$0xf] %v1176_v32  ;;  %1296 = vst [vmem:[#allocation22 + $0x24] sm:$0xf] %v1294_v33  ;;  %v926_v20 = vsel %vm147_vm3, %v920_v0, %v2763_v1  ;;  %v1044_v21 = vsel %vm147_vm3, %v1038_v2, %v2763_v1 }
  0x98   :  { %352 = vst [vmem:[#allocation22 + $0x4] sm:$0xf] %v350_v35  ;;  %234 = vst [vmem:[#allocation22] sm:$0xf] %v232_v34  ;;  %v1409_v40 = vmax.f32 %v1405_v25, %v2638_v37  ;;  %v1527_v41 = vmax.f32 %v1523_v26, %v2639_v36  ;;  %v583_v42 = vmax.f32 %v579_v27, %v2634_v38  ;;  %v2647_v44 = vpop.permute.xlu1 %2646  ;;  %v2642_v45 = vpop.permute.xlu0 %2641 }
  0x99   :  { %v465_v43 = vmax.f32 %v461_v28, %v2633_v39  ;;  %v2649_v5 = vunpack.i.h.bf16 %v2647_v44  ;;  %v2648_v6 = vunpack.i.l.bf16 %v2647_v44  ;;  %v2644_v7 = vunpack.i.h.bf16 %v2642_v45 }
  0x9a   :  { %v1412_v46 = vpack.c.bf16 %v2719_v31, %v1409_v40  ;;  %v1530_v47 = vpack.c.bf16 %v2719_v31, %v1527_v41  ;;  %v586_v48 = vpack.c.bf16 %v2719_v31, %v583_v42  ;;  %v2643_v8 = vunpack.i.l.bf16 %v2642_v45 }
  0x9b   :  { %v468_v49 = vpack.c.bf16 %v2719_v31, %v465_v43  ;;  %v1755_v26 = vmax.f32 %v1752_v10, %v2649_v5  ;;  %v1637_v27 = vmax.f32 %v1634_v9, %v2648_v6  ;;  %v811_v28 = vmax.f32 %v808_v13, %v2644_v7 }
  0x9c   :  { %1414 = vst [vmem:[#allocation22 + $0x28] sm:$0xf] %v1412_v46  ;;  %1532 = vst [vmem:[#allocation22 + $0x2c] sm:$0xf] %v1530_v47  ;;  %v3240_v52 = vpop.permute.xlu1 %2656  ;;  %v3242_v53 = vpop.permute.xlu0 %2651  ;;  %v693_v29 = vmax.f32 %v690_v11, %v2643_v8 }
  0x9d   :  { %588 = vst [vmem:[#allocation22 + $0xc] sm:$0xf] %v586_v48  ;;  %470 = vst [vmem:[#allocation22 + $0x8] sm:$0xf] %v468_v49  ;;  %v2659_v30 = vunpack.i.h.bf16 %v3240_v52  ;;  %v2658_v32 = vunpack.i.l.bf16 %v3240_v52  ;;  %v2654_v33 = vunpack.i.h.bf16 %v3242_v53  ;;  %v2653_v35 = vunpack.i.l.bf16 %v3242_v53 }
  0x9e   :  { %v2709_v61 = vld [vmem:[#allocation22 + $0x20] sm:$0xff]  }
  0x9f   :  { %v2708_v60 = vld [vmem:[#allocation22] sm:$0xff]   ;;  %2552 = vmatprep.mubr.bf16.mxu1 %v2709_v61  ;;  %v1991_v47 = vmax.f32 %v1988_v19, %v2659_v30  ;;  %v1873_v48 = vmax.f32 %v1870_v18, %v2658_v32  ;;  %v1047_v49 = vmax.f32 %v1044_v21, %v2654_v33  ;;  %v929_v50 = vmax.f32 %v926_v20, %v2653_v35 }
  0xa0   :  { %v2667_v3 = vpop.permute.xlu1 %2666  ;;  %v2662_v4 = vpop.permute.xlu0 %2661  ;;  %2544 = vmatprep.mubr.bf16.mxu0 %v2708_v60  ;;  %v2416_v18 = vld [vmem:[%s3314_s1] ss:$0 sm:$0xff] }
  0xa1   :  { %v2669_v14 = vunpack.i.h.bf16 %v2667_v3  ;;  %v2668_v15 = vunpack.i.l.bf16 %v2667_v3  ;;  %v2664_v16 = vunpack.i.h.bf16 %v2662_v4  ;;  %v2663_v23 = vunpack.i.l.bf16 %v2662_v4 }
  0xa3   :  { %v2711_v25 = vld [vmem:[#allocation22 + $0x28] sm:$0xff]   ;;  %v1641_v34 = vmax.f32 %v1637_v27, %v2668_v15  ;;  %v1759_v12 = vmax.f32 %v1755_v26, %v2669_v14  ;;  %v697_v1 = vmax.f32 %v693_v29, %v2663_v23  ;;  %v815_v36 = vmax.f32 %v811_v28, %v2664_v16 }
  0xa4   :  { %v2710_v17 = vld [vmem:[#allocation22 + $0x8] sm:$0xff]   ;;  %v2677_v22 = vpop.permute.xlu1 %2676  ;;  %v2672_v24 = vpop.permute.xlu0 %2671  ;;  %2553 = vmatmul.mubr.bf16.vlgmr.msra.gmra.mrb[0].mxu1 %v2711_v25 }
  0xa5   :  { %2545 = vmatmul.mubr.bf16.vlgmr.msra.gmra.mrb[0].mxu0 %v2710_v17  ;;  %v2679_v37 = vunpack.i.h.bf16 %v2677_v22  ;;  %v2678_v38 = vunpack.i.l.bf16 %v2677_v22  ;;  %v2674_v39 = vunpack.i.h.bf16 %v2672_v24  ;;  %v2673_v40 = vunpack.i.l.bf16 %v2672_v24 }
  0xa7   :  { %v1877_v55 = vmax.f32 %v1873_v48, %v2678_v38  ;;  %v1995_v56 = vmax.f32 %v1991_v47, %v2679_v37  ;;  %v933_v57 = vmax.f32 %v929_v50, %v2673_v40  ;;  %v1051_v58 = vmax.f32 %v1047_v49, %v2674_v39 }
  0xa8   :  { %v2687_v41 = vpop.permute.xlu1 %2686  ;;  %v2682_v42 = vpop.permute.xlu0 %2681 }
  0xa9   :  { %v2689_v43 = vunpack.i.h.bf16 %v2687_v41  ;;  %v2688_v44 = vunpack.i.l.bf16 %v2687_v41  ;;  %v2684_v45 = vunpack.i.h.bf16 %v2682_v42  ;;  %v2683_v46 = vunpack.i.l.bf16 %v2682_v42 }
  0xab   :  { %v1645_v51 = vmax.f32 %v1641_v34, %v2688_v44  ;;  %v1763_v52 = vmax.f32 %v1759_v12, %v2689_v43  ;;  %v701_v53 = vmax.f32 %v697_v1, %v2683_v46  ;;  %v819_v54 = vmax.f32 %v815_v36, %v2684_v45 }
  0xac   :  { %v2697_v59 = vpop.permute.xlu1 %2696  ;;  %v2692_v60 = vpop.permute.xlu0 %2691 }
  0xad   :  { %v1648_v61 = vpack.c.bf16 %v2719_v31, %v1645_v51  ;;  %v1766_v62 = vpack.c.bf16 %v2719_v31, %v1763_v52  ;;  %v704_v63 = vpack.c.bf16 %v2719_v31, %v701_v53  ;;  %v822_v0 = vpack.c.bf16 %v2719_v31, %v819_v54 }
  0xae   :  { %v2699_v2 = vunpack.i.h.bf16 %v2697_v59  ;;  %v2698_v3 = vunpack.i.l.bf16 %v2697_v59  ;;  %v2694_v4 = vunpack.i.h.bf16 %v2692_v60  ;;  %v2693_v5 = vunpack.i.l.bf16 %v2692_v60 }
  0xaf   :  { %1650 = vst [vmem:[#allocation22 + $0x30] sm:$0xf] %v1648_v61  ;;  %1768 = vst [vmem:[#allocation22 + $0x34] sm:$0xf] %v1766_v62 }
  0xb0   :  { %706 = vst [vmem:[#allocation22 + $0x10] sm:$0xf] %v704_v63  ;;  %824 = vst [vmem:[#allocation22 + $0x14] sm:$0xf] %v822_v0  ;;  %v1881_v6 = vmax.f32 %v1877_v55, %v2698_v3  ;;  %v1999_v7 = vmax.f32 %v1995_v56, %v2699_v2  ;;  %v937_v8 = vmax.f32 %v933_v57, %v2693_v5 }
  0xb1   :  { %v1055_v9 = vmax.f32 %v1051_v58, %v2694_v4 }
  0xb2   :  { %v1884_v10 = vpack.c.bf16 %v2719_v31, %v1881_v6  ;;  %v2002_v11 = vpack.c.bf16 %v2719_v31, %v1999_v7  ;;  %v940_v13 = vpack.c.bf16 %v2719_v31, %v937_v8 }
  0xb3   :  { %v1058_v14 = vpack.c.bf16 %v2719_v31, %v1055_v9 }
  0xb4   :  { %1886 = vst [vmem:[#allocation22 + $0x38] sm:$0xf] %v1884_v10  ;;  %2004 = vst [vmem:[#allocation22 + $0x3c] sm:$0xf] %v2002_v11 }
  0xb5   :  { %942 = vst [vmem:[#allocation22 + $0x18] sm:$0xf] %v940_v13  ;;  %1060 = vst [vmem:[#allocation22 + $0x1c] sm:$0xf] %v1058_v14 }
  0xb6   :  { %v2713_v16 = vld [vmem:[#allocation22 + $0x30] sm:$0xff]  }
  0xb7   :  { %v2712_v15 = vld [vmem:[#allocation22 + $0x10] sm:$0xff]   ;;  %2556 = vmatprep.mubr.bf16.mxu1 %v2713_v16 }
  0xb8   :  { %2548 = vmatprep.mubr.bf16.mxu0 %v2712_v15 }
  0xbb   :  { %v2715_v17 = vld [vmem:[#allocation22 + $0x38] sm:$0xff]  }
  0xbc   :  { %v2714_v23 = vld [vmem:[#allocation22 + $0x18] sm:$0xff]   ;;  %2557 = vmatmul.mubr.bf16.gmra.mrb[4].mxu1 %v2715_v17 }
  0xbd   :  { %2549 = vmatmul.mubr.bf16.gmra.mrb[4].mxu0 %v2714_v23 }
 0x177   :  { %v2554_v21 = vpop.f32.mrb[0].mxu1 }
 0x178   :  { %v2546_v19 = vpop.f32.mrb[0].mxu0  ;;  %v2216_v22 = vadd.f32 %v2554_v21, %v2416_v18  ;;  %v2207_v25 = vpop.f32.mrb[1].mxu1 }
 0x179   :  { %v2184_v20 = vadd.f32 %v2546_v19, %v2416_v18  ;;  %v2175_v31 = vpop.f32.mrb[1].mxu0  ;;  %v2208_v27 = vadd.f32 %v2416_v18, %v2207_v25  ;;  %v2555_v29 = vpop.f32.mrb[2].mxu1 }
 0x17a   :  { %v2176_v24 = vadd.f32 %v2416_v18, %v2175_v31  ;;  %v2547_v26 = vpop.f32.mrb[2].mxu0  ;;  %v2219_v32 = vadd.f32 %v2555_v29, %v2416_v18  ;;  %v2210_v35 = vpop.f32.mrb[3].mxu1  ;;  %v2248_v36 = vmax.f32 %v2216_v22, 0.0 }
 0x17b   :  { %v2187_v28 = vadd.f32 %v2547_v26, %v2416_v18  ;;  %v2178_v30 = vpop.f32.mrb[3].mxu0  ;;  %v2240_v34 = vmax.f32 %v2184_v20, 0.0  ;;  %v2211_v1 = vadd.f32 %v2416_v18, %v2210_v35  ;;  %v2246_v40 = vmax.f32 %v2208_v27, 0.0 }
 0x17c   :  { %v2179_v33 = vadd.f32 %v2416_v18, %v2178_v30  ;;  %v2238_v37 = vmax.f32 %v2176_v24, 0.0  ;;  %v2249_v38 = vmax.f32 %v2219_v32, 0.0 }
 0x17d   :  { %v2241_v12 = vmax.f32 %v2187_v28, 0.0  ;;  %v2247_v42 = vmax.f32 %v2211_v1, 0.0 }
 0x17e   :  { %v2239_v39 = vmax.f32 %v2179_v33, 0.0  ;;  %v2493_v43 = vpack.c.bf16 %v2249_v38, %v2248_v36 }
 0x17f   :  { %v2473_v41 = vpack.c.bf16 %v2241_v12, %v2240_v34  ;;  %v2488_v45 = vpack.c.bf16 %v2247_v42, %v2246_v40 }
 0x180   :  { %v2468_v44 = vpack.c.bf16 %v2239_v39, %v2238_v37  ;;  %2509 = vst [vmem:[%s3320_s7 + $0x28] sm:$0xff] %v2493_v43  }
 0x181   :  { %2505 = vst [vmem:[%s3320_s7 + $0x8] sm:$0xff] %v2473_v41   ;;  %2508 = vst [vmem:[%s3320_s7 + $0x20] sm:$0xff] %v2488_v45  }
 0x182   :  { %2469 = vst [vmem:[%s3320_s7] sm:$0xff] %v2468_v44  }
 0x18f   :  { %v2558_v48 = vpop.f32.mrb[4].mxu1 }
 0x190   :  { %v2550_v46 = vpop.f32.mrb[4].mxu0  ;;  %v2232_v50 = vadd.f32 %v2558_v48, %v2416_v18  ;;  %v2223_v52 = vpop.f32.mrb[5].mxu1 }
 0x191   :  { %v2200_v47 = vadd.f32 %v2550_v46, %v2416_v18  ;;  %v2191_v49 = vpop.f32.mrb[5].mxu0  ;;  %v2224_v54 = vadd.f32 %v2416_v18, %v2223_v52  ;;  %v2559_v56 = vpop.f32.mrb[6].mxu1 }
 0x192   :  { %v2192_v51 = vadd.f32 %v2416_v18, %v2191_v49  ;;  %v2551_v53 = vpop.f32.mrb[6].mxu0  ;;  %v2235_v58 = vadd.f32 %v2559_v56, %v2416_v18  ;;  %v2226_v60 = vpop.f32.mrb[7].mxu1  ;;  %v2252_v0 = vmax.f32 %v2232_v50, 0.0 }
 0x193   :  { %v2203_v55 = vadd.f32 %v2551_v53, %v2416_v18  ;;  %v2194_v57 = vpop.f32.mrb[7].mxu0  ;;  %v2244_v61 = vmax.f32 %v2200_v47, 0.0  ;;  %v2227_v63 = vadd.f32 %v2416_v18, %v2226_v60  ;;  %v2250_v5 = vmax.f32 %v2224_v54, 0.0 }
 0x194   :  { %v2195_v59 = vadd.f32 %v2416_v18, %v2194_v57  ;;  %v2242_v2 = vmax.f32 %v2192_v51, 0.0  ;;  %v2253_v3 = vmax.f32 %v2235_v58, 0.0 }
 0x195   :  { %v2245_v62 = vmax.f32 %v2203_v55, 0.0  ;;  %v2251_v7 = vmax.f32 %v2227_v63, 0.0 }
 0x196   :  { %v2243_v4 = vmax.f32 %v2195_v59, 0.0  ;;  %v2503_v8 = vpack.c.bf16 %v2253_v3, %v2252_v0 }
 0x197   :  { %v2483_v6 = vpack.c.bf16 %v2245_v62, %v2244_v61  ;;  %v2498_v10 = vpack.c.bf16 %v2251_v7, %v2250_v5 }
 0x198   :  { %v2478_v9 = vpack.c.bf16 %v2243_v4, %v2242_v2  ;;  %2511 = vst [vmem:[%s3320_s7 + $0x38] sm:$0xff] %v2503_v8  }
 0x199   :  { %2507 = vst [vmem:[%s3320_s7 + $0x18] sm:$0xff] %v2483_v6   ;;  %2510 = vst [vmem:[%s3320_s7 + $0x30] sm:$0xff] %v2498_v10  }
 0x19a   :  { %2506 = vst [vmem:[%s3320_s7 + $0x10] sm:$0xff] %v2478_v9  }

// kernel: ae_forward.18
= control target key start
LH: loop header
LB: loop body
LE: loop exit
PB: predicated region body
PF: predicated region fallthrough
CT: control target
= control target key end

     0   :  { %s6106_s15 = smov 0   ;;  %s7566_s0 = inlined_call_operand.vmem [shape: bf16[128,128], index: 0, kind: input, shape index: {}]   ;;  %s7567_s1 = inlined_call_operand.vmem [shape: f32[1,128], index: 1, kind: input, shape index: {}]   ;;  %s7568_s2 = inlined_call_operand.vmem [shape: bf16[512,16], index: 2, kind: input, shape index: {}]   ;;  %s7569_s3 = inlined_call_operand.<no memory space> [shape: bf16[], index: 3, kind: input, shape index: {}]   ;;  %s7570_s4 = inlined_call_operand.vmem [shape: bf16[512,16], index: 4, kind: input, shape index: {}]   ;;  %s7571_s5 = inlined_call_operand.vmem [shape: bf16[512,16], index: 5, kind: input, shape index: {}]   ;;  %s7572_s6 = inlined_call_operand.<no memory space> [shape: s32[], index: 6, kind: input, shape index: {}]   ;;  %s7573_s7 = inlined_call_operand.vmem [shape: bf16[512,16], index: 7, kind: input, shape index: {}]   ;;  %s7574_s8 = inlined_call_operand.<no memory space> [shape: bf16[], index: 8, kind: input, shape index: {}]   ;;  %s7575_s9 = inlined_call_operand.vmem [shape: f32[512,128], index: 9, kind: output, shape index: {}]  }
   0x1   :  { %v14_v0 = vstv %s7569_s3  ;;  %v29_v1 = vstv %s7572_s6  ;;  %v35_v2 = vstv %s7574_s8 }
   0x2   :  { %v6102_v3 = vunpack.i.l.bf16 %v14_v0  ;;  %v6104_v4 = vunpack.i.l.bf16 %v35_v2 }
   0x3 LB: > { %s5501_s3 = sadd.s32 4294967295, %s6037_s15   ;;  %p5505_p0 = scmp.ge.s32.totalorder %s6037_s15, 1  ;;  %s6037_s15 = sphi %s6106_s15, %s45_s15  }
   0x4   : > { %p314_p1 = scmp.lt.s32.totalorder %s6037_s15, 3 }
   0x6   : > { %p315_p2 = pnand %p5505_p0, %p314_p1 }
   0x8   : > { %318 = sbr.rel (%p315_p2) target bundleno = 469 (0x1d5), region = 44 }
   0xf   : > { %s5506_s8 = sshll.u32 %s5501_s3, 5  ;;  %v452_v5 = vlaneseq  ;;  %v6007_v7 = vld [vmem:[%s7566_s0] sm:$0xff]   ;;  %s6039_s25 = smov 16  }
  0x10   : > { %p381_p3 = scmp.lt.s32.totalorder %s5506_s8, 63  ;;  %5691 = vmatprep.subr.bf16.mxu0 %v6007_v7  ;;  %5739 = vmatprep.subr.bf16.mxu1 %v6007_v7  ;;  %s6040_s29 = smov 32  }
  0x11   : > { %v6114_v6 = vand.u32 127, %v452_v5  ;;  %5692 = vmatpush3.bf16.msra.mxu0 %v6007_v7  ;;  %5747 = vmatpush3.bf16.msra.mxu1 %v6007_v7  ;;  %s6041_s3 = smov 48  }
  0x12   : > { %s7579_s8 = smov (!%p381_p3, %s5506_s8), 63 }
  0x13   : > { %v6122_v8 = vadd.s32 128, %v6114_v6  ;;  %s6125_s18 = sshll.u32 %s7579_s8, 2  ;;  %vm513_vm1 = vcmp.lt.s32.totalorder %v6114_v6, 112  ;;  %vm486_vm2 = vcmp.lt.s32.totalorder %v6114_v6, 96  ;;  %vm459_vm3 = vcmp.lt.s32.totalorder %v6114_v6, 80 }
  0x14   : > { %s6131_s21 = scalar_lea.vmem %s7571_s5, %s6125_s18  ;;  %s6144_s24 = scalar_lea.vmem %s7570_s4, %s6125_s18  ;;  %vm532_vm4 = vcmp.lt.s32.totalorder %v6114_v6, 16  ;;  %vm7030_vm5 = vcmp.lt.s32.totalorder %v6114_v6, %v29_v1 }
  0x15   : > { %vm455_vm0 = vcmp.lt.s32.totalorder %v6122_v8, 144  ;;  %v5522_v9 = vld [vmem:[%s6131_s21 + $0x8] sm:$0xff]   ;;  %v502_v10 = vld [vmem:[%s6131_s21] sm:$0xff]   ;;  %s6205_s28 = scalar_lea.vmem %s7568_s2, %s6125_s18  ;;  %s6742_s30 = scalar_lea.vmem %s7573_s7, %s6125_s18 }
  0x16   : > { %v5586_v11 = vld [vmem:[%s6131_s21 + $0x48] sm:$0xff]   ;;  %v787_v12 = vunpack.c.l.bf16 %v5522_v9  ;;  %v930_v13 = vunpack.c.h.bf16 %v5522_v9  ;;  %v503_v14 = vunpack.c.l.bf16 %v502_v10  ;;  %v644_v15 = vunpack.c.h.bf16 %v502_v10  ;;  %v5578_v16 = vld [vmem:[%s6131_s21 + $0x40] sm:$0xff]  }
  0x17   : > { %v3075_v17 = vunpack.c.l.bf16 %v5586_v11  ;;  %v3218_v18 = vunpack.c.h.bf16 %v5586_v11  ;;  %v2789_v19 = vunpack.c.l.bf16 %v5578_v16  ;;  %v2932_v20 = vunpack.c.h.bf16 %v5578_v16  ;;  %v5577_v29 = vld [vmem:[%s6144_s24 + $0x40] sm:$0xff]   ;;  %v5585_v39 = vld [vmem:[%s6144_s24 + $0x48] sm:$0xff]  }
  0x18   : > { %v794_v21 = vsel %vm455_vm0, %v787_v12, %v6102_v3  ;;  %v937_v22 = vsel %vm455_vm0, %v930_v13, %v6102_v3  ;;  %v510_v23 = vsel %vm455_vm0, %v503_v14, %v6102_v3  ;;  %v651_v24 = vsel %vm455_vm0, %v644_v15, %v6102_v3  ;;  %v475_v34 = vld [vmem:[%s6144_s24] sm:$0xff]   ;;  %v5521_v40 = vld [vmem:[%s6144_s24 + $0x8] sm:$0xff]  }
  0x19   : > { %v798_v25 = vsel %vm513_vm1, %v794_v21, %v6102_v3  ;;  %v941_v26 = vsel %vm513_vm1, %v937_v22, %v6102_v3  ;;  %v514_v27 = vsel %vm513_vm1, %v510_v23, %v6102_v3  ;;  %v655_v28 = vsel %vm513_vm1, %v651_v24, %v6102_v3  ;;  %v5576_v61 = vld [vmem:[%s6205_s28 + $0x40] sm:$0xff]   ;;  %v5584_v12 = vld [vmem:[%s6205_s28 + $0x48] sm:$0xff]  }
  0x1a   : > { %v5777_v30 = vpack.i.bf16 %v941_v26, %v798_v25  ;;  %v5767_v31 = vpack.i.bf16 %v655_v28, %v514_v27  ;;  %v3082_v32 = vsel %vm455_vm0, %v3075_v17, %v6102_v3  ;;  %v3225_v33 = vsel %vm455_vm0, %v3218_v18, %v6102_v3  ;;  %v448_v5 = vld [vmem:[%s6205_s28] sm:$0xff]   ;;  %v5520_v13 = vld [vmem:[%s6205_s28 + $0x8] sm:$0xff]  }
  0x1b   : > { %v3086_v35 = vsel %vm513_vm1, %v3082_v32, %v6102_v3  ;;  %v3229_v36 = vsel %vm513_vm1, %v3225_v33, %v6102_v3  ;;  %v2796_v37 = vsel %vm455_vm0, %v2789_v19, %v6102_v3  ;;  %v2939_v38 = vsel %vm455_vm0, %v2932_v20, %v6102_v3 }
  0x1c   : > { %5778 = vrot.lane.b32.xlu1 %v5777_v30, %s6039_s25  ;;  %5768 = vrot.lane.b32.xlu0 %v5767_v31, %s6039_s25  ;;  %v5782_v41 = vpack.i.bf16 %v3229_v36, %v3086_v35  ;;  %v2800_v42 = vsel %vm513_vm1, %v2796_v37, %v6102_v3  ;;  %v2943_v43 = vsel %vm513_vm1, %v2939_v38, %v6102_v3  ;;  %v2761_v44 = vunpack.c.l.bf16 %v5577_v29  ;;  %v5594_v30 = vld [vmem:[%s6131_s21 + $0x50] sm:$0xff]   ;;  %v6008_v36 = vld [vmem:[%s7566_s0 + $0x8] sm:$0xff]  }
  0x1d   : > { %v5772_v45 = vpack.i.bf16 %v2943_v43, %v2800_v42  ;;  %v2904_v46 = vunpack.c.h.bf16 %v5577_v29  ;;  %v476_v47 = vunpack.c.l.bf16 %v475_v34  ;;  %v616_v48 = vunpack.c.h.bf16 %v475_v34  ;;  %v5530_v35 = vld [vmem:[%s6131_s21 + $0x10] sm:$0xff]   ;;  %5693 = vmatprep.subr.bf16.mxu0 %v6008_v36  ;;  %5740 = vmatprep.subr.bf16.mxu1 %v6008_v36 }
  0x1e   : > { %v2768_v49 = vsel %vm455_vm0, %v2761_v44, %v6102_v3  ;;  %v3047_v50 = vunpack.c.l.bf16 %v5585_v39  ;;  %v3190_v51 = vunpack.c.h.bf16 %v5585_v39  ;;  %v759_v52 = vunpack.c.l.bf16 %v5521_v40  ;;  %v6009_v37 = vld [vmem:[%s7566_s0 + $0x10] sm:$0xff]   ;;  %5694 = vmatpush3.bf16.msra.mxu0 %v6008_v36  ;;  %5748 = vmatpush3.bf16.msra.mxu1 %v6008_v36 }
  0x1f   : > { %v2772_v53 = vsel %vm486_vm2, %v2768_v49, %v6102_v3  ;;  %v2911_v54 = vsel %vm455_vm0, %v2904_v46, %v6102_v3  ;;  %v483_v55 = vsel %vm455_vm0, %v476_v47, %v6102_v3  ;;  %v623_v56 = vsel %vm455_vm0, %v616_v48, %v6102_v3  ;;  %5695 = vmatprep.subr.bf16.mxu0 %v6009_v37 }
  0x20   : > { %5783 = vrot.lane.b32.xlu1 %v5782_v41, %s6039_s25  ;;  %5773 = vrot.lane.b32.xlu0 %v5772_v45, %s6039_s25  ;;  %v2915_v57 = vsel %vm486_vm2, %v2911_v54, %v6102_v3  ;;  %v487_v58 = vsel %vm486_vm2, %v483_v55, %v6102_v3  ;;  %v627_v59 = vsel %vm486_vm2, %v623_v56, %v6102_v3  ;;  %v902_v60 = vunpack.c.h.bf16 %v5521_v40  ;;  %v6010_v56 = vld [vmem:[%s7566_s0 + $0x18] sm:$0xff]  }
  0x21   : > { %v5792_v62 = vpack.i.bf16 %v2915_v57, %v2772_v53  ;;  %v5787_v63 = vpack.i.bf16 %v627_v59, %v487_v58  ;;  %v3054_v0 = vsel %vm455_vm0, %v3047_v50, %v6102_v3  ;;  %v3197_v2 = vsel %vm455_vm0, %v3190_v51, %v6102_v3  ;;  %v5602_v50 = vld [vmem:[%s6131_s21 + $0x58] sm:$0xff]   ;;  %5741 = vmatprep.subr.bf16.mxu1 %v6009_v37 }
  0x22   : > { %v3058_v7 = vsel %vm486_vm2, %v3054_v0, %v6102_v3  ;;  %v3201_v9 = vsel %vm486_vm2, %v3197_v2, %v6102_v3  ;;  %v766_v10 = vsel %vm455_vm0, %v759_v52, %v6102_v3  ;;  %v909_v11 = vsel %vm455_vm0, %v902_v60, %v6102_v3  ;;  %v5538_v51 = vld [vmem:[%s6131_s21 + $0x18] sm:$0xff]   ;;  %5696 = vmatpush3.bf16.msra.mxu0 %v6009_v37 }
  0x23   : > { %v5802_v14 = vpack.i.bf16 %v3201_v9, %v3058_v7  ;;  %v770_v15 = vsel %vm486_vm2, %v766_v10, %v6102_v3  ;;  %v913_v16 = vsel %vm486_vm2, %v909_v11, %v6102_v3  ;;  %v2733_v17 = vunpack.c.l.bf16 %v5576_v61  ;;  %5749 = vmatpush3.bf16.msra.mxu1 %v6009_v37  ;;  %5697 = vmatprep.subr.bf16.mxu0 %v6010_v56 }
  0x24   : > { %5793 = vrot.lane.b32.xlu1 %v5792_v62, %s6040_s29  ;;  %5788 = vrot.lane.b32.xlu0 %v5787_v63, %s6040_s29  ;;  %v5797_v18 = vpack.i.bf16 %v913_v16, %v770_v15  ;;  %v2876_v19 = vunpack.c.h.bf16 %v5576_v61  ;;  %v449_v20 = vunpack.c.l.bf16 %v448_v5  ;;  %v588_v21 = vunpack.c.h.bf16 %v448_v5  ;;  %v5593_v61 = vld [vmem:[%s6144_s24 + $0x50] sm:$0xff]   ;;  %v6011_v15 = vld [vmem:[%s7566_s0 + $0x20] sm:$0xff]  }
  0x25   : > { %v2740_v22 = vsel %vm455_vm0, %v2733_v17, %v6102_v3  ;;  %v3019_v23 = vunpack.c.l.bf16 %v5584_v12  ;;  %v3162_v24 = vunpack.c.h.bf16 %v5584_v12  ;;  %v731_v25 = vunpack.c.l.bf16 %v5520_v13  ;;  %5742 = vmatprep.subr.bf16.mxu1 %v6010_v56 }
  0x26   : > { %v2744_v26 = vsel %vm459_vm3, %v2740_v22, %v6102_v3  ;;  %v2883_v27 = vsel %vm455_vm0, %v2876_v19, %v6102_v3  ;;  %v456_v28 = vsel %vm455_vm0, %v449_v20, %v6102_v3  ;;  %v595_v29 = vsel %vm455_vm0, %v588_v21, %v6102_v3  ;;  %v5529_v20 = vld [vmem:[%s6144_s24 + $0x10] sm:$0xff]   ;;  %5698 = vmatpush3.bf16.msra.mxu0 %v6010_v56 }
  0x27   : > { %v2887_v31 = vsel %vm459_vm3, %v2883_v27, %v6102_v3  ;;  %v460_v32 = vsel %vm459_vm3, %v456_v28, %v6102_v3  ;;  %v599_v33 = vsel %vm459_vm3, %v595_v29, %v6102_v3  ;;  %v3026_v34 = vsel %vm455_vm0, %v3019_v23, %v6102_v3  ;;  %5750 = vmatpush3.bf16.msra.mxu1 %v6010_v56 }
  0x28   : > { %5803 = vrot.lane.b32.xlu1 %v5802_v14, %s6040_s29  ;;  %5798 = vrot.lane.b32.xlu0 %v5797_v18, %s6040_s29  ;;  %v5812_v38 = vpack.i.bf16 %v2887_v31, %v2744_v26  ;;  %v5807_v39 = vpack.i.bf16 %v599_v33, %v460_v32  ;;  %v3030_v40 = vsel %vm459_vm3, %v3026_v34, %v6102_v3  ;;  %v874_v41 = vunpack.c.h.bf16 %v5520_v13 }
  0x29   : > { %v3169_v42 = vsel %vm455_vm0, %v3162_v24, %v6102_v3  ;;  %v738_v43 = vsel %vm455_vm0, %v731_v25, %v6102_v3  ;;  %v3361_v44 = vunpack.c.l.bf16 %v5594_v30  ;;  %v3504_v45 = vunpack.c.h.bf16 %v5594_v30  ;;  %v5601_v24 = vld [vmem:[%s6144_s24 + $0x58] sm:$0xff]   ;;  %v5592_v30 = vld [vmem:[%s6205_s28 + $0x50] sm:$0xff]   ;;  %5699 = vmatprep.subr.bf16.mxu0 %v6011_v15  ;;  %5743 = vmatprep.subr.bf16.mxu1 %v6011_v15 }
  0x2a   : > { %v3173_v46 = vsel %vm459_vm3, %v3169_v42, %v6102_v3  ;;  %v742_v47 = vsel %vm459_vm3, %v738_v43, %v6102_v3  ;;  %v881_v48 = vsel %vm455_vm0, %v874_v41, %v6102_v3  ;;  %v1073_v49 = vunpack.c.l.bf16 %v5530_v35  ;;  %v5537_v25 = vld [vmem:[%s6144_s24 + $0x18] sm:$0xff]   ;;  %v6012_v43 = vld [vmem:[%s7566_s0 + $0x28] sm:$0xff]   ;;  %5700 = vmatpush3.bf16.msra.mxu0 %v6011_v15 }
  0x2b   : > { %v5822_v52 = vpack.i.bf16 %v3173_v46, %v3030_v40  ;;  %v885_v53 = vsel %vm459_vm3, %v881_v48, %v6102_v3  ;;  %v3368_v54 = vsel %vm455_vm0, %v3361_v44, %v6102_v3  ;;  %v3511_v55 = vsel %vm455_vm0, %v3504_v45, %v6102_v3  ;;  %v5528_v48 = vld [vmem:[%s6205_s28 + $0x10] sm:$0xff]   ;;  %5751 = vmatpush3.bf16.msra.mxu1 %v6011_v15 }
  0x2c   : > { %5813 = vrot.lane.b32.xlu1 %v5812_v38, %s6041_s3  ;;  %5808 = vrot.lane.b32.xlu0 %v5807_v39, %s6041_s3  ;;  %v5817_v57 = vpack.i.bf16 %v885_v53, %v742_v47  ;;  %v3372_v58 = vsel %vm513_vm1, %v3368_v54, %v6102_v3  ;;  %v3515_v59 = vsel %vm513_vm1, %v3511_v55, %v6102_v3  ;;  %v1216_v60 = vunpack.c.h.bf16 %v5530_v35  ;;  %v5600_v53 = vld [vmem:[%s6205_s28 + $0x58] sm:$0xff]   ;;  %v6013_v54 = vld [vmem:[%s7566_s0 + $0x30] sm:$0xff]  }
  0x2d   : > { %v5832_v62 = vpack.i.bf16 %v3515_v59, %v3372_v58  ;;  %v1080_v63 = vsel %vm455_vm0, %v1073_v49, %v6102_v3  ;;  %v3647_v0 = vunpack.c.l.bf16 %v5602_v50  ;;  %v3790_v2 = vunpack.c.h.bf16 %v5602_v50  ;;  %5701 = vmatprep.subr.bf16.mxu0 %v6012_v43  ;;  %5744 = vmatprep.subr.bf16.mxu1 %v6012_v43 }
  0x2e   : > { %v1084_v5 = vsel %vm513_vm1, %v1080_v63, %v6102_v3  ;;  %v1223_v7 = vsel %vm455_vm0, %v1216_v60, %v6102_v3  ;;  %v1359_v9 = vunpack.c.l.bf16 %v5538_v51  ;;  %v1502_v10 = vunpack.c.h.bf16 %v5538_v51  ;;  %v5536_v63 = vld [vmem:[%s6205_s28 + $0x18] sm:$0xff]   ;;  %5702 = vmatpush3.bf16.msra.mxu0 %v6012_v43 }
  0x2f   : > { %v1227_v11 = vsel %vm513_vm1, %v1223_v7, %v6102_v3  ;;  %v3654_v12 = vsel %vm455_vm0, %v3647_v0, %v6102_v3  ;;  %v3797_v13 = vsel %vm455_vm0, %v3790_v2, %v6102_v3  ;;  %v3333_v14 = vunpack.c.l.bf16 %v5593_v61  ;;  %5752 = vmatpush3.bf16.msra.mxu1 %v6012_v43  ;;  %5703 = vmatprep.subr.bf16.mxu0 %v6013_v54 }
  0x30   : > { %5823 = vrot.lane.b32.xlu1 %v5822_v52, %s6041_s3  ;;  %5818 = vrot.lane.b32.xlu0 %v5817_v57, %s6041_s3  ;;  %v5827_v16 = vpack.i.bf16 %v1227_v11, %v1084_v5  ;;  %v3658_v17 = vsel %vm513_vm1, %v3654_v12, %v6102_v3  ;;  %v3801_v18 = vsel %vm513_vm1, %v3797_v13, %v6102_v3  ;;  %v3476_v19 = vunpack.c.h.bf16 %v5593_v61  ;;  %v5610_v13 = vld [vmem:[%s6131_s21 + $0x60] sm:$0xff]  }
  0x31   : > { %v1366_v21 = vsel %vm455_vm0, %v1359_v9, %v6102_v3  ;;  %v1509_v22 = vsel %vm455_vm0, %v1502_v10, %v6102_v3  ;;  %v3340_v23 = vsel %vm455_vm0, %v3333_v14, %v6102_v3  ;;  %v5842_v26 = vpack.i.bf16 %v3801_v18, %v3658_v17  ;;  %v6014_v14 = vld [vmem:[%s7566_s0 + $0x38] sm:$0xff]   ;;  %5745 = vmatprep.subr.bf16.mxu1 %v6013_v54 }
  0x32   : > { %v1370_v27 = vsel %vm513_vm1, %v1366_v21, %v6102_v3  ;;  %v1513_v28 = vsel %vm513_vm1, %v1509_v22, %v6102_v3  ;;  %v3483_v29 = vsel %vm455_vm0, %v3476_v19, %v6102_v3  ;;  %v3344_v32 = vsel %vm486_vm2, %v3340_v23, %v6102_v3  ;;  %v5546_v23 = vld [vmem:[%s6131_s21 + $0x20] sm:$0xff]   ;;  %5704 = vmatpush3.bf16.msra.mxu0 %v6013_v54 }
  0x33   : > { %v5837_v31 = vpack.i.bf16 %v1513_v28, %v1370_v27  ;;  %v1045_v33 = vunpack.c.l.bf16 %v5529_v20  ;;  %v1188_v34 = vunpack.c.h.bf16 %v5529_v20  ;;  %v3487_v35 = vsel %vm486_vm2, %v3483_v29, %v6102_v3  ;;  %v5618_v28 = vld [vmem:[%s6131_s21 + $0x68] sm:$0xff]   ;;  %5753 = vmatpush3.bf16.msra.mxu1 %v6013_v54  ;;  %5705 = vmatprep.subr.bf16.mxu0 %v6014_v14 }
  0x34   : > { %5833 = vrot.lane.b32.xlu1 %v5832_v62, %s6039_s25  ;;  %5828 = vrot.lane.b32.xlu0 %v5827_v16, %s6039_s25  ;;  %v3619_v36 = vunpack.c.l.bf16 %v5601_v24  ;;  %v3762_v37 = vunpack.c.h.bf16 %v5601_v24  ;;  %v1331_v38 = vunpack.c.l.bf16 %v5537_v25  ;;  %v1474_v41 = vunpack.c.h.bf16 %v5537_v25 }
  0x35   : > { %v1052_v39 = vsel %vm455_vm0, %v1045_v33, %v6102_v3  ;;  %v1195_v40 = vsel %vm455_vm0, %v1188_v34, %v6102_v3  ;;  %v3305_v42 = vunpack.c.l.bf16 %v5592_v30  ;;  %v5852_v49 = vpack.i.bf16 %v3487_v35, %v3344_v32  ;;  %5746 = vmatprep.subr.bf16.mxu1 %v6014_v14 }
  0x36   : > { %v1056_v44 = vsel %vm486_vm2, %v1052_v39, %v6102_v3  ;;  %v1199_v45 = vsel %vm486_vm2, %v1195_v40, %v6102_v3  ;;  %v3626_v46 = vsel %vm455_vm0, %v3619_v36, %v6102_v3  ;;  %v3769_v47 = vsel %vm455_vm0, %v3762_v37, %v6102_v3  ;;  %v5554_v39 = vld [vmem:[%s6131_s21 + $0x28] sm:$0xff]   ;;  %5706 = vmatpush3.bf16.msra.mxu0 %v6014_v14 }
  0x37   : > { %v3630_v50 = vsel %vm486_vm2, %v3626_v46, %v6102_v3  ;;  %v3773_v51 = vsel %vm486_vm2, %v3769_v47, %v6102_v3  ;;  %v1338_v52 = vsel %vm455_vm0, %v1331_v38, %v6102_v3  ;;  %v5847_v55 = vpack.i.bf16 %v1199_v45, %v1056_v44  ;;  %v5609_v44 = vld [vmem:[%s6144_s24 + $0x60] sm:$0xff]   ;;  %5754 = vmatpush3.bf16.msra.mxu1 %v6014_v14 }
  0x38   : > { %5843 = vrot.lane.b32.xlu1 %v5842_v26, %s6039_s25  ;;  %5838 = vrot.lane.b32.xlu0 %v5837_v31, %s6039_s25  ;;  %v1342_v56 = vsel %vm486_vm2, %v1338_v52, %v6102_v3  ;;  %v1481_v57 = vsel %vm455_vm0, %v1474_v41, %v6102_v3  ;;  %v3448_v58 = vunpack.c.h.bf16 %v5592_v30  ;;  %v3312_v60 = vsel %vm455_vm0, %v3305_v42, %v6102_v3 }
  0x39   : > { %v1485_v59 = vsel %vm486_vm2, %v1481_v57, %v6102_v3  ;;  %v1017_v61 = vunpack.c.l.bf16 %v5528_v48  ;;  %v1160_v62 = vunpack.c.h.bf16 %v5528_v48  ;;  %v5862_v0 = vpack.i.bf16 %v3773_v51, %v3630_v50 }
  0x3a   : > { %v3316_v2 = vsel %vm459_vm3, %v3312_v60, %v6102_v3  ;;  %v3455_v5 = vsel %vm455_vm0, %v3448_v58, %v6102_v3  ;;  %v3591_v7 = vunpack.c.l.bf16 %v5600_v53  ;;  %v3734_v12 = vunpack.c.h.bf16 %v5600_v53  ;;  %v5617_v58 = vld [vmem:[%s6144_s24 + $0x68] sm:$0xff]  }
  0x3b   : > { %v3459_v9 = vsel %vm459_vm3, %v3455_v5, %v6102_v3  ;;  %v1024_v10 = vsel %vm455_vm0, %v1017_v61, %v6102_v3  ;;  %v1167_v11 = vsel %vm455_vm0, %v1160_v62, %v6102_v3  ;;  %v5857_v15 = vpack.i.bf16 %v1485_v59, %v1342_v56 }
  0x3c   : > { %5853 = vrot.lane.b32.xlu1 %v5852_v49, %s6040_s29  ;;  %5848 = vrot.lane.b32.xlu0 %v5847_v55, %s6040_s29  ;;  %v1028_v16 = vsel %vm459_vm3, %v1024_v10, %v6102_v3  ;;  %v1171_v17 = vsel %vm459_vm3, %v1167_v11, %v6102_v3  ;;  %v1303_v18 = vunpack.c.l.bf16 %v5536_v63  ;;  %v5872_v19 = vpack.i.bf16 %v3459_v9, %v3316_v2  ;;  %v5545_v49 = vld [vmem:[%s6144_s24 + $0x20] sm:$0xff]  }
  0x3d   : > { %v3598_v20 = vsel %vm455_vm0, %v3591_v7, %v6102_v3  ;;  %v3741_v21 = vsel %vm455_vm0, %v3734_v12, %v6102_v3  ;;  %v1446_v22 = vunpack.c.h.bf16 %v5536_v63  ;;  %v5867_v24 = vpack.i.bf16 %v1171_v17, %v1028_v16  ;;  %v5553_v12 = vld [vmem:[%s6144_s24 + $0x28] sm:$0xff]   ;;  %v5608_v16 = vld [vmem:[%s6205_s28 + $0x60] sm:$0xff]  }
  0x3e   : > { %v3602_v25 = vsel %vm459_vm3, %v3598_v20, %v6102_v3  ;;  %v1310_v26 = vsel %vm455_vm0, %v1303_v18, %v6102_v3  ;;  %v3933_v27 = vunpack.c.l.bf16 %v5610_v13  ;;  %v3745_v29 = vsel %vm459_vm3, %v3741_v21, %v6102_v3  ;;  %v5544_v17 = vld [vmem:[%s6205_s28 + $0x20] sm:$0xff]  }
  0x3f   : > { %v1314_v30 = vsel %vm459_vm3, %v1310_v26, %v6102_v3  ;;  %v1453_v31 = vsel %vm455_vm0, %v1446_v22, %v6102_v3  ;;  %v4076_v32 = vunpack.c.h.bf16 %v5610_v13  ;;  %v1645_v35 = vunpack.c.l.bf16 %v5546_v23 }
  0x40   : > { %5863 = vrot.lane.b32.xlu1 %v5862_v0, %s6040_s29  ;;  %5858 = vrot.lane.b32.xlu0 %v5857_v15, %s6040_s29  ;;  %v1457_v33 = vsel %vm459_vm3, %v1453_v31, %v6102_v3  ;;  %v3940_v34 = vsel %vm455_vm0, %v3933_v27, %v6102_v3  ;;  %v1788_v36 = vunpack.c.h.bf16 %v5546_v23  ;;  %v4219_v38 = vunpack.c.l.bf16 %v5618_v28 }
  0x41   : > { %v4083_v37 = vsel %vm455_vm0, %v4076_v32, %v6102_v3  ;;  %v5882_v40 = vpack.i.bf16 %v3745_v29, %v3602_v25  ;;  %v1652_v41 = vsel %vm455_vm0, %v1645_v35, %v6102_v3  ;;  %v4362_v43 = vunpack.c.h.bf16 %v5618_v28 }
  0x42   : > { %v1795_v42 = vsel %vm455_vm0, %v1788_v36, %v6102_v3  ;;  %v5877_v45 = vpack.i.bf16 %v1457_v33, %v1314_v30  ;;  %v3944_v46 = vsel %vm513_vm1, %v3940_v34, %v6102_v3  ;;  %v4087_v47 = vsel %vm513_vm1, %v4083_v37, %v6102_v3  ;;  %v5616_v34 = vld [vmem:[%s6205_s28 + $0x68] sm:$0xff]  }
  0x43   : > { %v4226_v48 = vsel %vm455_vm0, %v4219_v38, %v6102_v3  ;;  %v1656_v50 = vsel %vm513_vm1, %v1652_v41, %v6102_v3  ;;  %v1799_v51 = vsel %vm513_vm1, %v1795_v42, %v6102_v3  ;;  %v4369_v52 = vsel %vm455_vm0, %v4362_v43, %v6102_v3  ;;  %v5626_v43 = vld [vmem:[%s6131_s21 + $0x70] sm:$0xff]  }
  0x44   : > { %5873 = vrot.lane.b32.xlu1 %v5872_v19, %s6041_s3  ;;  %5868 = vrot.lane.b32.xlu0 %v5867_v24, %s6041_s3  ;;  %v1931_v53 = vunpack.c.l.bf16 %v5554_v39  ;;  %v4230_v54 = vsel %vm513_vm1, %v4226_v48, %v6102_v3  ;;  %v2074_v55 = vunpack.c.h.bf16 %v5554_v39  ;;  %v3905_v56 = vunpack.c.l.bf16 %v5609_v44  ;;  %v5552_v39 = vld [vmem:[%s6205_s28 + $0x28] sm:$0xff]  }
  0x45   : > { %v4048_v57 = vunpack.c.h.bf16 %v5609_v44  ;;  %v4373_v59 = vsel %vm513_vm1, %v4369_v52, %v6102_v3  ;;  %v1617_v61 = vunpack.c.l.bf16 %v5545_v49  ;;  %v1760_v62 = vunpack.c.h.bf16 %v5545_v49  ;;  %v5562_v52 = vld [vmem:[%s6131_s21 + $0x30] sm:$0xff]  }
  0x46   : > { %v1938_v60 = vsel %vm455_vm0, %v1931_v53, %v6102_v3  ;;  %v2081_v0 = vsel %vm455_vm0, %v2074_v55, %v6102_v3  ;;  %v3912_v2 = vsel %vm455_vm0, %v3905_v56, %v6102_v3  ;;  %v5892_v7 = vpack.i.bf16 %v4087_v47, %v3944_v46 }
  0x47   : > { %v1942_v63 = vsel %vm513_vm1, %v1938_v60, %v6102_v3  ;;  %v4055_v5 = vsel %vm455_vm0, %v4048_v57, %v6102_v3  ;;  %v5887_v9 = vpack.i.bf16 %v1799_v51, %v1656_v50  ;;  %v2085_v10 = vsel %vm513_vm1, %v2081_v0, %v6102_v3 }
  0x48   : > { %5883 = vrot.lane.b32.xlu1 %v5882_v40, %s6041_s3  ;;  %5878 = vrot.lane.b32.xlu0 %v5877_v45, %s6041_s3  ;;  %v4191_v11 = vunpack.c.l.bf16 %v5617_v58  ;;  %v5902_v13 = vpack.i.bf16 %v4373_v59, %v4230_v54  ;;  %v3916_v14 = vsel %vm486_vm2, %v3912_v2, %v6102_v3  ;;  %v1624_v15 = vsel %vm455_vm0, %v1617_v61, %v6102_v3 }
  0x49   : > { %v5897_v18 = vpack.i.bf16 %v2085_v10, %v1942_v63  ;;  %v4059_v19 = vsel %vm486_vm2, %v4055_v5, %v6102_v3  ;;  %v1767_v20 = vsel %vm455_vm0, %v1760_v62, %v6102_v3  ;;  %v4334_v21 = vunpack.c.h.bf16 %v5617_v58 }
  0x4a   : > { %v1628_v22 = vsel %vm486_vm2, %v1624_v15, %v6102_v3  ;;  %v4198_v23 = vsel %vm455_vm0, %v4191_v11, %v6102_v3  ;;  %v1903_v24 = vunpack.c.l.bf16 %v5553_v12  ;;  %v2046_v25 = vunpack.c.h.bf16 %v5553_v12  ;;  %v5570_v12 = vld [vmem:[%s6131_s21 + $0x38] sm:$0xff]  }
  0x4b   : > { %v4341_v26 = vsel %vm455_vm0, %v4334_v21, %v6102_v3  ;;  %v3877_v27 = vunpack.c.l.bf16 %v5608_v16  ;;  %v4020_v28 = vunpack.c.h.bf16 %v5608_v16  ;;  %v1589_v29 = vunpack.c.l.bf16 %v5544_v17 }
  0x4c   : > { %5893 = vrot.lane.b32.xlu1 %v5892_v7, %s6039_s25  ;;  %5888 = vrot.lane.b32.xlu0 %v5887_v9, %s6039_s25  ;;  %v1771_v30 = vsel %vm486_vm2, %v1767_v20, %v6102_v3  ;;  %v1910_v31 = vsel %vm455_vm0, %v1903_v24, %v6102_v3  ;;  %v2053_v32 = vsel %vm455_vm0, %v2046_v25, %v6102_v3  ;;  %v1732_v33 = vunpack.c.h.bf16 %v5544_v17  ;;  %v5634_v7 = vld [vmem:[%s6131_s21 + $0x78] sm:$0xff]   ;;  %v5625_v17 = vld [vmem:[%s6144_s24 + $0x70] sm:$0xff]  }
  0x4d   : > { %v4202_v35 = vsel %vm486_vm2, %v4198_v23, %v6102_v3  ;;  %v4345_v36 = vsel %vm486_vm2, %v4341_v26, %v6102_v3  ;;  %v1914_v37 = vsel %vm486_vm2, %v1910_v31, %v6102_v3  ;;  %v2057_v38 = vsel %vm486_vm2, %v2053_v32, %v6102_v3  ;;  %v5633_v32 = vld [vmem:[%s6144_s24 + $0x78] sm:$0xff]  }
  0x4e   : > { %v5912_v40 = vpack.i.bf16 %v4059_v19, %v3916_v14  ;;  %v3884_v41 = vsel %vm455_vm0, %v3877_v27, %v6102_v3  ;;  %v4027_v42 = vsel %vm455_vm0, %v4020_v28, %v6102_v3  ;;  %v5907_v44 = vpack.i.bf16 %v1771_v30, %v1628_v22  ;;  %v5561_v28 = vld [vmem:[%s6144_s24 + $0x30] sm:$0xff]  }
  0x4f   : > { %v1596_v45 = vsel %vm455_vm0, %v1589_v29, %v6102_v3  ;;  %v1739_v46 = vsel %vm455_vm0, %v1732_v33, %v6102_v3  ;;  %v4163_v47 = vunpack.c.l.bf16 %v5616_v34  ;;  %v5922_v48 = vpack.i.bf16 %v4345_v36, %v4202_v35  ;;  %v5569_v36 = vld [vmem:[%s6144_s24 + $0x38] sm:$0xff]  }
  0x50   : > { %5903 = vrot.lane.b32.xlu1 %v5902_v13, %s6039_s25  ;;  %5898 = vrot.lane.b32.xlu0 %v5897_v18, %s6039_s25  ;;  %v5917_v49 = vpack.i.bf16 %v2057_v38, %v1914_v37  ;;  %v4306_v50 = vunpack.c.h.bf16 %v5616_v34  ;;  %v1875_v51 = vunpack.c.l.bf16 %v5552_v39  ;;  %v3888_v53 = vsel %vm459_vm3, %v3884_v41, %v6102_v3 }
  0x51   : > { %v4031_v54 = vsel %vm459_vm3, %v4027_v42, %v6102_v3  ;;  %v2018_v55 = vunpack.c.h.bf16 %v5552_v39  ;;  %v4505_v56 = vunpack.c.l.bf16 %v5626_v43  ;;  %v1600_v57 = vsel %vm459_vm3, %v1596_v45, %v6102_v3  ;;  %v5624_v45 = vld [vmem:[%s6205_s28 + $0x70] sm:$0xff]  }
  0x52   : > { %v1743_v58 = vsel %vm459_vm3, %v1739_v46, %v6102_v3  ;;  %v4170_v59 = vsel %vm455_vm0, %v4163_v47, %v6102_v3  ;;  %v4648_v60 = vunpack.c.h.bf16 %v5626_v43  ;;  %v4313_v61 = vsel %vm455_vm0, %v4306_v50, %v6102_v3 }
  0x53   : > { %v1882_v62 = vsel %vm455_vm0, %v1875_v51, %v6102_v3  ;;  %v2025_v63 = vsel %vm455_vm0, %v2018_v55, %v6102_v3  ;;  %v2217_v0 = vunpack.c.l.bf16 %v5562_v52  ;;  %v4512_v2 = vsel %vm455_vm0, %v4505_v56, %v6102_v3 }
  0x54   : > { %5913 = vrot.lane.b32.xlu1 %v5912_v40, %s6040_s29  ;;  %5908 = vrot.lane.b32.xlu0 %v5907_v44, %s6040_s29  ;;  %v4655_v5 = vsel %vm455_vm0, %v4648_v60, %v6102_v3  ;;  %v5932_v9 = vpack.i.bf16 %v4031_v54, %v3888_v53  ;;  %v5927_v10 = vpack.i.bf16 %v1743_v58, %v1600_v57  ;;  %v2360_v16 = vunpack.c.h.bf16 %v5562_v52  ;;  %v5560_v58 = vld [vmem:[%s6205_s28 + $0x30] sm:$0xff]  }
  0x55   : > { %v4174_v11 = vsel %vm459_vm3, %v4170_v59, %v6102_v3  ;;  %v4317_v13 = vsel %vm459_vm3, %v4313_v61, %v6102_v3  ;;  %v1886_v14 = vsel %vm459_vm3, %v1882_v62, %v6102_v3  ;;  %v2029_v15 = vsel %vm459_vm3, %v2025_v63, %v6102_v3 }
  0x56   : > { %v4516_v18 = vsel %vm513_vm1, %v4512_v2, %v6102_v3  ;;  %v4659_v19 = vsel %vm513_vm1, %v4655_v5, %v6102_v3  ;;  %v2224_v20 = vsel %vm455_vm0, %v2217_v0, %v6102_v3  ;;  %v4791_v21 = vunpack.c.l.bf16 %v5634_v7 }
  0x57   : > { %v2367_v22 = vsel %vm455_vm0, %v2360_v16, %v6102_v3  ;;  %v4934_v23 = vunpack.c.h.bf16 %v5634_v7  ;;  %v2503_v24 = vunpack.c.l.bf16 %v5570_v12  ;;  %v2646_v25 = vunpack.c.h.bf16 %v5570_v12  ;;  %v5523_v7 = vld [vmem:[%s6742_s30 + $0x8] sm:$0xff]  }
  0x58   : > { %5923 = vrot.lane.b32.xlu1 %v5922_v48, %s6040_s29  ;;  %5918 = vrot.lane.b32.xlu0 %v5917_v49, %s6040_s29  ;;  %v4477_v26 = vunpack.c.l.bf16 %v5625_v17  ;;  %v4620_v27 = vunpack.c.h.bf16 %v5625_v17  ;;  %v5942_v29 = vpack.i.bf16 %v4317_v13, %v4174_v11  ;;  %v5937_v30 = vpack.i.bf16 %v2029_v15, %v1886_v14  ;;  %v5632_v13 = vld [vmem:[%s6205_s28 + $0x78] sm:$0xff]  }
  0x59   : > { %v5952_v31 = vpack.i.bf16 %v4659_v19, %v4516_v18  ;;  %v2228_v33 = vsel %vm513_vm1, %v2224_v20, %v6102_v3  ;;  %v2371_v34 = vsel %vm513_vm1, %v2367_v22, %v6102_v3  ;;  %v4798_v35 = vsel %vm455_vm0, %v4791_v21, %v6102_v3  ;;  %v5568_v21 = vld [vmem:[%s6205_s28 + $0x38] sm:$0xff]   ;;  %s5515_s28 = sshll.u32 %s7579_s8, 3 }
  0x5a   : > { %v4941_v37 = vsel %vm455_vm0, %v4934_v23, %v6102_v3  ;;  %v2510_v38 = vsel %vm455_vm0, %v2503_v24, %v6102_v3  ;;  %v2653_v39 = vsel %vm455_vm0, %v2646_v25, %v6102_v3  ;;  %v2189_v40 = vunpack.c.l.bf16 %v5561_v28  ;;  %s7497_s13 = scalar_lea.vmem %s7575_s9, %s5515_s28 }
  0x5b   : > { %v4484_v41 = vsel %vm455_vm0, %v4477_v26, %v6102_v3  ;;  %v4627_v42 = vsel %vm455_vm0, %v4620_v27, %v6102_v3  ;;  %v2332_v43 = vunpack.c.h.bf16 %v5561_v28  ;;  %v4763_v44 = vunpack.c.l.bf16 %v5633_v32 }
  0x5c   : > { %5933 = vrot.lane.b32.xlu1 %v5932_v9, %s6041_s3  ;;  %5928 = vrot.lane.b32.xlu0 %v5927_v10, %s6041_s3  ;;  %v5947_v46 = vpack.i.bf16 %v2371_v34, %v2228_v33  ;;  %v4802_v47 = vsel %vm513_vm1, %v4798_v35, %v6102_v3  ;;  %v4906_v48 = vunpack.c.h.bf16 %v5633_v32  ;;  %v2475_v49 = vunpack.c.l.bf16 %v5569_v36 }
  0x5d   : > { %v4945_v50 = vsel %vm513_vm1, %v4941_v37, %v6102_v3  ;;  %v2514_v51 = vsel %vm513_vm1, %v2510_v38, %v6102_v3  ;;  %v2657_v52 = vsel %vm513_vm1, %v2653_v39, %v6102_v3  ;;  %v2618_v53 = vunpack.c.h.bf16 %v5569_v36  ;;  %v5587_v36 = vld [vmem:[%s6742_s30 + $0x48] sm:$0xff]   ;;  %v5579_v37 = vld [vmem:[%s6742_s30 + $0x40] sm:$0xff]  }
  0x5e   : > { %v4488_v54 = vsel %vm486_vm2, %v4484_v41, %v6102_v3  ;;  %v4631_v55 = vsel %vm486_vm2, %v4627_v42, %v6102_v3  ;;  %v2196_v56 = vsel %vm455_vm0, %v2189_v40, %v6102_v3  ;;  %v4449_v57 = vunpack.c.l.bf16 %v5624_v45  ;;  %v5595_v42 = vld [vmem:[%s6742_s30 + $0x50] sm:$0xff]  }
  0x5f   : > { %v2339_v59 = vsel %vm455_vm0, %v2332_v43, %v6102_v3  ;;  %v4770_v60 = vsel %vm455_vm0, %v4763_v44, %v6102_v3  ;;  %v4913_v61 = vsel %vm455_vm0, %v4906_v48, %v6102_v3  ;;  %v4592_v62 = vunpack.c.h.bf16 %v5624_v45 }
  0x60   : > { %5943 = vrot.lane.b32.xlu1 %v5942_v29, %s6041_s3  ;;  %5938 = vrot.lane.b32.xlu0 %v5937_v30, %s6041_s3  ;;  %v5962_v63 = vpack.i.bf16 %v4945_v50, %v4802_v47  ;;  %v5957_v0 = vpack.i.bf16 %v2657_v52, %v2514_v51  ;;  %v2482_v2 = vsel %vm455_vm0, %v2475_v49, %v6102_v3  ;;  %v2161_v11 = vunpack.c.l.bf16 %v5560_v58 }
  0x61   : > { %v2625_v5 = vsel %vm455_vm0, %v2618_v53, %v6102_v3  ;;  %v5972_v9 = vpack.i.bf16 %v4631_v55, %v4488_v54  ;;  %v2200_v10 = vsel %vm486_vm2, %v2196_v56, %v6102_v3  ;;  %v2304_v12 = vunpack.c.h.bf16 %v5560_v58 }
  0x62   : > { %v2343_v14 = vsel %vm486_vm2, %v2339_v59, %v6102_v3  ;;  %v4774_v15 = vsel %vm486_vm2, %v4770_v60, %v6102_v3  ;;  %v4917_v16 = vsel %vm486_vm2, %v4913_v61, %v6102_v3  ;;  %v4456_v17 = vsel %vm455_vm0, %v4449_v57, %v6102_v3  ;;  %v5531_v59 = vld [vmem:[%s6742_s30 + $0x10] sm:$0xff]   ;;  %v5603_v60 = vld [vmem:[%s6742_s30 + $0x58] sm:$0xff]  }
  0x63   : > { %v2486_v18 = vsel %vm486_vm2, %v2482_v2, %v6102_v3  ;;  %v2629_v19 = vsel %vm486_vm2, %v2625_v5, %v6102_v3  ;;  %v4599_v20 = vsel %vm455_vm0, %v4592_v62, %v6102_v3  ;;  %v812_v22 = vunpack.c.l.bf16 %v5523_v7 }
  0x64   : > { %5953 = vrot.lane.b32.xlu1 %v5952_v31, %s6039_s25  ;;  %5948 = vrot.lane.b32.xlu0 %v5947_v46, %s6039_s25  ;;  %v2168_v23 = vsel %vm455_vm0, %v2161_v11, %v6102_v3  ;;  %v2311_v24 = vsel %vm455_vm0, %v2304_v12, %v6102_v3  ;;  %v4735_v25 = vunpack.c.l.bf16 %v5632_v13  ;;  %v4878_v26 = vunpack.c.h.bf16 %v5632_v13  ;;  %v526_v31 = vld [vmem:[%s6742_s30] sm:$0xff]  }
  0x65   : > { %v5967_v27 = vpack.i.bf16 %v2343_v14, %v2200_v10  ;;  %v5982_v28 = vpack.i.bf16 %v4917_v16, %v4774_v15  ;;  %v4460_v29 = vsel %vm459_vm3, %v4456_v17, %v6102_v3  ;;  %v955_v30 = vunpack.c.h.bf16 %v5523_v7  ;;  %v5611_v14 = vld [vmem:[%s6742_s30 + $0x60] sm:$0xff]  }
  0x66   : > { %v5977_v32 = vpack.i.bf16 %v2629_v19, %v2486_v18  ;;  %v4603_v33 = vsel %vm459_vm3, %v4599_v20, %v6102_v3  ;;  %v2447_v34 = vunpack.c.l.bf16 %v5568_v21  ;;  %v6816_v35 = vsel %vm532_vm4, %v812_v22, %v6102_v3 }
  0x67   : > { %v2172_v38 = vsel %vm459_vm3, %v2168_v23, %v6102_v3  ;;  %v2315_v39 = vsel %vm459_vm3, %v2311_v24, %v6102_v3  ;;  %v2590_v40 = vunpack.c.h.bf16 %v5568_v21  ;;  %v6829_v41 = vsel %vm532_vm4, %v955_v30, %v6102_v3  ;;  %v5619_v30 = vld [vmem:[%s6742_s30 + $0x68] sm:$0xff]  }
  0x68   : > { %5963 = vrot.lane.b32.xlu1 %v5962_v63, %s6039_s25  ;;  %5958 = vrot.lane.b32.xlu0 %v5957_v0, %s6039_s25  ;;  %v4742_v43 = vsel %vm455_vm0, %v4735_v25, %v6102_v3  ;;  %v4885_v44 = vsel %vm455_vm0, %v4878_v26, %v6102_v3  ;;  %v527_v45 = vunpack.c.l.bf16 %v526_v31  ;;  %v669_v46 = vunpack.c.h.bf16 %v526_v31  ;;  %v5539_v0 = vld [vmem:[%s6742_s30 + $0x18] sm:$0xff]   ;;  %v5547_v25 = vld [vmem:[%s6742_s30 + $0x20] sm:$0xff]  }
  0x69   : > { %v3100_v47 = vunpack.c.l.bf16 %v5587_v36  ;;  %v3243_v48 = vunpack.c.h.bf16 %v5587_v36  ;;  %v2814_v49 = vunpack.c.l.bf16 %v5579_v37  ;;  %v2957_v50 = vunpack.c.h.bf16 %v5579_v37  ;;  %v5555_v31 = vld [vmem:[%s6742_s30 + $0x28] sm:$0xff]  }
  0x6a   : > { %v2454_v51 = vsel %vm455_vm0, %v2447_v34, %v6102_v3  ;;  %v6846_v52 = vsel %vm532_vm4, %v527_v45, %v6102_v3  ;;  %v6851_v53 = vsel %vm532_vm4, %v669_v46, %v6102_v3  ;;  %v3386_v54 = vunpack.c.l.bf16 %v5595_v42 }
  0x6b   : > { %v5992_v55 = vpack.i.bf16 %v4603_v33, %v4460_v29  ;;  %v2597_v56 = vsel %vm455_vm0, %v2590_v40, %v6102_v3  ;;  %v6859_v57 = vsel %vm532_vm4, %v3100_v47, %v6102_v3  ;;  %v6864_v58 = vsel %vm532_vm4, %v3243_v48, %v6102_v3  ;;  %v5627_v33 = vld [vmem:[%s6742_s30 + $0x70] sm:$0xff]  }
  0x6c   : > { %5973 = vrot.lane.b32.xlu1 %v5972_v9, %s6040_s29  ;;  %5968 = vrot.lane.b32.xlu0 %v5967_v27, %s6040_s29  ;;  %v5987_v61 = vpack.i.bf16 %v2315_v39, %v2172_v38  ;;  %v4746_v62 = vsel %vm459_vm3, %v4742_v43, %v6102_v3  ;;  %v6874_v8 = vsel %vm532_vm4, %v2814_v49, %v6102_v3  ;;  %v3529_v9 = vunpack.c.h.bf16 %v5595_v42  ;;  %v5563_v48 = vld [vmem:[%s6742_s30 + $0x30] sm:$0xff]   ;;  %v5635_v49 = vld [vmem:[%s6742_s30 + $0x78] sm:$0xff]  }
  0x6d   : > { %v6879_v63 = vsel %vm532_vm4, %v2957_v50, %v6102_v3  ;;  %v4889_v2 = vsel %vm459_vm3, %v4885_v44, %v6102_v3  ;;  %v2458_v5 = vsel %vm459_vm3, %v2454_v51, %v6102_v3  ;;  %v6893_v7 = vsel %vm532_vm4, %v3386_v54, %v6102_v3  ;;  %v5571_v54 = vld [vmem:[%s6742_s30 + $0x38] sm:$0xff]  }
  0x6e   : > { %v2601_v10 = vsel %vm459_vm3, %v2597_v56, %v6102_v3  ;;  %v1098_v11 = vunpack.c.l.bf16 %v5531_v59  ;;  %v1241_v12 = vunpack.c.h.bf16 %v5531_v59  ;;  %v3672_v13 = vunpack.c.l.bf16 %v5603_v60 }
  0x6f   : > { %v6902_v15 = vsel %vm532_vm4, %v3529_v9, %v6102_v3  ;;  %v3815_v16 = vunpack.c.h.bf16 %v5603_v60  ;;  %v1384_v17 = vunpack.c.l.bf16 %v5539_v0  ;;  %v1527_v18 = vunpack.c.h.bf16 %v5539_v0 }
  0x70   : > { %5983 = vrot.lane.b32.xlu1 %v5982_v28, %s6040_s29  ;;  %5978 = vrot.lane.b32.xlu0 %v5977_v32, %s6040_s29  ;;  %v6907_v19 = vsel %vm532_vm4, %v1098_v11, %v6102_v3  ;;  %v6912_v20 = vsel %vm532_vm4, %v1241_v12, %v6102_v3  ;;  %v6917_v21 = vsel %vm532_vm4, %v3672_v13, %v6102_v3  ;;  %v3958_v24 = vunpack.c.l.bf16 %v5611_v14 }
  0x71   : > { %v6002_v22 = vpack.i.bf16 %v4889_v2, %v4746_v62  ;;  %v5997_v23 = vpack.i.bf16 %v2601_v10, %v2458_v5  ;;  %v6925_v26 = vsel %vm532_vm4, %v3815_v16, %v6102_v3  ;;  %v6930_v27 = vsel %vm532_vm4, %v1384_v17, %v6102_v3 }
  0x72   : > { %v6935_v28 = vsel %vm532_vm4, %v1527_v18, %v6102_v3  ;;  %v4101_v29 = vunpack.c.h.bf16 %v5611_v14  ;;  %v6942_v32 = vsel %vm532_vm4, %v3958_v24, %v6102_v3  ;;  %v1670_v36 = vunpack.c.l.bf16 %v5547_v25 }
  0x73   : > { %v1813_v37 = vunpack.c.h.bf16 %v5547_v25  ;;  %v4244_v38 = vunpack.c.l.bf16 %v5619_v30  ;;  %v4387_v39 = vunpack.c.h.bf16 %v5619_v30  ;;  %v1956_v40 = vunpack.c.l.bf16 %v5555_v31 }
  0x74   : > { %5993 = vrot.lane.b32.xlu1 %v5992_v55, %s6041_s3  ;;  %5988 = vrot.lane.b32.xlu0 %v5987_v61, %s6041_s3  ;;  %v6948_v34 = vsel %vm532_vm4, %v4101_v29, %v6102_v3  ;;  %v6955_v42 = vsel %vm532_vm4, %v1670_v36, %v6102_v3  ;;  %v2099_v44 = vunpack.c.h.bf16 %v5555_v31  ;;  %v4530_v45 = vunpack.c.l.bf16 %v5627_v33 }
  0x75   : > { %v6960_v43 = vsel %vm532_vm4, %v1813_v37, %v6102_v3  ;;  %v6965_v46 = vsel %vm532_vm4, %v4244_v38, %v6102_v3  ;;  %v6970_v47 = vsel %vm532_vm4, %v4387_v39, %v6102_v3  ;;  %v6977_v50 = vsel %vm532_vm4, %v1956_v40, %v6102_v3 }
  0x76   : > { %v6982_v51 = vsel %vm532_vm4, %v2099_v44, %v6102_v3  ;;  %v6988_v55 = vsel %vm532_vm4, %v4530_v45, %v6102_v3  ;;  %v4673_v56 = vunpack.c.h.bf16 %v5627_v33  ;;  %v2242_v59 = vunpack.c.l.bf16 %v5563_v48 }
  0x77   : > { %v2385_v60 = vunpack.c.h.bf16 %v5563_v48  ;;  %v4816_v61 = vunpack.c.l.bf16 %v5635_v49  ;;  %v4959_v0 = vunpack.c.h.bf16 %v5635_v49  ;;  %v2528_v2 = vunpack.c.l.bf16 %v5571_v54 }
  0x78   : > { %6003 = vrot.lane.b32.xlu1 %v6002_v22, %s6041_s3  ;;  %5998 = vrot.lane.b32.xlu0 %v5997_v23, %s6041_s3  ;;  %v6993_v62 = vsel %vm532_vm4, %v4673_v56, %v6102_v3  ;;  %v2671_v5 = vunpack.c.h.bf16 %v5571_v54  ;;  %v6998_v9 = vsel %vm532_vm4, %v2242_v59, %v6102_v3  ;;  %v830_v29 = vsel %vm7030_vm5, %v6816_v35, %v6104_v4 }
  0x79   : > { %v7003_v10 = vsel %vm532_vm4, %v2385_v60, %v6102_v3  ;;  %v7008_v11 = vsel %vm532_vm4, %v4816_v61, %v6102_v3  ;;  %v7013_v12 = vsel %vm532_vm4, %v4959_v0, %v6102_v3  ;;  %v7018_v13 = vsel %vm532_vm4, %v2528_v2, %v6102_v3 }
  0x7a   : > { %v7023_v14 = vsel %vm532_vm4, %v2671_v5, %v6102_v3  ;;  %v973_v33 = vsel %vm7030_vm5, %v6829_v41, %v6104_v4  ;;  %v545_v6 = vsel %vm7030_vm5, %v6846_v52, %v6104_v4  ;;  %v687_v36 = vsel %vm7030_vm5, %v6851_v53, %v6104_v4 }
  0x7b   : > { %v3118_v44 = vsel %vm7030_vm5, %v6859_v57, %v6104_v4  ;;  %v3261_v45 = vsel %vm7030_vm5, %v6864_v58, %v6104_v4  ;;  %v2832_v48 = vsel %vm7030_vm5, %v6874_v8, %v6104_v4  ;;  %v2975_v49 = vsel %vm7030_vm5, %v6879_v63, %v6104_v4 }
  0x8e   : > { %v5779_v16 = vpop.permute.xlu1 %5778  ;;  %v5769_v17 = vpop.permute.xlu0 %5768 }
  0x8f   : > { %v5781_v22 = vunpack.i.h.bf16 %v5779_v16  ;;  %v5780_v23 = vunpack.i.l.bf16 %v5779_v16  ;;  %v5771_v24 = vunpack.i.h.bf16 %v5769_v17  ;;  %v5770_v25 = vunpack.i.l.bf16 %v5769_v17 }
  0x91   : > { %v977_v35 = vsel %vm7030_vm5, %v5781_v22, %v6104_v4  ;;  %v834_v37 = vsel %vm7030_vm5, %v5780_v23, %v6104_v4  ;;  %v691_v41 = vsel %vm7030_vm5, %v5771_v24, %v6104_v4  ;;  %v549_v52 = vsel %vm7030_vm5, %v5770_v25, %v6104_v4 }
  0x92   : > { %v5784_v30 = vpop.permute.xlu1 %5783  ;;  %v5774_v31 = vpop.permute.xlu0 %5773  ;;  %v7078_v0 = vmax.f32 %v973_v33, %v977_v35  ;;  %v7080_v2 = vmax.f32 %v830_v29, %v834_v37  ;;  %v695_v58 = vmax.f32 %v687_v36, %v691_v41  ;;  %v553_v5 = vmax.f32 %v545_v6, %v549_v52 }
  0x93   : > { %v5786_v38 = vunpack.i.h.bf16 %v5784_v30  ;;  %v5785_v39 = vunpack.i.l.bf16 %v5784_v30  ;;  %v5776_v40 = vunpack.i.h.bf16 %v5774_v31  ;;  %v5775_v53 = vunpack.i.l.bf16 %v5774_v31 }
  0x95   : > { %v3265_v8 = vsel %vm7030_vm5, %v5786_v38, %v6104_v4  ;;  %v3122_v63 = vsel %vm7030_vm5, %v5785_v39, %v6104_v4  ;;  %v2979_v16 = vsel %vm7030_vm5, %v5776_v40, %v6104_v4  ;;  %v2836_v17 = vsel %vm7030_vm5, %v5775_v53, %v6104_v4 }
  0x96   : > { %v5794_v54 = vpop.permute.xlu1 %5793  ;;  %v5789_v56 = vpop.permute.xlu0 %5788  ;;  %v3269_v35 = vmax.f32 %v3261_v45, %v3265_v8  ;;  %v3126_v37 = vmax.f32 %v3118_v44, %v3122_v63  ;;  %v2983_v41 = vmax.f32 %v2975_v49, %v2979_v16  ;;  %v2840_v52 = vmax.f32 %v2832_v48, %v2836_v17 }
  0x97   : > { %v5796_v59 = vunpack.i.h.bf16 %v5794_v54  ;;  %v5795_v60 = vunpack.i.l.bf16 %v5794_v54  ;;  %v5791_v57 = vunpack.i.h.bf16 %v5789_v56  ;;  %v5790_v61 = vunpack.i.l.bf16 %v5789_v56 }
  0x99   : > { %v2987_v22 = vsel %vm7030_vm5, %v5796_v59, %v6104_v4  ;;  %v2844_v23 = vsel %vm7030_vm5, %v5795_v60, %v6104_v4  ;;  %v699_v24 = vsel %vm7030_vm5, %v5791_v57, %v6104_v4  ;;  %v557_v25 = vsel %vm7030_vm5, %v5790_v61, %v6104_v4 }
  0x9a   : > { %v5804_v29 = vpop.permute.xlu1 %5803  ;;  %v5799_v30 = vpop.permute.xlu0 %5798  ;;  %v2991_v45 = vmax.f32 %v2983_v41, %v2987_v22  ;;  %v2848_v44 = vmax.f32 %v2840_v52, %v2844_v23  ;;  %v703_v49 = vmax.f32 %v695_v58, %v699_v24  ;;  %v561_v48 = vmax.f32 %v553_v5, %v557_v25 }
  0x9b   : > { %v5806_v31 = vunpack.i.h.bf16 %v5804_v29  ;;  %v5805_v33 = vunpack.i.l.bf16 %v5804_v29  ;;  %v5801_v6 = vunpack.i.h.bf16 %v5799_v30  ;;  %v5800_v36 = vunpack.i.l.bf16 %v5799_v30 }
  0x9d   : > { %v3273_v38 = vsel %vm7030_vm5, %v5806_v31, %v6104_v4  ;;  %v3130_v39 = vsel %vm7030_vm5, %v5805_v33, %v6104_v4  ;;  %v985_v40 = vsel %vm7030_vm5, %v5801_v6, %v6104_v4  ;;  %v842_v53 = vsel %vm7030_vm5, %v5800_v36, %v6104_v4 }
  0x9e   : > { %v5814_v54 = vpop.permute.xlu1 %5813  ;;  %v5809_v56 = vpop.permute.xlu0 %5808  ;;  %v3277_v8 = vmax.f32 %v3269_v35, %v3273_v38  ;;  %v3134_v63 = vmax.f32 %v3126_v37, %v3130_v39  ;;  %v989_v16 = vmax.f32 %v7078_v0, %v985_v40  ;;  %v846_v17 = vmax.f32 %v7080_v2, %v842_v53 }
  0x9f   : > { %v5816_v59 = vunpack.i.h.bf16 %v5814_v54  ;;  %v5815_v60 = vunpack.i.l.bf16 %v5814_v54  ;;  %v5811_v57 = vunpack.i.h.bf16 %v5809_v56  ;;  %v5810_v61 = vunpack.i.l.bf16 %v5809_v56 }
  0xa0   : > { %v6042_v35 = vmov 0.0  }
  0xa1   : > { %v2995_v29 = vsel %vm7030_vm5, %v5816_v59, %v6104_v4  ;;  %v2852_v58 = vsel %vm7030_vm5, %v5815_v60, %v6104_v4  ;;  %v707_v5 = vsel %vm7030_vm5, %v5811_v57, %v6104_v4  ;;  %v565_v22 = vsel %vm7030_vm5, %v5810_v61, %v6104_v4 }
  0xa2   : > { %v2999_v23 = vmax.f32 %v2991_v45, %v2995_v29  ;;  %v2856_v0 = vmax.f32 %v2848_v44, %v2852_v58  ;;  %v711_v24 = vmax.f32 %v703_v49, %v707_v5  ;;  %v569_v2 = vmax.f32 %v561_v48, %v565_v22  ;;  %v5824_v25 = vpop.permute.xlu1 %5823  ;;  %v5819_v30 = vpop.permute.xlu0 %5818 }
  0xa3   : > { %v5826_v31 = vunpack.i.h.bf16 %v5824_v25  ;;  %v5825_v33 = vunpack.i.l.bf16 %v5824_v25  ;;  %v5821_v6 = vunpack.i.h.bf16 %v5819_v30  ;;  %v5820_v36 = vunpack.i.l.bf16 %v5819_v30 }
  0xa4   : > { %v3002_v37 = vpack.c.bf16 %v6042_v35, %v2999_v23  ;;  %v2859_v41 = vpack.c.bf16 %v6042_v35, %v2856_v0  ;;  %v714_v52 = vpack.c.bf16 %v6042_v35, %v711_v24  ;;  %v571_v38 = vpack.c.bf16 %v6042_v35, %v569_v2 }
  0xa5   : > { %v3281_v39 = vsel %vm7030_vm5, %v5826_v31, %v6104_v4  ;;  %v3138_v40 = vsel %vm7030_vm5, %v5825_v33, %v6104_v4  ;;  %v993_v53 = vsel %vm7030_vm5, %v5821_v6, %v6104_v4  ;;  %v850_v45 = vsel %vm7030_vm5, %v5820_v36, %v6104_v4 }
  0xa6   : > { %3004 = vst [vmem:[#allocation22 + $0x44] sm:$0xf] %v3002_v37  ;;  %2861 = vst [vmem:[#allocation22 + $0x40] sm:$0xf] %v2859_v41  ;;  %v3285_v44 = vmax.f32 %v3277_v8, %v3281_v39  ;;  %v3142_v49 = vmax.f32 %v3134_v63, %v3138_v40  ;;  %v997_v48 = vmax.f32 %v989_v16, %v993_v53  ;;  %v5834_v56 = vpop.permute.xlu1 %5833  ;;  %v5829_v59 = vpop.permute.xlu0 %5828 }
  0xa7   : > { %716 = vst [vmem:[#allocation22 + $0x4] sm:$0xf] %v714_v52  ;;  %573 = vst [vmem:[#allocation22] sm:$0xf] %v571_v38  ;;  %v854_v54 = vmax.f32 %v846_v17, %v850_v45  ;;  %v5836_v60 = vunpack.i.h.bf16 %v5834_v56  ;;  %v5835_v57 = vunpack.i.l.bf16 %v5834_v56  ;;  %v5831_v61 = vunpack.i.h.bf16 %v5829_v59 }
  0xa8   : > { %v5830_v29 = vunpack.i.l.bf16 %v5829_v59  ;;  %v3288_v58 = vpack.c.bf16 %v6042_v35, %v3285_v44  ;;  %v3145_v5 = vpack.c.bf16 %v6042_v35, %v3142_v49  ;;  %v1000_v22 = vpack.c.bf16 %v6042_v35, %v997_v48 }
  0xa9   : > { %v857_v23 = vpack.c.bf16 %v6042_v35, %v854_v54  ;;  %v3404_v16 = vsel %vm7030_vm5, %v6893_v7, %v6104_v4  ;;  %v3547_v17 = vsel %vm7030_vm5, %v6902_v15, %v6104_v4  ;;  %v1116_v0 = vsel %vm7030_vm5, %v6907_v19, %v6104_v4 }
  0xaa   : > { %3290 = vst [vmem:[#allocation22 + $0x4c] sm:$0xf] %v3288_v58  ;;  %3147 = vst [vmem:[#allocation22 + $0x48] sm:$0xf] %v3145_v5  ;;  %v5844_v8 = vpop.permute.xlu1 %5843  ;;  %v5839_v63 = vpop.permute.xlu0 %5838  ;;  %v1259_v24 = vsel %vm7030_vm5, %v6912_v20, %v6104_v4  ;;  %v3551_v2 = vsel %vm7030_vm5, %v5836_v60, %v6104_v4  ;;  %v3408_v7 = vsel %vm7030_vm5, %v5835_v57, %v6104_v4 }
  0xab   : > { %1002 = vst [vmem:[#allocation22 + $0xc] sm:$0xf] %v1000_v22  ;;  %859 = vst [vmem:[#allocation22 + $0x8] sm:$0xf] %v857_v23  ;;  %v1263_v15 = vsel %vm7030_vm5, %v5831_v61, %v6104_v4  ;;  %v1120_v19 = vsel %vm7030_vm5, %v5830_v29, %v6104_v4  ;;  %v5846_v25 = vunpack.i.h.bf16 %v5844_v8  ;;  %v5845_v30 = vunpack.i.l.bf16 %v5844_v8 }
  0xac   : > { %v5841_v31 = vunpack.i.h.bf16 %v5839_v63  ;;  %v5840_v20 = vunpack.i.l.bf16 %v5839_v63  ;;  %v3690_v6 = vsel %vm7030_vm5, %v6917_v21, %v6104_v4  ;;  %v3833_v36 = vsel %vm7030_vm5, %v6925_v26, %v6104_v4 }
  0xad   : > { %v1402_v37 = vsel %vm7030_vm5, %v6930_v27, %v6104_v4  ;;  %v1545_v41 = vsel %vm7030_vm5, %v6935_v28, %v6104_v4  ;;  %v6016_v39 = vld [vmem:[#allocation22 + $0x40] sm:$0xff]   ;;  %v3555_v44 = vmax.f32 %v3547_v17, %v3551_v2  ;;  %v3412_v26 = vmax.f32 %v3404_v16, %v3408_v7 }
  0xae   : > { %v6015_v33 = vld [vmem:[#allocation22] sm:$0xff]   ;;  %v5854_v52 = vpop.permute.xlu1 %5853  ;;  %v5849_v38 = vpop.permute.xlu0 %5848  ;;  %v1267_v49 = vmax.f32 %v1259_v24, %v1263_v15  ;;  %v1124_v48 = vmax.f32 %v1116_v0, %v1120_v19  ;;  %5723 = vmatprep.mubr.bf16.mxu1 %v6016_v39  ;;  %v3837_v27 = vsel %vm7030_vm5, %v5846_v25, %v6104_v4  ;;  %v3694_v28 = vsel %vm7030_vm5, %v5845_v30, %v6104_v4 }
  0xaf   : > { %v5856_v40 = vunpack.i.h.bf16 %v5854_v52  ;;  %v5855_v21 = vunpack.i.l.bf16 %v5854_v52  ;;  %v5851_v53 = vunpack.i.h.bf16 %v5849_v38  ;;  %v5850_v45 = vunpack.i.l.bf16 %v5849_v38  ;;  %5707 = vmatprep.mubr.bf16.mxu0 %v6015_v33 }
  0xb0   : > { %v1549_v54 = vsel %vm7030_vm5, %v5841_v31, %v6104_v4  ;;  %v1406_v56 = vsel %vm7030_vm5, %v5840_v20, %v6104_v4  ;;  %v3841_v17 = vmax.f32 %v3833_v36, %v3837_v27  ;;  %v3698_v0 = vmax.f32 %v3690_v6, %v3694_v28 }
  0xb1   : > { %v3559_v60 = vsel %vm7030_vm5, %v5856_v40, %v6104_v4  ;;  %v3416_v57 = vsel %vm7030_vm5, %v5855_v21, %v6104_v4  ;;  %v1271_v61 = vsel %vm7030_vm5, %v5851_v53, %v6104_v4  ;;  %v1128_v29 = vsel %vm7030_vm5, %v5850_v45, %v6104_v4  ;;  %v6018_v22 = vld [vmem:[#allocation22 + $0x48] sm:$0xff]  }
  0xb2   : > { %v6017_v59 = vld [vmem:[#allocation22 + $0x8] sm:$0xff]   ;;  %v5864_v58 = vpop.permute.xlu1 %5863  ;;  %v5859_v5 = vpop.permute.xlu0 %5858  ;;  %v1553_v24 = vmax.f32 %v1545_v41, %v1549_v54  ;;  %v1410_v2 = vmax.f32 %v1402_v37, %v1406_v56  ;;  %5724 = vmatmul.mubr.bf16.vlgmr.msra.gmra.mrb[0].mxu1 %v6018_v22  ;;  %v3420_v30 = vmax.f32 %v3412_v26, %v3416_v57  ;;  %v3563_v31 = vmax.f32 %v3555_v44, %v3559_v60 }
  0xb3   : > { %v5866_v23 = vunpack.i.h.bf16 %v5864_v58  ;;  %v5865_v8 = vunpack.i.l.bf16 %v5864_v58  ;;  %v5861_v63 = vunpack.i.h.bf16 %v5859_v5  ;;  %v5860_v16 = vunpack.i.l.bf16 %v5859_v5  ;;  %5708 = vmatmul.mubr.bf16.vlgmr.msra.gmra.mrb[0].mxu0 %v6017_v59 }
  0xb4   : > { %v1132_v20 = vmax.f32 %v1124_v48, %v1128_v29  ;;  %v1275_v33 = vmax.f32 %v1267_v49, %v1271_v61 }
  0xb5   : > { %v3845_v7 = vsel %vm7030_vm5, %v5866_v23, %v6104_v4  ;;  %v3702_v15 = vsel %vm7030_vm5, %v5865_v8, %v6104_v4  ;;  %v1557_v19 = vsel %vm7030_vm5, %v5861_v63, %v6104_v4  ;;  %v1414_v25 = vsel %vm7030_vm5, %v5860_v16, %v6104_v4 }
  0xb6   : > { %v5874_v6 = vpop.permute.xlu1 %5873  ;;  %v5869_v36 = vpop.permute.xlu0 %5868  ;;  %v3706_v39 = vmax.f32 %v3698_v0, %v3702_v15  ;;  %v3849_v40 = vmax.f32 %v3841_v17, %v3845_v7  ;;  %v1418_v21 = vmax.f32 %v1410_v2, %v1414_v25  ;;  %v1561_v53 = vmax.f32 %v1553_v24, %v1557_v19 }
  0xb7   : > { %v5876_v37 = vunpack.i.h.bf16 %v5874_v6  ;;  %v5875_v41 = vunpack.i.l.bf16 %v5874_v6  ;;  %v5871_v52 = vunpack.i.h.bf16 %v5869_v36  ;;  %v5870_v38 = vunpack.i.l.bf16 %v5869_v36 }
  0xb9   : > { %v3567_v45 = vsel %vm7030_vm5, %v5876_v37, %v6104_v4  ;;  %v3424_v44 = vsel %vm7030_vm5, %v5875_v41, %v6104_v4  ;;  %v1279_v26 = vsel %vm7030_vm5, %v5871_v52, %v6104_v4  ;;  %v1136_v49 = vsel %vm7030_vm5, %v5870_v38, %v6104_v4 }
  0xba   : > { %v3428_v48 = vmax.f32 %v3420_v30, %v3424_v44  ;;  %v3571_v27 = vmax.f32 %v3563_v31, %v3567_v45  ;;  %v1140_v28 = vmax.f32 %v1132_v20, %v1136_v49  ;;  %v1283_v54 = vmax.f32 %v1275_v33, %v1279_v26  ;;  %v5884_v56 = vpop.permute.xlu1 %5883  ;;  %v5879_v59 = vpop.permute.xlu0 %5878 }
  0xbb   : > { %v5886_v60 = vunpack.i.h.bf16 %v5884_v56  ;;  %v5885_v57 = vunpack.i.l.bf16 %v5884_v56  ;;  %v5881_v61 = vunpack.i.h.bf16 %v5879_v59  ;;  %v5880_v29 = vunpack.i.l.bf16 %v5879_v59 }
  0xbc   : > { %v3431_v58 = vpack.c.bf16 %v6042_v35, %v3428_v48  ;;  %v3574_v5 = vpack.c.bf16 %v6042_v35, %v3571_v27  ;;  %v1143_v22 = vpack.c.bf16 %v6042_v35, %v1140_v28  ;;  %v1286_v23 = vpack.c.bf16 %v6042_v35, %v1283_v54 }
  0xbd   : > { %v3853_v8 = vsel %vm7030_vm5, %v5886_v60, %v6104_v4  ;;  %v3710_v63 = vsel %vm7030_vm5, %v5885_v57, %v6104_v4  ;;  %v1565_v16 = vsel %vm7030_vm5, %v5881_v61, %v6104_v4  ;;  %v1422_v17 = vsel %vm7030_vm5, %v5880_v29, %v6104_v4 }
  0xbe   : > { %3433 = vst [vmem:[#allocation22 + $0x50] sm:$0xf] %v3431_v58  ;;  %3576 = vst [vmem:[#allocation22 + $0x54] sm:$0xf] %v3574_v5  ;;  %v3714_v0 = vmax.f32 %v3706_v39, %v3710_v63  ;;  %v3857_v24 = vmax.f32 %v3849_v40, %v3853_v8  ;;  %v1426_v2 = vmax.f32 %v1418_v21, %v1422_v17  ;;  %v5894_v15 = vpop.permute.xlu1 %5893  ;;  %v5889_v19 = vpop.permute.xlu0 %5888 }
  0xbf   : > { %1145 = vst [vmem:[#allocation22 + $0x10] sm:$0xf] %v1143_v22  ;;  %1288 = vst [vmem:[#allocation22 + $0x14] sm:$0xf] %v1286_v23  ;;  %v1569_v7 = vmax.f32 %v1561_v53, %v1565_v16  ;;  %v5896_v25 = vunpack.i.h.bf16 %v5894_v15  ;;  %v5895_v30 = vunpack.i.l.bf16 %v5894_v15  ;;  %v5891_v31 = vunpack.i.h.bf16 %v5889_v19 }
  0xc0   : > { %v5890_v20 = vunpack.i.l.bf16 %v5889_v19  ;;  %v3717_v33 = vpack.c.bf16 %v6042_v35, %v3714_v0  ;;  %v3860_v6 = vpack.c.bf16 %v6042_v35, %v3857_v24  ;;  %v1429_v36 = vpack.c.bf16 %v6042_v35, %v1426_v2 }
  0xc1   : > { %v1572_v37 = vpack.c.bf16 %v6042_v35, %v1569_v7  ;;  %v3976_v38 = vsel %vm7030_vm5, %v6942_v32, %v6104_v4  ;;  %v4119_v39 = vsel %vm7030_vm5, %v6948_v34, %v6104_v4  ;;  %v1688_v40 = vsel %vm7030_vm5, %v6955_v42, %v6104_v4 }
  0xc2   : > { %3719 = vst [vmem:[#allocation22 + $0x58] sm:$0xf] %v3717_v33  ;;  %3862 = vst [vmem:[#allocation22 + $0x5c] sm:$0xf] %v3860_v6  ;;  %v5904_v41 = vpop.permute.xlu1 %5903  ;;  %v5899_v52 = vpop.permute.xlu0 %5898  ;;  %v1831_v21 = vsel %vm7030_vm5, %v6960_v43, %v6104_v4  ;;  %v4123_v53 = vsel %vm7030_vm5, %v5896_v25, %v6104_v4  ;;  %v3980_v32 = vsel %vm7030_vm5, %v5895_v30, %v6104_v4 }
  0xc3   : > { %1431 = vst [vmem:[#allocation22 + $0x18] sm:$0xf] %v1429_v36  ;;  %1574 = vst [vmem:[#allocation22 + $0x1c] sm:$0xf] %v1572_v37  ;;  %v1835_v34 = vsel %vm7030_vm5, %v5891_v31, %v6104_v4  ;;  %v1692_v42 = vsel %vm7030_vm5, %v5890_v20, %v6104_v4  ;;  %v5906_v45 = vunpack.i.h.bf16 %v5904_v41  ;;  %v5905_v44 = vunpack.i.l.bf16 %v5904_v41 }
  0xc4   : > { %v5901_v26 = vunpack.i.h.bf16 %v5899_v52  ;;  %v5900_v43 = vunpack.i.l.bf16 %v5899_v52  ;;  %v4262_v48 = vsel %vm7030_vm5, %v6965_v46, %v6104_v4  ;;  %v4405_v27 = vsel %vm7030_vm5, %v6970_v47, %v6104_v4 }
  0xc5   : > { %v1974_v28 = vsel %vm7030_vm5, %v6977_v50, %v6104_v4  ;;  %v2117_v54 = vsel %vm7030_vm5, %v6982_v51, %v6104_v4  ;;  %v6020_v60 = vld [vmem:[#allocation22 + $0x50] sm:$0xff]   ;;  %v4127_v58 = vmax.f32 %v4119_v39, %v4123_v53  ;;  %v3984_v47 = vmax.f32 %v3976_v38, %v3980_v32 }
  0xc6   : > { %v6019_v49 = vld [vmem:[#allocation22 + $0x10] sm:$0xff]   ;;  %v5914_v56 = vpop.permute.xlu1 %5913  ;;  %v5909_v59 = vpop.permute.xlu0 %5908  ;;  %v1839_v5 = vmax.f32 %v1831_v21, %v1835_v34  ;;  %v1696_v22 = vmax.f32 %v1688_v40, %v1692_v42  ;;  %5727 = vmatprep.mubr.bf16.mxu1 %v6020_v60  ;;  %v4409_v50 = vsel %vm7030_vm5, %v5906_v45, %v6104_v4  ;;  %v4266_v51 = vsel %vm7030_vm5, %v5905_v44, %v6104_v4 }
  0xc7   : > { %v5916_v57 = vunpack.i.h.bf16 %v5914_v56  ;;  %v5915_v46 = vunpack.i.l.bf16 %v5914_v56  ;;  %v5911_v61 = vunpack.i.h.bf16 %v5909_v59  ;;  %v5910_v29 = vunpack.i.l.bf16 %v5909_v59  ;;  %5711 = vmatprep.mubr.bf16.mxu0 %v6019_v49 }
  0xc8   : > { %v2121_v23 = vsel %vm7030_vm5, %v5901_v26, %v6104_v4  ;;  %v1978_v8 = vsel %vm7030_vm5, %v5900_v43, %v6104_v4  ;;  %v4413_v20 = vmax.f32 %v4405_v27, %v4409_v50  ;;  %v4270_v33 = vmax.f32 %v4262_v48, %v4266_v51 }
  0xc9   : > { %v4131_v16 = vsel %vm7030_vm5, %v5916_v57, %v6104_v4  ;;  %v3988_v17 = vsel %vm7030_vm5, %v5915_v46, %v6104_v4  ;;  %v1843_v0 = vsel %vm7030_vm5, %v5911_v61, %v6104_v4  ;;  %v1700_v24 = vsel %vm7030_vm5, %v5910_v29, %v6104_v4  ;;  %v6022_v15 = vld [vmem:[#allocation22 + $0x58] sm:$0xff]  }
  0xca   : > { %v6021_v63 = vld [vmem:[#allocation22 + $0x18] sm:$0xff]   ;;  %v5924_v2 = vpop.permute.xlu1 %5923  ;;  %v5919_v7 = vpop.permute.xlu0 %5918  ;;  %v2125_v6 = vmax.f32 %v2117_v54, %v2121_v23  ;;  %v1982_v36 = vmax.f32 %v1974_v28, %v1978_v8  ;;  %5728 = vmatmul.mubr.bf16.gmra.mrb[4].mxu1 %v6022_v15  ;;  %v3992_v39 = vmax.f32 %v3984_v47, %v3988_v17  ;;  %v4135_v40 = vmax.f32 %v4127_v58, %v4131_v16 }
  0xcb   : > { %v5926_v19 = vunpack.i.h.bf16 %v5924_v2  ;;  %v5925_v25 = vunpack.i.l.bf16 %v5924_v2  ;;  %v5921_v30 = vunpack.i.h.bf16 %v5919_v7  ;;  %v5920_v31 = vunpack.i.l.bf16 %v5919_v7  ;;  %5712 = vmatmul.mubr.bf16.gmra.mrb[4].mxu0 %v6021_v63 }
  0xcc   : > { %v1704_v21 = vmax.f32 %v1696_v22, %v1700_v24  ;;  %v1847_v53 = vmax.f32 %v1839_v5, %v1843_v0 }
  0xcd   : > { %v4417_v37 = vsel %vm7030_vm5, %v5926_v19, %v6104_v4  ;;  %v4274_v41 = vsel %vm7030_vm5, %v5925_v25, %v6104_v4  ;;  %v2129_v52 = vsel %vm7030_vm5, %v5921_v30, %v6104_v4  ;;  %v1986_v38 = vsel %vm7030_vm5, %v5920_v31, %v6104_v4 }
  0xce   : > { %v5934_v32 = vpop.permute.xlu1 %5933  ;;  %v5929_v34 = vpop.permute.xlu0 %5928  ;;  %v4278_v43 = vmax.f32 %v4270_v33, %v4274_v41  ;;  %v4421_v49 = vmax.f32 %v4413_v20, %v4417_v37  ;;  %v1990_v48 = vmax.f32 %v1982_v36, %v1986_v38  ;;  %v2133_v27 = vmax.f32 %v2125_v6, %v2129_v52 }
  0xcf   : > { %v5936_v42 = vunpack.i.h.bf16 %v5934_v32  ;;  %v5935_v45 = vunpack.i.l.bf16 %v5934_v32  ;;  %v5931_v44 = vunpack.i.h.bf16 %v5929_v34  ;;  %v5930_v26 = vunpack.i.l.bf16 %v5929_v34 }
  0xd0   : > { %v2403_v32 = vsel %vm7030_vm5, %v7003_v10, %v6104_v4 }
  0xd1   : > { %v4139_v28 = vsel %vm7030_vm5, %v5936_v42, %v6104_v4  ;;  %v3996_v54 = vsel %vm7030_vm5, %v5935_v45, %v6104_v4  ;;  %v1851_v56 = vsel %vm7030_vm5, %v5931_v44, %v6104_v4  ;;  %v1708_v59 = vsel %vm7030_vm5, %v5930_v26, %v6104_v4 }
  0xd2   : > { %v4000_v60 = vmax.f32 %v3992_v39, %v3996_v54  ;;  %v4143_v57 = vmax.f32 %v4135_v40, %v4139_v28  ;;  %v1712_v46 = vmax.f32 %v1704_v21, %v1708_v59  ;;  %v1855_v61 = vmax.f32 %v1847_v53, %v1851_v56  ;;  %v5944_v29 = vpop.permute.xlu1 %5943  ;;  %v5939_v58 = vpop.permute.xlu0 %5938 }
  0xd3   : > { %v5946_v47 = vunpack.i.h.bf16 %v5944_v29  ;;  %v5945_v5 = vunpack.i.l.bf16 %v5944_v29  ;;  %v5941_v22 = vunpack.i.h.bf16 %v5939_v58  ;;  %v5940_v50 = vunpack.i.l.bf16 %v5939_v58 }
  0xd4   : > { %v4003_v51 = vpack.c.bf16 %v6042_v35, %v4000_v60  ;;  %v4146_v23 = vpack.c.bf16 %v6042_v35, %v4143_v57  ;;  %v1715_v8 = vpack.c.bf16 %v6042_v35, %v1712_v46  ;;  %v1858_v63 = vpack.c.bf16 %v6042_v35, %v1855_v61 }
  0xd5   : > { %v4425_v16 = vsel %vm7030_vm5, %v5946_v47, %v6104_v4  ;;  %v4282_v17 = vsel %vm7030_vm5, %v5945_v5, %v6104_v4  ;;  %v2137_v0 = vsel %vm7030_vm5, %v5941_v22, %v6104_v4  ;;  %v1994_v24 = vsel %vm7030_vm5, %v5940_v50, %v6104_v4 }
  0xd6   : > { %4005 = vst [vmem:[#allocation22 + $0x60] sm:$0xf] %v4003_v51  ;;  %4148 = vst [vmem:[#allocation22 + $0x64] sm:$0xf] %v4146_v23  ;;  %v4286_v2 = vmax.f32 %v4278_v43, %v4282_v17  ;;  %v4429_v7 = vmax.f32 %v4421_v49, %v4425_v16  ;;  %v1998_v15 = vmax.f32 %v1990_v48, %v1994_v24  ;;  %v5954_v25 = vpop.permute.xlu1 %5953  ;;  %v5949_v30 = vpop.permute.xlu0 %5948 }
  0xd7   : > { %1717 = vst [vmem:[#allocation22 + $0x20] sm:$0xf] %v1715_v8  ;;  %1860 = vst [vmem:[#allocation22 + $0x24] sm:$0xf] %v1858_v63  ;;  %v2141_v19 = vmax.f32 %v2133_v27, %v2137_v0  ;;  %v5956_v31 = vunpack.i.h.bf16 %v5954_v25  ;;  %v5955_v20 = vunpack.i.l.bf16 %v5954_v25  ;;  %v5951_v33 = vunpack.i.h.bf16 %v5949_v30 }
  0xd8   : > { %v5950_v6 = vunpack.i.l.bf16 %v5949_v30  ;;  %v4289_v36 = vpack.c.bf16 %v6042_v35, %v4286_v2  ;;  %v4432_v37 = vpack.c.bf16 %v6042_v35, %v4429_v7  ;;  %v2001_v41 = vpack.c.bf16 %v6042_v35, %v1998_v15 }
  0xd9   : > { %v2144_v52 = vpack.c.bf16 %v6042_v35, %v2141_v19  ;;  %v4548_v40 = vsel %vm7030_vm5, %v6988_v55, %v6104_v4  ;;  %v4691_v21 = vsel %vm7030_vm5, %v6993_v62, %v6104_v4  ;;  %v2260_v53 = vsel %vm7030_vm5, %v6998_v9, %v6104_v4 }
  0xda   : > { %4291 = vst [vmem:[#allocation22 + $0x68] sm:$0xf] %v4289_v36  ;;  %4434 = vst [vmem:[#allocation22 + $0x6c] sm:$0xf] %v4432_v37  ;;  %v5964_v38 = vpop.permute.xlu1 %5963  ;;  %v5959_v39 = vpop.permute.xlu0 %5958  ;;  %v4695_v34 = vsel %vm7030_vm5, %v5956_v31, %v6104_v4  ;;  %v4552_v55 = vsel %vm7030_vm5, %v5955_v20, %v6104_v4  ;;  %v2407_v62 = vsel %vm7030_vm5, %v5951_v33, %v6104_v4 }
  0xdb   : > { %2003 = vst [vmem:[#allocation22 + $0x28] sm:$0xf] %v2001_v41  ;;  %2146 = vst [vmem:[#allocation22 + $0x2c] sm:$0xf] %v2144_v52  ;;  %v2264_v9 = vsel %vm7030_vm5, %v5950_v6, %v6104_v4  ;;  %v5966_v42 = vunpack.i.h.bf16 %v5964_v38  ;;  %v5965_v45 = vunpack.i.l.bf16 %v5964_v38  ;;  %v5961_v44 = vunpack.i.h.bf16 %v5959_v39 }
  0xdc   : > { %v5960_v10 = vunpack.i.l.bf16 %v5959_v39  ;;  %v4834_v43 = vsel %vm7030_vm5, %v7008_v11, %v6104_v4  ;;  %v4977_v49 = vsel %vm7030_vm5, %v7013_v12, %v6104_v4  ;;  %v2546_v48 = vsel %vm7030_vm5, %v7018_v13, %v6104_v4 }
  0xdd   : > { %v2689_v27 = vsel %vm7030_vm5, %v7023_v14, %v6104_v4  ;;  %v6024_v56 = vld [vmem:[#allocation22 + $0x60] sm:$0xff]   ;;  %v4699_v46 = vmax.f32 %v4691_v21, %v4695_v34  ;;  %v4556_v12 = vmax.f32 %v4548_v40, %v4552_v55  ;;  %v2411_v61 = vmax.f32 %v2403_v32, %v2407_v62 }
  0xde   : > { %v6023_v26 = vld [vmem:[#allocation22 + $0x20] sm:$0xff]   ;;  %v5974_v28 = vpop.permute.xlu1 %5973  ;;  %v5969_v54 = vpop.permute.xlu0 %5968  ;;  %v2268_v29 = vmax.f32 %v2260_v53, %v2264_v9  ;;  %5731 = vmatprep.mubr.bf16.mxu1 %v6024_v56  ;;  %v4981_v13 = vsel %vm7030_vm5, %v5966_v42, %v6104_v4  ;;  %v4838_v14 = vsel %vm7030_vm5, %v5965_v45, %v6104_v4  ;;  %v2693_v58 = vsel %vm7030_vm5, %v5961_v44, %v6104_v4 }
  0xdf   : > { %v5976_v59 = vunpack.i.h.bf16 %v5974_v28  ;;  %v5975_v11 = vunpack.i.l.bf16 %v5974_v28  ;;  %v5971_v60 = vunpack.i.h.bf16 %v5969_v54  ;;  %v5970_v57 = vunpack.i.l.bf16 %v5969_v54  ;;  %5715 = vmatprep.mubr.bf16.mxu0 %v6023_v26 }
  0xe0   : > { %v2550_v47 = vsel %vm7030_vm5, %v5960_v10, %v6104_v4  ;;  %v4985_v7 = vmax.f32 %v4977_v49, %v4981_v13  ;;  %v4842_v15 = vmax.f32 %v4834_v43, %v4838_v14  ;;  %v2697_v19 = vmax.f32 %v2689_v27, %v2693_v58 }
  0xe1   : > { %v4703_v22 = vsel %vm7030_vm5, %v5976_v59, %v6104_v4  ;;  %v4560_v50 = vsel %vm7030_vm5, %v5975_v11, %v6104_v4  ;;  %v2415_v51 = vsel %vm7030_vm5, %v5971_v60, %v6104_v4  ;;  %v2272_v23 = vsel %vm7030_vm5, %v5970_v57, %v6104_v4  ;;  %v6026_v16 = vld [vmem:[#allocation22 + $0x68] sm:$0xff]  }
  0xe2   : > { %v6025_v5 = vld [vmem:[#allocation22 + $0x28] sm:$0xff]   ;;  %v5984_v8 = vpop.permute.xlu1 %5983  ;;  %v5979_v63 = vpop.permute.xlu0 %5978  ;;  %v2554_v25 = vmax.f32 %v2546_v48, %v2550_v47  ;;  %5732 = vmatmul.mubr.bf16.gmra.mrb[8].mxu1 %v6026_v16  ;;  %v4564_v6 = vmax.f32 %v4556_v12, %v4560_v50  ;;  %v4707_v36 = vmax.f32 %v4699_v46, %v4703_v22  ;;  %v2276_v37 = vmax.f32 %v2268_v29, %v2272_v23 }
  0xe3   : > { %v5986_v17 = vunpack.i.h.bf16 %v5984_v8  ;;  %v5985_v0 = vunpack.i.l.bf16 %v5984_v8  ;;  %v5981_v24 = vunpack.i.h.bf16 %v5979_v63  ;;  %v5980_v2 = vunpack.i.l.bf16 %v5979_v63  ;;  %5716 = vmatmul.mubr.bf16.gmra.mrb[8].mxu0 %v6025_v5 }
  0xe4   : > { %v2419_v41 = vmax.f32 %v2411_v61, %v2415_v51 }
  0xe5   : > { %v4989_v30 = vsel %vm7030_vm5, %v5986_v17, %v6104_v4  ;;  %v4846_v31 = vsel %vm7030_vm5, %v5985_v0, %v6104_v4  ;;  %v2701_v20 = vsel %vm7030_vm5, %v5981_v24, %v6104_v4  ;;  %v2558_v33 = vsel %vm7030_vm5, %v5980_v2, %v6104_v4  ;;  %v7492_v17 = vld [vmem:[%s7567_s1] ss:$0 sm:$0xff] }
  0xe6   : > { %v5994_v52 = vpop.permute.xlu1 %5993  ;;  %v5989_v38 = vpop.permute.xlu0 %5988  ;;  %v4850_v32 = vmax.f32 %v4842_v15, %v4846_v31  ;;  %v4993_v34 = vmax.f32 %v4985_v7, %v4989_v30  ;;  %v2562_v55 = vmax.f32 %v2554_v25, %v2558_v33  ;;  %v2705_v62 = vmax.f32 %v2697_v19, %v2701_v20 }
  0xe7   : > { %v5996_v39 = vunpack.i.h.bf16 %v5994_v52  ;;  %v5995_v40 = vunpack.i.l.bf16 %v5994_v52  ;;  %v5991_v21 = vunpack.i.h.bf16 %v5989_v38  ;;  %v5990_v53 = vunpack.i.l.bf16 %v5989_v38 }
  0xe9   : > { %v4711_v9 = vsel %vm7030_vm5, %v5996_v39, %v6104_v4  ;;  %v4568_v42 = vsel %vm7030_vm5, %v5995_v40, %v6104_v4  ;;  %v2423_v45 = vsel %vm7030_vm5, %v5991_v21, %v6104_v4  ;;  %v2280_v44 = vsel %vm7030_vm5, %v5990_v53, %v6104_v4 }
  0xea   : > { %v4572_v10 = vmax.f32 %v4564_v6, %v4568_v42  ;;  %v4715_v26 = vmax.f32 %v4707_v36, %v4711_v9  ;;  %v2284_v43 = vmax.f32 %v2276_v37, %v2280_v44  ;;  %v2427_v49 = vmax.f32 %v2419_v41, %v2423_v45  ;;  %v6004_v48 = vpop.permute.xlu1 %6003  ;;  %v5999_v27 = vpop.permute.xlu0 %5998 }
  0xeb   : > { %v6006_v28 = vunpack.i.h.bf16 %v6004_v48  ;;  %v6005_v54 = vunpack.i.l.bf16 %v6004_v48  ;;  %v6001_v56 = vunpack.i.h.bf16 %v5999_v27  ;;  %v6000_v59 = vunpack.i.l.bf16 %v5999_v27 }
  0xec   : > { %v4575_v11 = vpack.c.bf16 %v6042_v35, %v4572_v10  ;;  %v4718_v60 = vpack.c.bf16 %v6042_v35, %v4715_v26  ;;  %v2287_v57 = vpack.c.bf16 %v6042_v35, %v2284_v43  ;;  %v2430_v46 = vpack.c.bf16 %v6042_v35, %v2427_v49 }
  0xed   : > { %v4997_v12 = vsel %vm7030_vm5, %v6006_v28, %v6104_v4  ;;  %v4854_v61 = vsel %vm7030_vm5, %v6005_v54, %v6104_v4  ;;  %v2709_v29 = vsel %vm7030_vm5, %v6001_v56, %v6104_v4  ;;  %v2566_v13 = vsel %vm7030_vm5, %v6000_v59, %v6104_v4 }
  0xee   : > { %4577 = vst [vmem:[#allocation22 + $0x70] sm:$0xf] %v4575_v11  ;;  %4720 = vst [vmem:[#allocation22 + $0x74] sm:$0xf] %v4718_v60  ;;  %v4858_v14 = vmax.f32 %v4850_v32, %v4854_v61  ;;  %v5001_v58 = vmax.f32 %v4993_v34, %v4997_v12  ;;  %v2570_v47 = vmax.f32 %v2562_v55, %v2566_v13 }
  0xef   : > { %2289 = vst [vmem:[#allocation22 + $0x30] sm:$0xf] %v2287_v57  ;;  %2432 = vst [vmem:[#allocation22 + $0x34] sm:$0xf] %v2430_v46  ;;  %v2713_v5 = vmax.f32 %v2705_v62, %v2709_v29 }
  0xf0   : > { %v4861_v22 = vpack.c.bf16 %v6042_v35, %v4858_v14  ;;  %v5004_v50 = vpack.c.bf16 %v6042_v35, %v5001_v58  ;;  %v2573_v51 = vpack.c.bf16 %v6042_v35, %v2570_v47 }
  0xf1   : > { %v2716_v23 = vpack.c.bf16 %v6042_v35, %v2713_v5 }
  0xf2   : > { %4863 = vst [vmem:[#allocation22 + $0x78] sm:$0xf] %v4861_v22  ;;  %5006 = vst [vmem:[#allocation22 + $0x7c] sm:$0xf] %v5004_v50 }
  0xf3   : > { %2575 = vst [vmem:[#allocation22 + $0x38] sm:$0xf] %v2573_v51  ;;  %2718 = vst [vmem:[#allocation22 + $0x3c] sm:$0xf] %v2716_v23 }
  0xf5   : > { %v6028_v8 = vld [vmem:[#allocation22 + $0x70] sm:$0xff]  }
  0xf6   : > { %v6027_v18 = vld [vmem:[#allocation22 + $0x30] sm:$0xff]   ;;  %5735 = vmatprep.mubr.bf16.mxu1 %v6028_v8 }
  0xf7   : > { %5719 = vmatprep.mubr.bf16.mxu0 %v6027_v18 }
  0xf9   : > { %v6030_v16 = vld [vmem:[#allocation22 + $0x78] sm:$0xff]  }
  0xfa   : > { %v6029_v63 = vld [vmem:[#allocation22 + $0x38] sm:$0xff]   ;;  %5736 = vmatmul.mubr.bf16.gmra.mrb[12].mxu1 %v6030_v16 }
  0xfb   : > { %5720 = vmatmul.mubr.bf16.gmra.mrb[12].mxu0 %v6029_v63 }
 0x185   : > { %v5725_v24 = vpop.f32.mrb[0].mxu1 }
 0x186   : > { %v5709_v35 = vpop.f32.mrb[0].mxu0  ;;  %v5314_v7 = vadd.f32 %v5725_v24, %v7492_v17  ;;  %v5305_v19 = vpop.f32.mrb[1].mxu1 }
 0x187   : > { %v5250_v0 = vadd.f32 %v5709_v35, %v7492_v17  ;;  %v5241_v2 = vpop.f32.mrb[1].mxu0  ;;  %v5306_v30 = vadd.f32 %v7492_v17, %v5305_v19  ;;  %v5726_v20 = vpop.f32.mrb[2].mxu1 }
 0x188   : > { %v5242_v15 = vadd.f32 %v7492_v17, %v5241_v2  ;;  %v5710_v25 = vpop.f32.mrb[2].mxu0  ;;  %5386 = vst [vmem:[%s7497_s13 + $0x90] sm:$0xff] %v5314_v7  ;;  %v5317_v6 = vadd.f32 %v5726_v20, %v7492_v17  ;;  %v5308_v37 = vpop.f32.mrb[3].mxu1 }
 0x189   : > { %5370 = vst [vmem:[%s7497_s13 + $0x10] sm:$0xff] %v5250_v0  ;;  %v5253_v31 = vadd.f32 %v5710_v25, %v7492_v17  ;;  %v5244_v33 = vpop.f32.mrb[3].mxu0  ;;  %5384 = vst [vmem:[%s7497_s13 + $0x80] sm:$0xff] %v5306_v30  ;;  %v5309_v41 = vadd.f32 %v7492_v17, %v5308_v37 }
 0x18a   : > { %5368 = vst [vmem:[%s7497_s13] sm:$0xff] %v5242_v15  ;;  %v5245_v36 = vadd.f32 %v7492_v17, %v5244_v33  ;;  %5387 = vst [vmem:[%s7497_s13 + $0x98] sm:$0xff] %v5317_v6 }
 0x18b   : > { %5371 = vst [vmem:[%s7497_s13 + $0x18] sm:$0xff] %v5253_v31  ;;  %5385 = vst [vmem:[%s7497_s13 + $0x88] sm:$0xff] %v5309_v41 }
 0x18c   : > { %5369 = vst [vmem:[%s7497_s13 + $0x8] sm:$0xff] %v5245_v36 }
 0x19d   : > { %v5729_v39 = vpop.f32.mrb[4].mxu1 }
 0x19e   : > { %v5713_v52 = vpop.f32.mrb[4].mxu0  ;;  %v5330_v21 = vadd.f32 %v5729_v39, %v7492_v17  ;;  %v5321_v32 = vpop.f32.mrb[5].mxu1 }
 0x19f   : > { %v5266_v38 = vadd.f32 %v5713_v52, %v7492_v17  ;;  %v5257_v40 = vpop.f32.mrb[5].mxu0  ;;  %v5322_v55 = vadd.f32 %v7492_v17, %v5321_v32  ;;  %v5730_v9 = vpop.f32.mrb[6].mxu1 }
 0x1a0   : > { %v5258_v53 = vadd.f32 %v7492_v17, %v5257_v40  ;;  %v5714_v34 = vpop.f32.mrb[6].mxu0  ;;  %5390 = vst [vmem:[%s7497_s13 + $0xb0] sm:$0xff] %v5330_v21  ;;  %v5333_v45 = vadd.f32 %v5730_v9, %v7492_v17  ;;  %v5324_v10 = vpop.f32.mrb[7].mxu1 }
 0x1a1   : > { %5374 = vst [vmem:[%s7497_s13 + $0x30] sm:$0xff] %v5266_v38  ;;  %v5269_v62 = vadd.f32 %v5714_v34, %v7492_v17  ;;  %v5260_v42 = vpop.f32.mrb[7].mxu0  ;;  %5388 = vst [vmem:[%s7497_s13 + $0xa0] sm:$0xff] %v5322_v55  ;;  %v5325_v26 = vadd.f32 %v7492_v17, %v5324_v10 }
 0x1a2   : > { %5372 = vst [vmem:[%s7497_s13 + $0x20] sm:$0xff] %v5258_v53  ;;  %v5261_v44 = vadd.f32 %v7492_v17, %v5260_v42  ;;  %5391 = vst [vmem:[%s7497_s13 + $0xb8] sm:$0xff] %v5333_v45 }
 0x1a3   : > { %5375 = vst [vmem:[%s7497_s13 + $0x38] sm:$0xff] %v5269_v62  ;;  %5389 = vst [vmem:[%s7497_s13 + $0xa8] sm:$0xff] %v5325_v26 }
 0x1a4   : > { %5373 = vst [vmem:[%s7497_s13 + $0x28] sm:$0xff] %v5261_v44 }
 0x1b5   : > { %v5733_v48 = vpop.f32.mrb[8].mxu1 }
 0x1b6   : > { %v5717_v43 = vpop.f32.mrb[8].mxu0  ;;  %v5346_v28 = vadd.f32 %v5733_v48, %v7492_v17  ;;  %v5337_v56 = vpop.f32.mrb[9].mxu1 }
 0x1b7   : > { %v5282_v49 = vadd.f32 %v5717_v43, %v7492_v17  ;;  %v5273_v27 = vpop.f32.mrb[9].mxu0  ;;  %v5338_v11 = vadd.f32 %v7492_v17, %v5337_v56  ;;  %v5734_v57 = vpop.f32.mrb[10].mxu1 }
 0x1b8   : > { %v5274_v54 = vadd.f32 %v7492_v17, %v5273_v27  ;;  %v5718_v59 = vpop.f32.mrb[10].mxu0  ;;  %5394 = vst [vmem:[%s7497_s13 + $0xd0] sm:$0xff] %v5346_v28  ;;  %v5349_v12 = vadd.f32 %v5734_v57, %v7492_v17  ;;  %v5340_v29 = vpop.f32.mrb[11].mxu1 }
 0x1b9   : > { %5378 = vst [vmem:[%s7497_s13 + $0x50] sm:$0xff] %v5282_v49  ;;  %v5285_v60 = vadd.f32 %v5718_v59, %v7492_v17  ;;  %v5276_v46 = vpop.f32.mrb[11].mxu0  ;;  %5392 = vst [vmem:[%s7497_s13 + $0xc0] sm:$0xff] %v5338_v11  ;;  %v5341_v13 = vadd.f32 %v7492_v17, %v5340_v29 }
 0x1ba   : > { %5376 = vst [vmem:[%s7497_s13 + $0x40] sm:$0xff] %v5274_v54  ;;  %v5277_v61 = vadd.f32 %v7492_v17, %v5276_v46  ;;  %5395 = vst [vmem:[%s7497_s13 + $0xd8] sm:$0xff] %v5349_v12 }
 0x1bb   : > { %5379 = vst [vmem:[%s7497_s13 + $0x58] sm:$0xff] %v5285_v60  ;;  %5393 = vst [vmem:[%s7497_s13 + $0xc8] sm:$0xff] %v5341_v13 }
 0x1bc   : > { %5377 = vst [vmem:[%s7497_s13 + $0x48] sm:$0xff] %v5277_v61 }
 0x1cd   : > { %v5737_v47 = vpop.f32.mrb[12].mxu1 }
 0x1ce   : > { %v5721_v14 = vpop.f32.mrb[12].mxu0  ;;  %v5362_v22 = vadd.f32 %v5737_v47, %v7492_v17  ;;  %v5353_v51 = vpop.f32.mrb[13].mxu1 }
 0x1cf   : > { %v5298_v58 = vadd.f32 %v5721_v14, %v7492_v17  ;;  %v5289_v5 = vpop.f32.mrb[13].mxu0  ;;  %v5354_v18 = vadd.f32 %v7492_v17, %v5353_v51  ;;  %v5738_v63 = vpop.f32.mrb[14].mxu1 }
 0x1d0   : > { %v5290_v50 = vadd.f32 %v7492_v17, %v5289_v5  ;;  %v5722_v23 = vpop.f32.mrb[14].mxu0  ;;  %5398 = vst [vmem:[%s7497_s13 + $0xf0] sm:$0xff] %v5362_v22  ;;  %v5365_v35 = vadd.f32 %v5738_v63, %v7492_v17  ;;  %v5356_v24 = vpop.f32.mrb[15].mxu1 }
 0x1d1   : > { %5382 = vst [vmem:[%s7497_s13 + $0x70] sm:$0xff] %v5298_v58  ;;  %v5301_v8 = vadd.f32 %v5722_v23, %v7492_v17  ;;  %v5292_v16 = vpop.f32.mrb[15].mxu0  ;;  %5396 = vst [vmem:[%s7497_s13 + $0xe0] sm:$0xff] %v5354_v18  ;;  %v5357_v2 = vadd.f32 %v7492_v17, %v5356_v24 }
 0x1d2   : > { %5380 = vst [vmem:[%s7497_s13 + $0x60] sm:$0xff] %v5290_v50  ;;  %v5293_v0 = vadd.f32 %v7492_v17, %v5292_v16  ;;  %5399 = vst [vmem:[%s7497_s13 + $0xf8] sm:$0xff] %v5365_v35 }
 0x1d3   : > { %5383 = vst [vmem:[%s7497_s13 + $0x78] sm:$0xff] %v5301_v8  ;;  %5397 = vst [vmem:[%s7497_s13 + $0xe8] sm:$0xff] %v5357_v2 }
 0x1d4   : > { %5381 = vst [vmem:[%s7497_s13 + $0x68] sm:$0xff] %v5293_v0 }
 0x1d5 PF: > { %s45_s15 = sadd.s32 1, %s6037_s15  }
 0x1d6   : > { %p42_p4 = scmp.ge.s32.totalorder %s45_s15, 4  }
 0x1d8   :  { %44 = sbr.rel (!%p42_p4) target bundleno = 3 (0x3), region = 331 }

</bundles_post_ra>
